<compile_context>
chip_gen: v6e
topology: v6e:2x2x1
jax: 0.10.0
libtpu: 0.0.40
codegen_flags: <defaults>
</compile_context>

<pallas_src>
import numpy as np
import jax
import jax.numpy as jnp
from jax.experimental import pallas as pl
from jax.experimental.pallas import tpu as pltpu

WEIGHT_BIT = 8
ACT_BIT = 8
KH = KW = 5
STRIDE = 2
PAD = 2


def _conv_out(n):
    return (n + 2 * PAD - KH) // STRIDE + 1


def batch_frexp_np(x, max_bit=31):
    """HAWQ batch_frexp: integer mantissa (ROUND_HALF_UP to 31 bits) + exponent."""
    m, e = np.frexp(np.asarray(x, dtype=np.float64))
    m_int = np.floor(m * (2.0 ** max_bit) + 0.5)          # scales are > 0
    return m_int, (np.float64(max_bit) - e)


# --------------------- one-time parameter preparation -------------------------

def prepare_ga_params(params, ga_left):
    """Quantize weights/biases (per-output-channel symmetric 8-bit) and fold all
    per-channel rescales into (ratio, bias*ratio).  Pure numpy; run once."""
    s0 = float(params["input_range"]) / (2.0 ** (ACT_BIT - 1) - 1)
    n = 2.0 ** (WEIGHT_BIT - 1) - 1                        # 127
    act_scale = s0
    stages = []
    for k in range(4):
        w = np.asarray(params[f"w{k + 1}"], np.float64)    # (Cout, Cin, 5, 5)
        b = np.asarray(params[f"b{k + 1}"], np.float64)
        cout, cin = w.shape[0], w.shape[1]
        w_absmax = np.maximum(np.abs(w.reshape(cout, -1)).max(axis=1), 1e-8)
        w_scale = w_absmax / n
        # TODO(synk): some HAWQ variants clamp weights to symmetric [-127, 127].
        w_int = np.clip(np.round(w / w_scale[:, None, None, None]), -n - 1, n)
        bias_scale = w_scale * act_scale                   # per output channel
        b_int = np.round(b / bias_scale)
        if k < 3:
            # ReLU -> asymmetric QuantAct with zero point 0, range [0, 255]
            act_scale_out = float(params[f"act_range{k + 1}"]) / (2.0 ** ACT_BIT - 1)
            m_int, e = batch_frexp_np(bias_scale / act_scale_out)
            ratio = m_int * (2.0 ** (-e))
            act_scale = act_scale_out
        else:
            # final: m,e = batch_frexp(act_sf*w_sf); out = round(x*m / 2**(e-ga_left))
            m_int, e = batch_frexp_np(bias_scale)
            ratio = m_int * (2.0 ** (ga_left - e))
        br = b_int * ratio                                 # folded bias (review)
        # im2col weight layout, row index = (i*KW + j)*Cin + c  -> (25*Cin, Cout)
        wmat = np.transpose(w_int, (2, 3, 1, 0)).reshape(KH * KW * cin, cout)
        stages.append({
            "w": jnp.asarray(wmat, jnp.bfloat16),          # int8-range: exact in bf16
            "rs": jnp.asarray(np.stack([ratio, br]).astype(np.float32)),  # (2, Cout)
        })
    return {"s0": jnp.float32(s0), "stages": stages}


# ------------------------------ fused kernel ----------------------------------

def _make_kernel(dims):
    """dims: 4 tuples (Hin, Win, Cin, Ho, Wo, Cout), one per conv stage."""

    def _sel(start, size):
        # strided tap selection; plain slice when the extent is 1
        return pl.ds(start, size, stride=STRIDE) if size > 1 else pl.ds(start, 1)

    def kernel(x_ref, w1, rs1, w2, rs2, w3, rs3, w4, rs4, o_ref, a1, a2, a3, a4):
        acts = (a1, a2, a3, a4)
        ws = (w1, w2, w3, w4)
        rss = (rs1, rs2, rs3, rs4)

        def write_padded(a_ref, val, hin, win):
            # zero border + interior write == the conv's zero padding
            a_ref[...] = jnp.zeros(a_ref.shape, a_ref.dtype)
            a_ref[PAD:PAD + hin, PAD:PAD + win, :] = val

        # stage-1 padded input (input QuantAct already applied; bf16 on the wire)
        write_padded(a1, x_ref[...].astype(jnp.float32), dims[0][0], dims[0][1])

        q = None
        for k in range(4):
            hin, win, cin, ho, wo, cout = dims[k]
            a_ref, w_ref, rs_ref = acts[k], ws[k], rss[k]
            if k > 0:
                q3 = q.reshape(dims[k - 1][3], dims[k - 1][4], cin)
                write_padded(a_ref, q3, hin, win)

            # fused im2col: 25 strided VMEM reads -> (Ho*Wo, 25*Cin) patch tile
            cols = []
            for i in range(KH):
                for j in range(KW):
                    p = a_ref[_sel(i, ho), _sel(j, wo), :]          # (ho, wo, cin)
                    cols.append(p.reshape(ho * wo, cin))
            pmat = jnp.concatenate(cols, axis=1).astype(jnp.bfloat16)

            # bf16 x bf16 MXU products are exact for 8-bit-range operands and
            # accumulate in f32 (exact while |sum| < 2^24, i.e. Cin <= ~20).
            acc = jnp.dot(pmat, w_ref[...], preferred_element_type=jnp.float32)

            ratio = rs_ref[0:1, :]                                   # (1, Cout)
            br = rs_ref[1:2, :]                                      # b_int * ratio
            y = acc * ratio + br        # == (acc + b_int) * ratio   (ratio > 0)
            if k < 3:
                y = jnp.maximum(y, 0.0)                              # ReLU
                q = jnp.clip(jnp.round(y), 0.0, 2.0 ** ACT_BIT - 1)  # QuantAct
            else:
                q = jnp.round(y)                                     # dyadic<<ga_left
        o_ref[...] = q.astype(o_ref.dtype)

    return kernel


# ------------------------------ forward pass ----------------------------------

def _ga_forward(x_nchw, prep):
    b, cin, h, w = x_nchw.shape
    stages = prep["stages"]
    couts = [int(s["w"].shape[1]) for s in stages]

    dims = []
    hi, wi, ci = h, w, cin
    for k in range(4):
        ho, wo = _conv_out(hi), _conv_out(wi)
        dims.append((hi, wi, ci, ho, wo, couts[k]))
        hi, wi, ci = ho, wo, couts[k]
    r4, m = dims[3][3] * dims[3][4], couts[3]

    # Input QuantAct (symmetric, 8-bit) on the tiny raw NHWC tensor; quantized
    # ints travel as bf16 (exact), halving the kernel's input DMA bytes.
    # TODO(synk): reference clamp assumed [-128, 127]; some variants use [-127,127].
    qmax = 2.0 ** (ACT_BIT - 1) - 1
    x = jnp.transpose(x_nchw.astype(jnp.float32), (0, 2, 3, 1))     # NCHW -> NHWC
    xq = jnp.clip(jnp.round(x / prep["s0"]), -qmax - 1.0, qmax).astype(jnp.bfloat16)

    in_specs = [pl.BlockSpec((None, h, w, cin), lambda i: (i, 0, 0, 0))]
    operands = [xq]
    for k in range(4):
        wk, rsk = stages[k]["w"], stages[k]["rs"]
        in_specs.append(pl.BlockSpec(wk.shape, lambda i: (0, 0)))   # VMEM-resident
        in_specs.append(pl.BlockSpec(rsk.shape, lambda i: (0, 0)))  # VMEM-resident
        operands.extend([wk, rsk])

    # one zero-padded activation scratch per stage (all stay in VMEM)
    scratch = [pltpu.VMEM((dims[k][0] + 2 * PAD, dims[k][1] + 2 * PAD, dims[k][2]),
                          jnp.float32) for k in range(4)]

    out = pl.pallas_call(
        _make_kernel(tuple(dims)),
        out_shape=jax.ShapeDtypeStruct((b, r4, m), jnp.float32),
        grid=(b,),                                   # >= 2 -> both v7x TCs busy
        in_specs=in_specs,
        out_specs=pl.BlockSpec((None, r4, m), lambda i: (i, 0, 0)),
        scratch_shapes=scratch,
        compiler_params=pltpu.CompilerParams(
            dimension_semantics=("parallel",)),
    )(*operands)

    out = out.reshape(b, dims[3][3], dims[3][4], m)
    return jnp.transpose(out, (0, 3, 1, 2))                          # NHWC -> NCHW


g_a_forward = jax.jit(_ga_forward)


# ---------------------------------- main ---------------------------------------

if __name__ == "__main__":
    key = jax.random.PRNGKey(0)
    Nch, Mch, Cin = 8, 16, 3
    k = jax.random.split(key, 9)

    def winit(kk, co, ci):
        return np.asarray(jax.random.normal(kk, (co, ci, KH, KW), jnp.float32)
                          ) / np.sqrt(ci * KH * KW)

    params = {
        "w1": winit(k[0], Nch, Cin),
        "b1": 0.05 * np.asarray(jax.random.normal(k[1], (Nch,), jnp.float32)),
        "w2": winit(k[2], Nch, Nch),
        "b2": 0.05 * np.asarray(jax.random.normal(k[3], (Nch,), jnp.float32)),
        "w3": winit(k[4], Nch, Nch),
        "b3": 0.05 * np.asarray(jax.random.normal(k[5], (Nch,), jnp.float32)),
        "w4": winit(k[6], Mch, Nch),
        "b4": 0.05 * np.asarray(jax.random.normal(k[7], (Mch,), jnp.float32)),
        # fixed (calibration-style) activation ranges for the QuantAct modules
        "input_range": 2.5,
        "act_range1": 3.0,
        "act_range2": 3.0,
        "act_range3": 3.0,
    }

    x = jax.random.normal(k[8], (2, Cin, 16, 16), jnp.float32)       # NCHW input
    prep = prepare_ga_params(params, ga_left=16)                     # one-time prep
    out = g_a_forward(x, prep)
    out = jax.block_until_ready(out)
    assert out.shape == (2, Mch, 1, 1) and out.dtype == jnp.float32
    print("KERNEL_OK")
</pallas_src>

<mosaic_0001>
module attributes {stable_mosaic.version = 11 : i64} {
  func.func @kernel(%arg0: i32, %arg1: memref<1x16x16x3xbf16, #tpu.memory_space<vmem>>, %arg2: memref<75x8xbf16, #tpu.memory_space<vmem>>, %arg3: memref<2x8xf32, #tpu.memory_space<vmem>>, %arg4: memref<200x8xbf16, #tpu.memory_space<vmem>>, %arg5: memref<2x8xf32, #tpu.memory_space<vmem>>, %arg6: memref<200x8xbf16, #tpu.memory_space<vmem>>, %arg7: memref<2x8xf32, #tpu.memory_space<vmem>>, %arg8: memref<200x16xbf16, #tpu.memory_space<vmem>>, %arg9: memref<2x16xf32, #tpu.memory_space<vmem>>, %arg10: memref<1x1x16xf32, #tpu.memory_space<vmem>>, %arg11: memref<20x20x3xf32, #tpu.memory_space<vmem>>, %arg12: memref<12x12x8xf32, #tpu.memory_space<vmem>>, %arg13: memref<8x8x8xf32, #tpu.memory_space<vmem>>, %arg14: memref<6x6x8xf32, #tpu.memory_space<vmem>>) attributes {dimension_semantics = [#tpu.dimension_semantics<parallel>], iteration_bounds = array<i64: 2>, scalar_prefetch = 0 : i64, scratch_operands = 4 : i64, tpu.core_type = #tpu.core_type<tc>, window_params = [{transform_indices = @transform_0, window_bounds = array<i64: 1, 16, 16, 3>}, {pipeline_mode = #tpu.pipeline_mode<synchronous>, transform_indices = @transform_1, window_bounds = array<i64: 75, 8>}, {pipeline_mode = #tpu.pipeline_mode<synchronous>, transform_indices = @transform_2, window_bounds = array<i64: 2, 8>}, {pipeline_mode = #tpu.pipeline_mode<synchronous>, transform_indices = @transform_3, window_bounds = array<i64: 200, 8>}, {pipeline_mode = #tpu.pipeline_mode<synchronous>, transform_indices = @transform_4, window_bounds = array<i64: 2, 8>}, {pipeline_mode = #tpu.pipeline_mode<synchronous>, transform_indices = @transform_5, window_bounds = array<i64: 200, 8>}, {pipeline_mode = #tpu.pipeline_mode<synchronous>, transform_indices = @transform_6, window_bounds = array<i64: 2, 8>}, {pipeline_mode = #tpu.pipeline_mode<synchronous>, transform_indices = @transform_7, window_bounds = array<i64: 200, 16>}, {pipeline_mode = #tpu.pipeline_mode<synchronous>, transform_indices = @transform_8, window_bounds = array<i64: 2, 16>}, {transform_indices = @transform_9, window_bounds = array<i64: 1, 1, 16>}]} {
    %c0 = arith.constant 0 : index
    %c0_0 = arith.constant 0 : index
    %c0_1 = arith.constant 0 : index
    %c0_2 = arith.constant 0 : index
    %0 = vector.load %arg1[%c0, %c0_0, %c0_1, %c0_2] : memref<1x16x16x3xbf16, #tpu.memory_space<vmem>>, vector<1x16x16x3xbf16>
    %1 = vector.shape_cast %0 : vector<1x16x16x3xbf16> to vector<16x16x3xbf16>
    %2 = arith.extf %1 : vector<16x16x3xbf16> to vector<16x16x3xf32>
    %cst = arith.constant 0.000000e+00 : f32
    %3 = vector.broadcast %cst : f32 to vector<20x20x3xf32>
    %c0_3 = arith.constant 0 : index
    %c0_4 = arith.constant 0 : index
    %c0_5 = arith.constant 0 : index
    %4 = vector.load %arg11[%c0_3, %c0_4, %c0_5] : memref<20x20x3xf32, #tpu.memory_space<vmem>>, vector<20x20x3xf32>
    tpu.vector_store %arg11[%c0_3, %c0_4, %c0_5], %3 {strides = array<i32>} : memref<20x20x3xf32, #tpu.memory_space<vmem>>, vector<20x20x3xf32>,
    %c2 = arith.constant 2 : index
    %c2_6 = arith.constant 2 : index
    %c0_7 = arith.constant 0 : index
    %5 = vector.load %arg11[%c2, %c2_6, %c0_7] : memref<20x20x3xf32, #tpu.memory_space<vmem>>, vector<16x16x3xf32>
    tpu.vector_store %arg11[%c2, %c2_6, %c0_7], %2 {strides = array<i32>} : memref<20x20x3xf32, #tpu.memory_space<vmem>>, vector<16x16x3xf32>,
    %c0_8 = arith.constant 0 : index
    %c0_9 = arith.constant 0 : index
    %c0_10 = arith.constant 0 : index
    %6 = tpu.strided_load %arg11[%c0_8, %c0_9, %c0_10] {strides = array<i32: 2, 2, 1>} : memref<20x20x3xf32, #tpu.memory_space<vmem>>, vector<8x8x3xf32>
    %7 = vector.shape_cast %6 : vector<8x8x3xf32> to vector<64x3xf32>
    %c0_11 = arith.constant 0 : index
    %c1 = arith.constant 1 : index
    %c0_12 = arith.constant 0 : index
    %8 = tpu.strided_load %arg11[%c0_11, %c1, %c0_12] {strides = array<i32: 2, 2, 1>} : memref<20x20x3xf32, #tpu.memory_space<vmem>>, vector<8x8x3xf32>
    %9 = vector.shape_cast %8 : vector<8x8x3xf32> to vector<64x3xf32>
    %c0_13 = arith.constant 0 : index
    %c2_14 = arith.constant 2 : index
    %c0_15 = arith.constant 0 : index
    %10 = tpu.strided_load %arg11[%c0_13, %c2_14, %c0_15] {strides = array<i32: 2, 2, 1>} : memref<20x20x3xf32, #tpu.memory_space<vmem>>, vector<8x8x3xf32>
    %11 = vector.shape_cast %10 : vector<8x8x3xf32> to vector<64x3xf32>
    %c0_16 = arith.constant 0 : index
    %c3 = arith.constant 3 : index
    %c0_17 = arith.constant 0 : index
    %12 = tpu.strided_load %arg11[%c0_16, %c3, %c0_17] {strides = array<i32: 2, 2, 1>} : memref<20x20x3xf32, #tpu.memory_space<vmem>>, vector<8x8x3xf32>
    %13 = vector.shape_cast %12 : vector<8x8x3xf32> to vector<64x3xf32>
    %c0_18 = arith.constant 0 : index
    %c4 = arith.constant 4 : index
    %c0_19 = arith.constant 0 : index
    %14 = tpu.strided_load %arg11[%c0_18, %c4, %c0_19] {strides = array<i32: 2, 2, 1>} : memref<20x20x3xf32, #tpu.memory_space<vmem>>, vector<8x8x3xf32>
    %15 = vector.shape_cast %14 : vector<8x8x3xf32> to vector<64x3xf32>
    %c1_20 = arith.constant 1 : index
    %c0_21 = arith.constant 0 : index
    %c0_22 = arith.constant 0 : index
    %16 = tpu.strided_load %arg11[%c1_20, %c0_21, %c0_22] {strides = array<i32: 2, 2, 1>} : memref<20x20x3xf32, #tpu.memory_space<vmem>>, vector<8x8x3xf32>
    %17 = vector.shape_cast %16 : vector<8x8x3xf32> to vector<64x3xf32>
    %c1_23 = arith.constant 1 : index
    %c1_24 = arith.constant 1 : index
    %c0_25 = arith.constant 0 : index
    %18 = tpu.strided_load %arg11[%c1_23, %c1_24, %c0_25] {strides = array<i32: 2, 2, 1>} : memref<20x20x3xf32, #tpu.memory_space<vmem>>, vector<8x8x3xf32>
    %19 = vector.shape_cast %18 : vector<8x8x3xf32> to vector<64x3xf32>
    %c1_26 = arith.constant 1 : index
    %c2_27 = arith.constant 2 : index
    %c0_28 = arith.constant 0 : index
    %20 = tpu.strided_load %arg11[%c1_26, %c2_27, %c0_28] {strides = array<i32: 2, 2, 1>} : memref<20x20x3xf32, #tpu.memory_space<vmem>>, vector<8x8x3xf32>
    %21 = vector.shape_cast %20 : vector<8x8x3xf32> to vector<64x3xf32>
    %c1_29 = arith.constant 1 : index
    %c3_30 = arith.constant 3 : index
    %c0_31 = arith.constant 0 : index
    %22 = tpu.strided_load %arg11[%c1_29, %c3_30, %c0_31] {strides = array<i32: 2, 2, 1>} : memref<20x20x3xf32, #tpu.memory_space<vmem>>, vector<8x8x3xf32>
    %23 = vector.shape_cast %22 : vector<8x8x3xf32> to vector<64x3xf32>
    %c1_32 = arith.constant 1 : index
    %c4_33 = arith.constant 4 : index
    %c0_34 = arith.constant 0 : index
    %24 = tpu.strided_load %arg11[%c1_32, %c4_33, %c0_34] {strides = array<i32: 2, 2, 1>} : memref<20x20x3xf32, #tpu.memory_space<vmem>>, vector<8x8x3xf32>
    %25 = vector.shape_cast %24 : vector<8x8x3xf32> to vector<64x3xf32>
    %c2_35 = arith.constant 2 : index
    %c0_36 = arith.constant 0 : index
    %c0_37 = arith.constant 0 : index
    %26 = tpu.strided_load %arg11[%c2_35, %c0_36, %c0_37] {strides = array<i32: 2, 2, 1>} : memref<20x20x3xf32, #tpu.memory_space<vmem>>, vector<8x8x3xf32>
    %27 = vector.shape_cast %26 : vector<8x8x3xf32> to vector<64x3xf32>
    %c2_38 = arith.constant 2 : index
    %c1_39 = arith.constant 1 : index
    %c0_40 = arith.constant 0 : index
    %28 = tpu.strided_load %arg11[%c2_38, %c1_39, %c0_40] {strides = array<i32: 2, 2, 1>} : memref<20x20x3xf32, #tpu.memory_space<vmem>>, vector<8x8x3xf32>
    %29 = vector.shape_cast %28 : vector<8x8x3xf32> to vector<64x3xf32>
    %c2_41 = arith.constant 2 : index
    %c2_42 = arith.constant 2 : index
    %c0_43 = arith.constant 0 : index
    %30 = tpu.strided_load %arg11[%c2_41, %c2_42, %c0_43] {strides = array<i32: 2, 2, 1>} : memref<20x20x3xf32, #tpu.memory_space<vmem>>, vector<8x8x3xf32>
    %31 = vector.shape_cast %30 : vector<8x8x3xf32> to vector<64x3xf32>
    %c2_44 = arith.constant 2 : index
    %c3_45 = arith.constant 3 : index
    %c0_46 = arith.constant 0 : index
    %32 = tpu.strided_load %arg11[%c2_44, %c3_45, %c0_46] {strides = array<i32: 2, 2, 1>} : memref<20x20x3xf32, #tpu.memory_space<vmem>>, vector<8x8x3xf32>
    %33 = vector.shape_cast %32 : vector<8x8x3xf32> to vector<64x3xf32>
    %c2_47 = arith.constant 2 : index
    %c4_48 = arith.constant 4 : index
    %c0_49 = arith.constant 0 : index
    %34 = tpu.strided_load %arg11[%c2_47, %c4_48, %c0_49] {strides = array<i32: 2, 2, 1>} : memref<20x20x3xf32, #tpu.memory_space<vmem>>, vector<8x8x3xf32>
    %35 = vector.shape_cast %34 : vector<8x8x3xf32> to vector<64x3xf32>
    %c3_50 = arith.constant 3 : index
    %c0_51 = arith.constant 0 : index
    %c0_52 = arith.constant 0 : index
    %36 = tpu.strided_load %arg11[%c3_50, %c0_51, %c0_52] {strides = array<i32: 2, 2, 1>} : memref<20x20x3xf32, #tpu.memory_space<vmem>>, vector<8x8x3xf32>
    %37 = vector.shape_cast %36 : vector<8x8x3xf32> to vector<64x3xf32>
    %c3_53 = arith.constant 3 : index
    %c1_54 = arith.constant 1 : index
    %c0_55 = arith.constant 0 : index
    %38 = tpu.strided_load %arg11[%c3_53, %c1_54, %c0_55] {strides = array<i32: 2, 2, 1>} : memref<20x20x3xf32, #tpu.memory_space<vmem>>, vector<8x8x3xf32>
    %39 = vector.shape_cast %38 : vector<8x8x3xf32> to vector<64x3xf32>
    %c3_56 = arith.constant 3 : index
    %c2_57 = arith.constant 2 : index
    %c0_58 = arith.constant 0 : index
    %40 = tpu.strided_load %arg11[%c3_56, %c2_57, %c0_58] {strides = array<i32: 2, 2, 1>} : memref<20x20x3xf32, #tpu.memory_space<vmem>>, vector<8x8x3xf32>
    %41 = vector.shape_cast %40 : vector<8x8x3xf32> to vector<64x3xf32>
    %c3_59 = arith.constant 3 : index
    %c3_60 = arith.constant 3 : index
    %c0_61 = arith.constant 0 : index
    %42 = tpu.strided_load %arg11[%c3_59, %c3_60, %c0_61] {strides = array<i32: 2, 2, 1>} : memref<20x20x3xf32, #tpu.memory_space<vmem>>, vector<8x8x3xf32>
    %43 = vector.shape_cast %42 : vector<8x8x3xf32> to vector<64x3xf32>
    %c3_62 = arith.constant 3 : index
    %c4_63 = arith.constant 4 : index
    %c0_64 = arith.constant 0 : index
    %44 = tpu.strided_load %arg11[%c3_62, %c4_63, %c0_64] {strides = array<i32: 2, 2, 1>} : memref<20x20x3xf32, #tpu.memory_space<vmem>>, vector<8x8x3xf32>
    %45 = vector.shape_cast %44 : vector<8x8x3xf32> to vector<64x3xf32>
    %c4_65 = arith.constant 4 : index
    %c0_66 = arith.constant 0 : index
    %c0_67 = arith.constant 0 : index
    %46 = tpu.strided_load %arg11[%c4_65, %c0_66, %c0_67] {strides = array<i32: 2, 2, 1>} : memref<20x20x3xf32, #tpu.memory_space<vmem>>, vector<8x8x3xf32>
    %47 = vector.shape_cast %46 : vector<8x8x3xf32> to vector<64x3xf32>
    %c4_68 = arith.constant 4 : index
    %c1_69 = arith.constant 1 : index
    %c0_70 = arith.constant 0 : index
    %48 = tpu.strided_load %arg11[%c4_68, %c1_69, %c0_70] {strides = array<i32: 2, 2, 1>} : memref<20x20x3xf32, #tpu.memory_space<vmem>>, vector<8x8x3xf32>
    %49 = vector.shape_cast %48 : vector<8x8x3xf32> to vector<64x3xf32>
    %c4_71 = arith.constant 4 : index
    %c2_72 = arith.constant 2 : index
    %c0_73 = arith.constant 0 : index
    %50 = tpu.strided_load %arg11[%c4_71, %c2_72, %c0_73] {strides = array<i32: 2, 2, 1>} : memref<20x20x3xf32, #tpu.memory_space<vmem>>, vector<8x8x3xf32>
    %51 = vector.shape_cast %50 : vector<8x8x3xf32> to vector<64x3xf32>
    %c4_74 = arith.constant 4 : index
    %c3_75 = arith.constant 3 : index
    %c0_76 = arith.constant 0 : index
    %52 = tpu.strided_load %arg11[%c4_74, %c3_75, %c0_76] {strides = array<i32: 2, 2, 1>} : memref<20x20x3xf32, #tpu.memory_space<vmem>>, vector<8x8x3xf32>
    %53 = vector.shape_cast %52 : vector<8x8x3xf32> to vector<64x3xf32>
    %c4_77 = arith.constant 4 : index
    %c4_78 = arith.constant 4 : index
    %c0_79 = arith.constant 0 : index
    %54 = tpu.strided_load %arg11[%c4_77, %c4_78, %c0_79] {strides = array<i32: 2, 2, 1>} : memref<20x20x3xf32, #tpu.memory_space<vmem>>, vector<8x8x3xf32>
    %55 = vector.shape_cast %54 : vector<8x8x3xf32> to vector<64x3xf32>
    %56 = tpu.concatenate %7, %9, %11, %13, %15, %17, %19, %21, %23, %25, %27, %29, %31, %33, %35, %37 in 1 : vector<64x3xf32>, vector<64x3xf32>, vector<64x3xf32>, vector<64x3xf32>, vector<64x3xf32>, vector<64x3xf32>, vector<64x3xf32>, vector<64x3xf32>, vector<64x3xf32>, vector<64x3xf32>, vector<64x3xf32>, vector<64x3xf32>, vector<64x3xf32>, vector<64x3xf32>, vector<64x3xf32>, vector<64x3xf32> -> vector<64x48xf32>
    %57 = tpu.concatenate %39, %41, %43, %45, %47, %49, %51, %53, %55 in 1 : vector<64x3xf32>, vector<64x3xf32>, vector<64x3xf32>, vector<64x3xf32>, vector<64x3xf32>, vector<64x3xf32>, vector<64x3xf32>, vector<64x3xf32>, vector<64x3xf32> -> vector<64x27xf32>
    %58 = tpu.concatenate %56, %57 in 1 : vector<64x48xf32>, vector<64x27xf32> -> vector<64x75xf32>
    %59 = arith.truncf %58 : vector<64x75xf32> to vector<64x75xbf16>
    %c0_80 = arith.constant 0 : index
    %c0_81 = arith.constant 0 : index
    %60 = vector.load %arg2[%c0_80, %c0_81] : memref<75x8xbf16, #tpu.memory_space<vmem>>, vector<75x8xbf16>
    %cst_82 = arith.constant dense<0.000000e+00> : vector<64x8xf32>
    %61 = tpu.matmul %59, %60, %cst_82 {dimension_numbers = #tpu.dot_dimension_numbers<[1], [0], [0], [1], [0, 0, 1, 1], [], []>} : vector<64x75xbf16>, vector<75x8xbf16>, vector<64x8xf32> -> vector<64x8xf32>
    %c0_83 = arith.constant 0 : index
    %c0_84 = arith.constant 0 : index
    %62 = vector.load %arg3[%c0_83, %c0_84] : memref<2x8xf32, #tpu.memory_space<vmem>>, vector<1x8xf32>
    %c1_85 = arith.constant 1 : index
    %c0_86 = arith.constant 0 : index
    %63 = vector.load %arg3[%c1_85, %c0_86] : memref<2x8xf32, #tpu.memory_space<vmem>>, vector<1x8xf32>
    %64 = vector.broadcast %62 : vector<1x8xf32> to vector<64x8xf32>
    %65 = arith.mulf %61, %64 : vector<64x8xf32>
    %66 = vector.broadcast %63 : vector<1x8xf32> to vector<64x8xf32>
    %67 = arith.addf %65, %66 : vector<64x8xf32>
    %cst_87 = arith.constant 0.000000e+00 : f32
    %68 = vector.broadcast %cst_87 : f32 to vector<64x8xf32>
    %69 = arith.maximumf %67, %68 : vector<64x8xf32>
    %70 = math.roundeven %69 : vector<64x8xf32>
    %cst_88 = arith.constant 0.000000e+00 : f32
    %cst_89 = arith.constant 2.550000e+02 : f32
    %71 = vector.broadcast %cst_88 : f32 to vector<64x8xf32>
    %72 = arith.maximumf %71, %70 : vector<64x8xf32>
    %73 = vector.broadcast %cst_89 : f32 to vector<64x8xf32>
    %74 = arith.minimumf %73, %72 : vector<64x8xf32>
    %75 = vector.shape_cast %74 : vector<64x8xf32> to vector<8x8x8xf32>
    %cst_90 = arith.constant 0.000000e+00 : f32
    %76 = vector.broadcast %cst_90 : f32 to vector<12x12x8xf32>
    %c0_91 = arith.constant 0 : index
    %c0_92 = arith.constant 0 : index
    %c0_93 = arith.constant 0 : index
    %77 = vector.load %arg12[%c0_91, %c0_92, %c0_93] : memref<12x12x8xf32, #tpu.memory_space<vmem>>, vector<12x12x8xf32>
    tpu.vector_store %arg12[%c0_91, %c0_92, %c0_93], %76 {strides = array<i32>} : memref<12x12x8xf32, #tpu.memory_space<vmem>>, vector<12x12x8xf32>,
    %c2_94 = arith.constant 2 : index
    %c2_95 = arith.constant 2 : index
    %c0_96 = arith.constant 0 : index
    %78 = vector.load %arg12[%c2_94, %c2_95, %c0_96] : memref<12x12x8xf32, #tpu.memory_space<vmem>>, vector<8x8x8xf32>
    tpu.vector_store %arg12[%c2_94, %c2_95, %c0_96], %75 {strides = array<i32>} : memref<12x12x8xf32, #tpu.memory_space<vmem>>, vector<8x8x8xf32>,
    %c0_97 = arith.constant 0 : index
    %c0_98 = arith.constant 0 : index
    %c0_99 = arith.constant 0 : index
    %79 = tpu.strided_load %arg12[%c0_97, %c0_98, %c0_99] {strides = array<i32: 2, 2, 1>} : memref<12x12x8xf32, #tpu.memory_space<vmem>>, vector<4x4x8xf32>
    %80 = vector.shape_cast %79 : vector<4x4x8xf32> to vector<16x8xf32>
    %c0_100 = arith.constant 0 : index
    %c1_101 = arith.constant 1 : index
    %c0_102 = arith.constant 0 : index
    %81 = tpu.strided_load %arg12[%c0_100, %c1_101, %c0_102] {strides = array<i32: 2, 2, 1>} : memref<12x12x8xf32, #tpu.memory_space<vmem>>, vector<4x4x8xf32>
    %82 = vector.shape_cast %81 : vector<4x4x8xf32> to vector<16x8xf32>
    %c0_103 = arith.constant 0 : index
    %c2_104 = arith.constant 2 : index
    %c0_105 = arith.constant 0 : index
    %83 = tpu.strided_load %arg12[%c0_103, %c2_104, %c0_105] {strides = array<i32: 2, 2, 1>} : memref<12x12x8xf32, #tpu.memory_space<vmem>>, vector<4x4x8xf32>
    %84 = vector.shape_cast %83 : vector<4x4x8xf32> to vector<16x8xf32>
    %c0_106 = arith.constant 0 : index
    %c3_107 = arith.constant 3 : index
    %c0_108 = arith.constant 0 : index
    %85 = tpu.strided_load %arg12[%c0_106, %c3_107, %c0_108] {strides = array<i32: 2, 2, 1>} : memref<12x12x8xf32, #tpu.memory_space<vmem>>, vector<4x4x8xf32>
    %86 = vector.shape_cast %85 : vector<4x4x8xf32> to vector<16x8xf32>
    %c0_109 = arith.constant 0 : index
    %c4_110 = arith.constant 4 : index
    %c0_111 = arith.constant 0 : index
    %87 = tpu.strided_load %arg12[%c0_109, %c4_110, %c0_111] {strides = array<i32: 2, 2, 1>} : memref<12x12x8xf32, #tpu.memory_space<vmem>>, vector<4x4x8xf32>
    %88 = vector.shape_cast %87 : vector<4x4x8xf32> to vector<16x8xf32>
    %c1_112 = arith.constant 1 : index
    %c0_113 = arith.constant 0 : index
    %c0_114 = arith.constant 0 : index
    %89 = tpu.strided_load %arg12[%c1_112, %c0_113, %c0_114] {strides = array<i32: 2, 2, 1>} : memref<12x12x8xf32, #tpu.memory_space<vmem>>, vector<4x4x8xf32>
    %90 = vector.shape_cast %89 : vector<4x4x8xf32> to vector<16x8xf32>
    %c1_115 = arith.constant 1 : index
    %c1_116 = arith.constant 1 : index
    %c0_117 = arith.constant 0 : index
    %91 = tpu.strided_load %arg12[%c1_115, %c1_116, %c0_117] {strides = array<i32: 2, 2, 1>} : memref<12x12x8xf32, #tpu.memory_space<vmem>>, vector<4x4x8xf32>
    %92 = vector.shape_cast %91 : vector<4x4x8xf32> to vector<16x8xf32>
    %c1_118 = arith.constant 1 : index
    %c2_119 = arith.constant 2 : index
    %c0_120 = arith.constant 0 : index
    %93 = tpu.strided_load %arg12[%c1_118, %c2_119, %c0_120] {strides = array<i32: 2, 2, 1>} : memref<12x12x8xf32, #tpu.memory_space<vmem>>, vector<4x4x8xf32>
    %94 = vector.shape_cast %93 : vector<4x4x8xf32> to vector<16x8xf32>
    %c1_121 = arith.constant 1 : index
    %c3_122 = arith.constant 3 : index
    %c0_123 = arith.constant 0 : index
    %95 = tpu.strided_load %arg12[%c1_121, %c3_122, %c0_123] {strides = array<i32: 2, 2, 1>} : memref<12x12x8xf32, #tpu.memory_space<vmem>>, vector<4x4x8xf32>
    %96 = vector.shape_cast %95 : vector<4x4x8xf32> to vector<16x8xf32>
    %c1_124 = arith.constant 1 : index
    %c4_125 = arith.constant 4 : index
    %c0_126 = arith.constant 0 : index
    %97 = tpu.strided_load %arg12[%c1_124, %c4_125, %c0_126] {strides = array<i32: 2, 2, 1>} : memref<12x12x8xf32, #tpu.memory_space<vmem>>, vector<4x4x8xf32>
    %98 = vector.shape_cast %97 : vector<4x4x8xf32> to vector<16x8xf32>
    %c2_127 = arith.constant 2 : index
    %c0_128 = arith.constant 0 : index
    %c0_129 = arith.constant 0 : index
    %99 = tpu.strided_load %arg12[%c2_127, %c0_128, %c0_129] {strides = array<i32: 2, 2, 1>} : memref<12x12x8xf32, #tpu.memory_space<vmem>>, vector<4x4x8xf32>
    %100 = vector.shape_cast %99 : vector<4x4x8xf32> to vector<16x8xf32>
    %c2_130 = arith.constant 2 : index
    %c1_131 = arith.constant 1 : index
    %c0_132 = arith.constant 0 : index
    %101 = tpu.strided_load %arg12[%c2_130, %c1_131, %c0_132] {strides = array<i32: 2, 2, 1>} : memref<12x12x8xf32, #tpu.memory_space<vmem>>, vector<4x4x8xf32>
    %102 = vector.shape_cast %101 : vector<4x4x8xf32> to vector<16x8xf32>
    %c2_133 = arith.constant 2 : index
    %c2_134 = arith.constant 2 : index
    %c0_135 = arith.constant 0 : index
    %103 = tpu.strided_load %arg12[%c2_133, %c2_134, %c0_135] {strides = array<i32: 2, 2, 1>} : memref<12x12x8xf32, #tpu.memory_space<vmem>>, vector<4x4x8xf32>
    %104 = vector.shape_cast %103 : vector<4x4x8xf32> to vector<16x8xf32>
    %c2_136 = arith.constant 2 : index
    %c3_137 = arith.constant 3 : index
    %c0_138 = arith.constant 0 : index
    %105 = tpu.strided_load %arg12[%c2_136, %c3_137, %c0_138] {strides = array<i32: 2, 2, 1>} : memref<12x12x8xf32, #tpu.memory_space<vmem>>, vector<4x4x8xf32>
    %106 = vector.shape_cast %105 : vector<4x4x8xf32> to vector<16x8xf32>
    %c2_139 = arith.constant 2 : index
    %c4_140 = arith.constant 4 : index
    %c0_141 = arith.constant 0 : index
    %107 = tpu.strided_load %arg12[%c2_139, %c4_140, %c0_141] {strides = array<i32: 2, 2, 1>} : memref<12x12x8xf32, #tpu.memory_space<vmem>>, vector<4x4x8xf32>
    %108 = vector.shape_cast %107 : vector<4x4x8xf32> to vector<16x8xf32>
    %c3_142 = arith.constant 3 : index
    %c0_143 = arith.constant 0 : index
    %c0_144 = arith.constant 0 : index
    %109 = tpu.strided_load %arg12[%c3_142, %c0_143, %c0_144] {strides = array<i32: 2, 2, 1>} : memref<12x12x8xf32, #tpu.memory_space<vmem>>, vector<4x4x8xf32>
    %110 = vector.shape_cast %109 : vector<4x4x8xf32> to vector<16x8xf32>
    %c3_145 = arith.constant 3 : index
    %c1_146 = arith.constant 1 : index
    %c0_147 = arith.constant 0 : index
    %111 = tpu.strided_load %arg12[%c3_145, %c1_146, %c0_147] {strides = array<i32: 2, 2, 1>} : memref<12x12x8xf32, #tpu.memory_space<vmem>>, vector<4x4x8xf32>
    %112 = vector.shape_cast %111 : vector<4x4x8xf32> to vector<16x8xf32>
    %c3_148 = arith.constant 3 : index
    %c2_149 = arith.constant 2 : index
    %c0_150 = arith.constant 0 : index
    %113 = tpu.strided_load %arg12[%c3_148, %c2_149, %c0_150] {strides = array<i32: 2, 2, 1>} : memref<12x12x8xf32, #tpu.memory_space<vmem>>, vector<4x4x8xf32>
    %114 = vector.shape_cast %113 : vector<4x4x8xf32> to vector<16x8xf32>
    %c3_151 = arith.constant 3 : index
    %c3_152 = arith.constant 3 : index
    %c0_153 = arith.constant 0 : index
    %115 = tpu.strided_load %arg12[%c3_151, %c3_152, %c0_153] {strides = array<i32: 2, 2, 1>} : memref<12x12x8xf32, #tpu.memory_space<vmem>>, vector<4x4x8xf32>
    %116 = vector.shape_cast %115 : vector<4x4x8xf32> to vector<16x8xf32>
    %c3_154 = arith.constant 3 : index
    %c4_155 = arith.constant 4 : index
    %c0_156 = arith.constant 0 : index
    %117 = tpu.strided_load %arg12[%c3_154, %c4_155, %c0_156] {strides = array<i32: 2, 2, 1>} : memref<12x12x8xf32, #tpu.memory_space<vmem>>, vector<4x4x8xf32>
    %118 = vector.shape_cast %117 : vector<4x4x8xf32> to vector<16x8xf32>
    %c4_157 = arith.constant 4 : index
    %c0_158 = arith.constant 0 : index
    %c0_159 = arith.constant 0 : index
    %119 = tpu.strided_load %arg12[%c4_157, %c0_158, %c0_159] {strides = array<i32: 2, 2, 1>} : memref<12x12x8xf32, #tpu.memory_space<vmem>>, vector<4x4x8xf32>
    %120 = vector.shape_cast %119 : vector<4x4x8xf32> to vector<16x8xf32>
    %c4_160 = arith.constant 4 : index
    %c1_161 = arith.constant 1 : index
    %c0_162 = arith.constant 0 : index
    %121 = tpu.strided_load %arg12[%c4_160, %c1_161, %c0_162] {strides = array<i32: 2, 2, 1>} : memref<12x12x8xf32, #tpu.memory_space<vmem>>, vector<4x4x8xf32>
    %122 = vector.shape_cast %121 : vector<4x4x8xf32> to vector<16x8xf32>
    %c4_163 = arith.constant 4 : index
    %c2_164 = arith.constant 2 : index
    %c0_165 = arith.constant 0 : index
    %123 = tpu.strided_load %arg12[%c4_163, %c2_164, %c0_165] {strides = array<i32: 2, 2, 1>} : memref<12x12x8xf32, #tpu.memory_space<vmem>>, vector<4x4x8xf32>
    %124 = vector.shape_cast %123 : vector<4x4x8xf32> to vector<16x8xf32>
    %c4_166 = arith.constant 4 : index
    %c3_167 = arith.constant 3 : index
    %c0_168 = arith.constant 0 : index
    %125 = tpu.strided_load %arg12[%c4_166, %c3_167, %c0_168] {strides = array<i32: 2, 2, 1>} : memref<12x12x8xf32, #tpu.memory_space<vmem>>, vector<4x4x8xf32>
    %126 = vector.shape_cast %125 : vector<4x4x8xf32> to vector<16x8xf32>
    %c4_169 = arith.constant 4 : index
    %c4_170 = arith.constant 4 : index
    %c0_171 = arith.constant 0 : index
    %127 = tpu.strided_load %arg12[%c4_169, %c4_170, %c0_171] {strides = array<i32: 2, 2, 1>} : memref<12x12x8xf32, #tpu.memory_space<vmem>>, vector<4x4x8xf32>
    %128 = vector.shape_cast %127 : vector<4x4x8xf32> to vector<16x8xf32>
    %129 = tpu.concatenate %80, %82, %84, %86, %88, %90, %92, %94, %96, %98, %100, %102, %104, %106, %108, %110 in 1 : vector<16x8xf32>, vector<16x8xf32>, vector<16x8xf32>, vector<16x8xf32>, vector<16x8xf32>, vector<16x8xf32>, vector<16x8xf32>, vector<16x8xf32>, vector<16x8xf32>, vector<16x8xf32>, vector<16x8xf32>, vector<16x8xf32>, vector<16x8xf32>, vector<16x8xf32>, vector<16x8xf32>, vector<16x8xf32> -> vector<16x128xf32>
    %130 = tpu.concatenate %112, %114, %116, %118, %120, %122, %124, %126, %128 in 1 : vector<16x8xf32>, vector<16x8xf32>, vector<16x8xf32>, vector<16x8xf32>, vector<16x8xf32>, vector<16x8xf32>, vector<16x8xf32>, vector<16x8xf32>, vector<16x8xf32> -> vector<16x72xf32>
    %131 = tpu.concatenate %129, %130 in 1 : vector<16x128xf32>, vector<16x72xf32> -> vector<16x200xf32>
    %132 = arith.truncf %131 : vector<16x200xf32> to vector<16x200xbf16>
    %c0_172 = arith.constant 0 : index
    %c0_173 = arith.constant 0 : index
    %133 = vector.load %arg4[%c0_172, %c0_173] : memref<200x8xbf16, #tpu.memory_space<vmem>>, vector<200x8xbf16>
    %cst_174 = arith.constant dense<0.000000e+00> : vector<16x8xf32>
    %134 = tpu.matmul %132, %133, %cst_174 {dimension_numbers = #tpu.dot_dimension_numbers<[1], [0], [0], [1], [0, 0, 1, 1], [], []>} : vector<16x200xbf16>, vector<200x8xbf16>, vector<16x8xf32> -> vector<16x8xf32>
    %c0_175 = arith.constant 0 : index
    %c0_176 = arith.constant 0 : index
    %135 = vector.load %arg5[%c0_175, %c0_176] : memref<2x8xf32, #tpu.memory_space<vmem>>, vector<1x8xf32>
    %c1_177 = arith.constant 1 : index
    %c0_178 = arith.constant 0 : index
    %136 = vector.load %arg5[%c1_177, %c0_178] : memref<2x8xf32, #tpu.memory_space<vmem>>, vector<1x8xf32>
    %137 = vector.broadcast %135 : vector<1x8xf32> to vector<16x8xf32>
    %138 = arith.mulf %134, %137 : vector<16x8xf32>
    %139 = vector.broadcast %136 : vector<1x8xf32> to vector<16x8xf32>
    %140 = arith.addf %138, %139 : vector<16x8xf32>
    %cst_179 = arith.constant 0.000000e+00 : f32
    %141 = vector.broadcast %cst_179 : f32 to vector<16x8xf32>
    %142 = arith.maximumf %140, %141 : vector<16x8xf32>
    %143 = math.roundeven %142 : vector<16x8xf32>
    %cst_180 = arith.constant 0.000000e+00 : f32
    %cst_181 = arith.constant 2.550000e+02 : f32
    %144 = vector.broadcast %cst_180 : f32 to vector<16x8xf32>
    %145 = arith.maximumf %144, %143 : vector<16x8xf32>
    %146 = vector.broadcast %cst_181 : f32 to vector<16x8xf32>
    %147 = arith.minimumf %146, %145 : vector<16x8xf32>
    %148 = vector.shape_cast %147 : vector<16x8xf32> to vector<4x4x8xf32>
    %cst_182 = arith.constant 0.000000e+00 : f32
    %149 = vector.broadcast %cst_182 : f32 to vector<8x8x8xf32>
    %c0_183 = arith.constant 0 : index
    %c0_184 = arith.constant 0 : index
    %c0_185 = arith.constant 0 : index
    %150 = vector.load %arg13[%c0_183, %c0_184, %c0_185] : memref<8x8x8xf32, #tpu.memory_space<vmem>>, vector<8x8x8xf32>
    tpu.vector_store %arg13[%c0_183, %c0_184, %c0_185], %149 {strides = array<i32>} : memref<8x8x8xf32, #tpu.memory_space<vmem>>, vector<8x8x8xf32>,
    %c2_186 = arith.constant 2 : index
    %c2_187 = arith.constant 2 : index
    %c0_188 = arith.constant 0 : index
    %151 = vector.load %arg13[%c2_186, %c2_187, %c0_188] : memref<8x8x8xf32, #tpu.memory_space<vmem>>, vector<4x4x8xf32>
    tpu.vector_store %arg13[%c2_186, %c2_187, %c0_188], %148 {strides = array<i32>} : memref<8x8x8xf32, #tpu.memory_space<vmem>>, vector<4x4x8xf32>,
    %c0_189 = arith.constant 0 : index
    %c0_190 = arith.constant 0 : index
    %c0_191 = arith.constant 0 : index
    %152 = tpu.strided_load %arg13[%c0_189, %c0_190, %c0_191] {strides = array<i32: 2, 2, 1>} : memref<8x8x8xf32, #tpu.memory_space<vmem>>, vector<2x2x8xf32>
    %153 = vector.shape_cast %152 : vector<2x2x8xf32> to vector<4x8xf32>
    %c0_192 = arith.constant 0 : index
    %c1_193 = arith.constant 1 : index
    %c0_194 = arith.constant 0 : index
    %154 = tpu.strided_load %arg13[%c0_192, %c1_193, %c0_194] {strides = array<i32: 2, 2, 1>} : memref<8x8x8xf32, #tpu.memory_space<vmem>>, vector<2x2x8xf32>
    %155 = vector.shape_cast %154 : vector<2x2x8xf32> to vector<4x8xf32>
    %c0_195 = arith.constant 0 : index
    %c2_196 = arith.constant 2 : index
    %c0_197 = arith.constant 0 : index
    %156 = tpu.strided_load %arg13[%c0_195, %c2_196, %c0_197] {strides = array<i32: 2, 2, 1>} : memref<8x8x8xf32, #tpu.memory_space<vmem>>, vector<2x2x8xf32>
    %157 = vector.shape_cast %156 : vector<2x2x8xf32> to vector<4x8xf32>
    %c0_198 = arith.constant 0 : index
    %c3_199 = arith.constant 3 : index
    %c0_200 = arith.constant 0 : index
    %158 = tpu.strided_load %arg13[%c0_198, %c3_199, %c0_200] {strides = array<i32: 2, 2, 1>} : memref<8x8x8xf32, #tpu.memory_space<vmem>>, vector<2x2x8xf32>
    %159 = vector.shape_cast %158 : vector<2x2x8xf32> to vector<4x8xf32>
    %c0_201 = arith.constant 0 : index
    %c4_202 = arith.constant 4 : index
    %c0_203 = arith.constant 0 : index
    %160 = tpu.strided_load %arg13[%c0_201, %c4_202, %c0_203] {strides = array<i32: 2, 2, 1>} : memref<8x8x8xf32, #tpu.memory_space<vmem>>, vector<2x2x8xf32>
    %161 = vector.shape_cast %160 : vector<2x2x8xf32> to vector<4x8xf32>
    %c1_204 = arith.constant 1 : index
    %c0_205 = arith.constant 0 : index
    %c0_206 = arith.constant 0 : index
    %162 = tpu.strided_load %arg13[%c1_204, %c0_205, %c0_206] {strides = array<i32: 2, 2, 1>} : memref<8x8x8xf32, #tpu.memory_space<vmem>>, vector<2x2x8xf32>
    %163 = vector.shape_cast %162 : vector<2x2x8xf32> to vector<4x8xf32>
    %c1_207 = arith.constant 1 : index
    %c1_208 = arith.constant 1 : index
    %c0_209 = arith.constant 0 : index
    %164 = tpu.strided_load %arg13[%c1_207, %c1_208, %c0_209] {strides = array<i32: 2, 2, 1>} : memref<8x8x8xf32, #tpu.memory_space<vmem>>, vector<2x2x8xf32>
    %165 = vector.shape_cast %164 : vector<2x2x8xf32> to vector<4x8xf32>
    %c1_210 = arith.constant 1 : index
    %c2_211 = arith.constant 2 : index
    %c0_212 = arith.constant 0 : index
    %166 = tpu.strided_load %arg13[%c1_210, %c2_211, %c0_212] {strides = array<i32: 2, 2, 1>} : memref<8x8x8xf32, #tpu.memory_space<vmem>>, vector<2x2x8xf32>
    %167 = vector.shape_cast %166 : vector<2x2x8xf32> to vector<4x8xf32>
    %c1_213 = arith.constant 1 : index
    %c3_214 = arith.constant 3 : index
    %c0_215 = arith.constant 0 : index
    %168 = tpu.strided_load %arg13[%c1_213, %c3_214, %c0_215] {strides = array<i32: 2, 2, 1>} : memref<8x8x8xf32, #tpu.memory_space<vmem>>, vector<2x2x8xf32>
    %169 = vector.shape_cast %168 : vector<2x2x8xf32> to vector<4x8xf32>
    %c1_216 = arith.constant 1 : index
    %c4_217 = arith.constant 4 : index
    %c0_218 = arith.constant 0 : index
    %170 = tpu.strided_load %arg13[%c1_216, %c4_217, %c0_218] {strides = array<i32: 2, 2, 1>} : memref<8x8x8xf32, #tpu.memory_space<vmem>>, vector<2x2x8xf32>
    %171 = vector.shape_cast %170 : vector<2x2x8xf32> to vector<4x8xf32>
    %c2_219 = arith.constant 2 : index
    %c0_220 = arith.constant 0 : index
    %c0_221 = arith.constant 0 : index
    %172 = tpu.strided_load %arg13[%c2_219, %c0_220, %c0_221] {strides = array<i32: 2, 2, 1>} : memref<8x8x8xf32, #tpu.memory_space<vmem>>, vector<2x2x8xf32>
    %173 = vector.shape_cast %172 : vector<2x2x8xf32> to vector<4x8xf32>
    %c2_222 = arith.constant 2 : index
    %c1_223 = arith.constant 1 : index
    %c0_224 = arith.constant 0 : index
    %174 = tpu.strided_load %arg13[%c2_222, %c1_223, %c0_224] {strides = array<i32: 2, 2, 1>} : memref<8x8x8xf32, #tpu.memory_space<vmem>>, vector<2x2x8xf32>
    %175 = vector.shape_cast %174 : vector<2x2x8xf32> to vector<4x8xf32>
    %c2_225 = arith.constant 2 : index
    %c2_226 = arith.constant 2 : index
    %c0_227 = arith.constant 0 : index
    %176 = tpu.strided_load %arg13[%c2_225, %c2_226, %c0_227] {strides = array<i32: 2, 2, 1>} : memref<8x8x8xf32, #tpu.memory_space<vmem>>, vector<2x2x8xf32>
    %177 = vector.shape_cast %176 : vector<2x2x8xf32> to vector<4x8xf32>
    %c2_228 = arith.constant 2 : index
    %c3_229 = arith.constant 3 : index
    %c0_230 = arith.constant 0 : index
    %178 = tpu.strided_load %arg13[%c2_228, %c3_229, %c0_230] {strides = array<i32: 2, 2, 1>} : memref<8x8x8xf32, #tpu.memory_space<vmem>>, vector<2x2x8xf32>
    %179 = vector.shape_cast %178 : vector<2x2x8xf32> to vector<4x8xf32>
    %c2_231 = arith.constant 2 : index
    %c4_232 = arith.constant 4 : index
    %c0_233 = arith.constant 0 : index
    %180 = tpu.strided_load %arg13[%c2_231, %c4_232, %c0_233] {strides = array<i32: 2, 2, 1>} : memref<8x8x8xf32, #tpu.memory_space<vmem>>, vector<2x2x8xf32>
    %181 = vector.shape_cast %180 : vector<2x2x8xf32> to vector<4x8xf32>
    %c3_234 = arith.constant 3 : index
    %c0_235 = arith.constant 0 : index
    %c0_236 = arith.constant 0 : index
    %182 = tpu.strided_load %arg13[%c3_234, %c0_235, %c0_236] {strides = array<i32: 2, 2, 1>} : memref<8x8x8xf32, #tpu.memory_space<vmem>>, vector<2x2x8xf32>
    %183 = vector.shape_cast %182 : vector<2x2x8xf32> to vector<4x8xf32>
    %c3_237 = arith.constant 3 : index
    %c1_238 = arith.constant 1 : index
    %c0_239 = arith.constant 0 : index
    %184 = tpu.strided_load %arg13[%c3_237, %c1_238, %c0_239] {strides = array<i32: 2, 2, 1>} : memref<8x8x8xf32, #tpu.memory_space<vmem>>, vector<2x2x8xf32>
    %185 = vector.shape_cast %184 : vector<2x2x8xf32> to vector<4x8xf32>
    %c3_240 = arith.constant 3 : index
    %c2_241 = arith.constant 2 : index
    %c0_242 = arith.constant 0 : index
    %186 = tpu.strided_load %arg13[%c3_240, %c2_241, %c0_242] {strides = array<i32: 2, 2, 1>} : memref<8x8x8xf32, #tpu.memory_space<vmem>>, vector<2x2x8xf32>
    %187 = vector.shape_cast %186 : vector<2x2x8xf32> to vector<4x8xf32>
    %c3_243 = arith.constant 3 : index
    %c3_244 = arith.constant 3 : index
    %c0_245 = arith.constant 0 : index
    %188 = tpu.strided_load %arg13[%c3_243, %c3_244, %c0_245] {strides = array<i32: 2, 2, 1>} : memref<8x8x8xf32, #tpu.memory_space<vmem>>, vector<2x2x8xf32>
    %189 = vector.shape_cast %188 : vector<2x2x8xf32> to vector<4x8xf32>
    %c3_246 = arith.constant 3 : index
    %c4_247 = arith.constant 4 : index
    %c0_248 = arith.constant 0 : index
    %190 = tpu.strided_load %arg13[%c3_246, %c4_247, %c0_248] {strides = array<i32: 2, 2, 1>} : memref<8x8x8xf32, #tpu.memory_space<vmem>>, vector<2x2x8xf32>
    %191 = vector.shape_cast %190 : vector<2x2x8xf32> to vector<4x8xf32>
    %c4_249 = arith.constant 4 : index
    %c0_250 = arith.constant 0 : index
    %c0_251 = arith.constant 0 : index
    %192 = tpu.strided_load %arg13[%c4_249, %c0_250, %c0_251] {strides = array<i32: 2, 2, 1>} : memref<8x8x8xf32, #tpu.memory_space<vmem>>, vector<2x2x8xf32>
    %193 = vector.shape_cast %192 : vector<2x2x8xf32> to vector<4x8xf32>
    %c4_252 = arith.constant 4 : index
    %c1_253 = arith.constant 1 : index
    %c0_254 = arith.constant 0 : index
    %194 = tpu.strided_load %arg13[%c4_252, %c1_253, %c0_254] {strides = array<i32: 2, 2, 1>} : memref<8x8x8xf32, #tpu.memory_space<vmem>>, vector<2x2x8xf32>
    %195 = vector.shape_cast %194 : vector<2x2x8xf32> to vector<4x8xf32>
    %c4_255 = arith.constant 4 : index
    %c2_256 = arith.constant 2 : index
    %c0_257 = arith.constant 0 : index
    %196 = tpu.strided_load %arg13[%c4_255, %c2_256, %c0_257] {strides = array<i32: 2, 2, 1>} : memref<8x8x8xf32, #tpu.memory_space<vmem>>, vector<2x2x8xf32>
    %197 = vector.shape_cast %196 : vector<2x2x8xf32> to vector<4x8xf32>
    %c4_258 = arith.constant 4 : index
    %c3_259 = arith.constant 3 : index
    %c0_260 = arith.constant 0 : index
    %198 = tpu.strided_load %arg13[%c4_258, %c3_259, %c0_260] {strides = array<i32: 2, 2, 1>} : memref<8x8x8xf32, #tpu.memory_space<vmem>>, vector<2x2x8xf32>
    %199 = vector.shape_cast %198 : vector<2x2x8xf32> to vector<4x8xf32>
    %c4_261 = arith.constant 4 : index
    %c4_262 = arith.constant 4 : index
    %c0_263 = arith.constant 0 : index
    %200 = tpu.strided_load %arg13[%c4_261, %c4_262, %c0_263] {strides = array<i32: 2, 2, 1>} : memref<8x8x8xf32, #tpu.memory_space<vmem>>, vector<2x2x8xf32>
    %201 = vector.shape_cast %200 : vector<2x2x8xf32> to vector<4x8xf32>
    %202 = tpu.concatenate %153, %155, %157, %159, %161, %163, %165, %167, %169, %171, %173, %175, %177, %179, %181, %183 in 1 : vector<4x8xf32>, vector<4x8xf32>, vector<4x8xf32>, vector<4x8xf32>, vector<4x8xf32>, vector<4x8xf32>, vector<4x8xf32>, vector<4x8xf32>, vector<4x8xf32>, vector<4x8xf32>, vector<4x8xf32>, vector<4x8xf32>, vector<4x8xf32>, vector<4x8xf32>, vector<4x8xf32>, vector<4x8xf32> -> vector<4x128xf32>
    %203 = tpu.concatenate %185, %187, %189, %191, %193, %195, %197, %199, %201 in 1 : vector<4x8xf32>, vector<4x8xf32>, vector<4x8xf32>, vector<4x8xf32>, vector<4x8xf32>, vector<4x8xf32>, vector<4x8xf32>, vector<4x8xf32>, vector<4x8xf32> -> vector<4x72xf32>
    %204 = tpu.concatenate %202, %203 in 1 : vector<4x128xf32>, vector<4x72xf32> -> vector<4x200xf32>
    %205 = arith.truncf %204 : vector<4x200xf32> to vector<4x200xbf16>
    %c0_264 = arith.constant 0 : index
    %c0_265 = arith.constant 0 : index
    %206 = vector.load %arg6[%c0_264, %c0_265] : memref<200x8xbf16, #tpu.memory_space<vmem>>, vector<200x8xbf16>
    %cst_266 = arith.constant dense<0.000000e+00> : vector<4x8xf32>
    %207 = tpu.matmul %205, %206, %cst_266 {dimension_numbers = #tpu.dot_dimension_numbers<[1], [0], [0], [1], [0, 0, 1, 1], [], []>} : vector<4x200xbf16>, vector<200x8xbf16>, vector<4x8xf32> -> vector<4x8xf32>
    %c0_267 = arith.constant 0 : index
    %c0_268 = arith.constant 0 : index
    %208 = vector.load %arg7[%c0_267, %c0_268] : memref<2x8xf32, #tpu.memory_space<vmem>>, vector<1x8xf32>
    %c1_269 = arith.constant 1 : index
    %c0_270 = arith.constant 0 : index
    %209 = vector.load %arg7[%c1_269, %c0_270] : memref<2x8xf32, #tpu.memory_space<vmem>>, vector<1x8xf32>
    %210 = vector.broadcast %208 : vector<1x8xf32> to vector<4x8xf32>
    %211 = arith.mulf %207, %210 : vector<4x8xf32>
    %212 = vector.broadcast %209 : vector<1x8xf32> to vector<4x8xf32>
    %213 = arith.addf %211, %212 : vector<4x8xf32>
    %cst_271 = arith.constant 0.000000e+00 : f32
    %214 = vector.broadcast %cst_271 : f32 to vector<4x8xf32>
    %215 = arith.maximumf %213, %214 : vector<4x8xf32>
    %216 = math.roundeven %215 : vector<4x8xf32>
    %cst_272 = arith.constant 0.000000e+00 : f32
    %cst_273 = arith.constant 2.550000e+02 : f32
    %217 = vector.broadcast %cst_272 : f32 to vector<4x8xf32>
    %218 = arith.maximumf %217, %216 : vector<4x8xf32>
    %219 = vector.broadcast %cst_273 : f32 to vector<4x8xf32>
    %220 = arith.minimumf %219, %218 : vector<4x8xf32>
    %221 = vector.shape_cast %220 : vector<4x8xf32> to vector<2x2x8xf32>
    %cst_274 = arith.constant 0.000000e+00 : f32
    %222 = vector.broadcast %cst_274 : f32 to vector<6x6x8xf32>
    %c0_275 = arith.constant 0 : index
    %c0_276 = arith.constant 0 : index
    %c0_277 = arith.constant 0 : index
    %223 = vector.load %arg14[%c0_275, %c0_276, %c0_277] : memref<6x6x8xf32, #tpu.memory_space<vmem>>, vector<6x6x8xf32>
    tpu.vector_store %arg14[%c0_275, %c0_276, %c0_277], %222 {strides = array<i32>} : memref<6x6x8xf32, #tpu.memory_space<vmem>>, vector<6x6x8xf32>,
    %c2_278 = arith.constant 2 : index
    %c2_279 = arith.constant 2 : index
    %c0_280 = arith.constant 0 : index
    %224 = vector.load %arg14[%c2_278, %c2_279, %c0_280] : memref<6x6x8xf32, #tpu.memory_space<vmem>>, vector<2x2x8xf32>
    tpu.vector_store %arg14[%c2_278, %c2_279, %c0_280], %221 {strides = array<i32>} : memref<6x6x8xf32, #tpu.memory_space<vmem>>, vector<2x2x8xf32>,
    %c0_281 = arith.constant 0 : index
    %c0_282 = arith.constant 0 : index
    %c0_283 = arith.constant 0 : index
    %225 = vector.load %arg14[%c0_281, %c0_282, %c0_283] : memref<6x6x8xf32, #tpu.memory_space<vmem>>, vector<1x1x8xf32>
    %226 = vector.shape_cast %225 : vector<1x1x8xf32> to vector<1x8xf32>
    %c0_284 = arith.constant 0 : index
    %c1_285 = arith.constant 1 : index
    %c0_286 = arith.constant 0 : index
    %227 = vector.load %arg14[%c0_284, %c1_285, %c0_286] : memref<6x6x8xf32, #tpu.memory_space<vmem>>, vector<1x1x8xf32>
    %228 = vector.shape_cast %227 : vector<1x1x8xf32> to vector<1x8xf32>
    %c0_287 = arith.constant 0 : index
    %c2_288 = arith.constant 2 : index
    %c0_289 = arith.constant 0 : index
    %229 = vector.load %arg14[%c0_287, %c2_288, %c0_289] : memref<6x6x8xf32, #tpu.memory_space<vmem>>, vector<1x1x8xf32>
    %230 = vector.shape_cast %229 : vector<1x1x8xf32> to vector<1x8xf32>
    %c0_290 = arith.constant 0 : index
    %c3_291 = arith.constant 3 : index
    %c0_292 = arith.constant 0 : index
    %231 = vector.load %arg14[%c0_290, %c3_291, %c0_292] : memref<6x6x8xf32, #tpu.memory_space<vmem>>, vector<1x1x8xf32>
    %232 = vector.shape_cast %231 : vector<1x1x8xf32> to vector<1x8xf32>
    %c0_293 = arith.constant 0 : index
    %c4_294 = arith.constant 4 : index
    %c0_295 = arith.constant 0 : index
    %233 = vector.load %arg14[%c0_293, %c4_294, %c0_295] : memref<6x6x8xf32, #tpu.memory_space<vmem>>, vector<1x1x8xf32>
    %234 = vector.shape_cast %233 : vector<1x1x8xf32> to vector<1x8xf32>
    %c1_296 = arith.constant 1 : index
    %c0_297 = arith.constant 0 : index
    %c0_298 = arith.constant 0 : index
    %235 = vector.load %arg14[%c1_296, %c0_297, %c0_298] : memref<6x6x8xf32, #tpu.memory_space<vmem>>, vector<1x1x8xf32>
    %236 = vector.shape_cast %235 : vector<1x1x8xf32> to vector<1x8xf32>
    %c1_299 = arith.constant 1 : index
    %c1_300 = arith.constant 1 : index
    %c0_301 = arith.constant 0 : index
    %237 = vector.load %arg14[%c1_299, %c1_300, %c0_301] : memref<6x6x8xf32, #tpu.memory_space<vmem>>, vector<1x1x8xf32>
    %238 = vector.shape_cast %237 : vector<1x1x8xf32> to vector<1x8xf32>
    %c1_302 = arith.constant 1 : index
    %c2_303 = arith.constant 2 : index
    %c0_304 = arith.constant 0 : index
    %239 = vector.load %arg14[%c1_302, %c2_303, %c0_304] : memref<6x6x8xf32, #tpu.memory_space<vmem>>, vector<1x1x8xf32>
    %240 = vector.shape_cast %239 : vector<1x1x8xf32> to vector<1x8xf32>
    %c1_305 = arith.constant 1 : index
    %c3_306 = arith.constant 3 : index
    %c0_307 = arith.constant 0 : index
    %241 = vector.load %arg14[%c1_305, %c3_306, %c0_307] : memref<6x6x8xf32, #tpu.memory_space<vmem>>, vector<1x1x8xf32>
    %242 = vector.shape_cast %241 : vector<1x1x8xf32> to vector<1x8xf32>
    %c1_308 = arith.constant 1 : index
    %c4_309 = arith.constant 4 : index
    %c0_310 = arith.constant 0 : index
    %243 = vector.load %arg14[%c1_308, %c4_309, %c0_310] : memref<6x6x8xf32, #tpu.memory_space<vmem>>, vector<1x1x8xf32>
    %244 = vector.shape_cast %243 : vector<1x1x8xf32> to vector<1x8xf32>
    %c2_311 = arith.constant 2 : index
    %c0_312 = arith.constant 0 : index
    %c0_313 = arith.constant 0 : index
    %245 = vector.load %arg14[%c2_311, %c0_312, %c0_313] : memref<6x6x8xf32, #tpu.memory_space<vmem>>, vector<1x1x8xf32>
    %246 = vector.shape_cast %245 : vector<1x1x8xf32> to vector<1x8xf32>
    %c2_314 = arith.constant 2 : index
    %c1_315 = arith.constant 1 : index
    %c0_316 = arith.constant 0 : index
    %247 = vector.load %arg14[%c2_314, %c1_315, %c0_316] : memref<6x6x8xf32, #tpu.memory_space<vmem>>, vector<1x1x8xf32>
    %248 = vector.shape_cast %247 : vector<1x1x8xf32> to vector<1x8xf32>
    %c2_317 = arith.constant 2 : index
    %c2_318 = arith.constant 2 : index
    %c0_319 = arith.constant 0 : index
    %249 = vector.load %arg14[%c2_317, %c2_318, %c0_319] : memref<6x6x8xf32, #tpu.memory_space<vmem>>, vector<1x1x8xf32>
    %250 = vector.shape_cast %249 : vector<1x1x8xf32> to vector<1x8xf32>
    %c2_320 = arith.constant 2 : index
    %c3_321 = arith.constant 3 : index
    %c0_322 = arith.constant 0 : index
    %251 = vector.load %arg14[%c2_320, %c3_321, %c0_322] : memref<6x6x8xf32, #tpu.memory_space<vmem>>, vector<1x1x8xf32>
    %252 = vector.shape_cast %251 : vector<1x1x8xf32> to vector<1x8xf32>
    %c2_323 = arith.constant 2 : index
    %c4_324 = arith.constant 4 : index
    %c0_325 = arith.constant 0 : index
    %253 = vector.load %arg14[%c2_323, %c4_324, %c0_325] : memref<6x6x8xf32, #tpu.memory_space<vmem>>, vector<1x1x8xf32>
    %254 = vector.shape_cast %253 : vector<1x1x8xf32> to vector<1x8xf32>
    %c3_326 = arith.constant 3 : index
    %c0_327 = arith.constant 0 : index
    %c0_328 = arith.constant 0 : index
    %255 = vector.load %arg14[%c3_326, %c0_327, %c0_328] : memref<6x6x8xf32, #tpu.memory_space<vmem>>, vector<1x1x8xf32>
    %256 = vector.shape_cast %255 : vector<1x1x8xf32> to vector<1x8xf32>
    %c3_329 = arith.constant 3 : index
    %c1_330 = arith.constant 1 : index
    %c0_331 = arith.constant 0 : index
    %257 = vector.load %arg14[%c3_329, %c1_330, %c0_331] : memref<6x6x8xf32, #tpu.memory_space<vmem>>, vector<1x1x8xf32>
    %258 = vector.shape_cast %257 : vector<1x1x8xf32> to vector<1x8xf32>
    %c3_332 = arith.constant 3 : index
    %c2_333 = arith.constant 2 : index
    %c0_334 = arith.constant 0 : index
    %259 = vector.load %arg14[%c3_332, %c2_333, %c0_334] : memref<6x6x8xf32, #tpu.memory_space<vmem>>, vector<1x1x8xf32>
    %260 = vector.shape_cast %259 : vector<1x1x8xf32> to vector<1x8xf32>
    %c3_335 = arith.constant 3 : index
    %c3_336 = arith.constant 3 : index
    %c0_337 = arith.constant 0 : index
    %261 = vector.load %arg14[%c3_335, %c3_336, %c0_337] : memref<6x6x8xf32, #tpu.memory_space<vmem>>, vector<1x1x8xf32>
    %262 = vector.shape_cast %261 : vector<1x1x8xf32> to vector<1x8xf32>
    %c3_338 = arith.constant 3 : index
    %c4_339 = arith.constant 4 : index
    %c0_340 = arith.constant 0 : index
    %263 = vector.load %arg14[%c3_338, %c4_339, %c0_340] : memref<6x6x8xf32, #tpu.memory_space<vmem>>, vector<1x1x8xf32>
    %264 = vector.shape_cast %263 : vector<1x1x8xf32> to vector<1x8xf32>
    %c4_341 = arith.constant 4 : index
    %c0_342 = arith.constant 0 : index
    %c0_343 = arith.constant 0 : index
    %265 = vector.load %arg14[%c4_341, %c0_342, %c0_343] : memref<6x6x8xf32, #tpu.memory_space<vmem>>, vector<1x1x8xf32>
    %266 = vector.shape_cast %265 : vector<1x1x8xf32> to vector<1x8xf32>
    %c4_344 = arith.constant 4 : index
    %c1_345 = arith.constant 1 : index
    %c0_346 = arith.constant 0 : index
    %267 = vector.load %arg14[%c4_344, %c1_345, %c0_346] : memref<6x6x8xf32, #tpu.memory_space<vmem>>, vector<1x1x8xf32>
    %268 = vector.shape_cast %267 : vector<1x1x8xf32> to vector<1x8xf32>
    %c4_347 = arith.constant 4 : index
    %c2_348 = arith.constant 2 : index
    %c0_349 = arith.constant 0 : index
    %269 = vector.load %arg14[%c4_347, %c2_348, %c0_349] : memref<6x6x8xf32, #tpu.memory_space<vmem>>, vector<1x1x8xf32>
    %270 = vector.shape_cast %269 : vector<1x1x8xf32> to vector<1x8xf32>
    %c4_350 = arith.constant 4 : index
    %c3_351 = arith.constant 3 : index
    %c0_352 = arith.constant 0 : index
    %271 = vector.load %arg14[%c4_350, %c3_351, %c0_352] : memref<6x6x8xf32, #tpu.memory_space<vmem>>, vector<1x1x8xf32>
    %272 = vector.shape_cast %271 : vector<1x1x8xf32> to vector<1x8xf32>
    %c4_353 = arith.constant 4 : index
    %c4_354 = arith.constant 4 : index
    %c0_355 = arith.constant 0 : index
    %273 = vector.load %arg14[%c4_353, %c4_354, %c0_355] : memref<6x6x8xf32, #tpu.memory_space<vmem>>, vector<1x1x8xf32>
    %274 = vector.shape_cast %273 : vector<1x1x8xf32> to vector<1x8xf32>
    %275 = tpu.concatenate %226, %228, %230, %232, %234, %236, %238, %240, %242, %244, %246, %248, %250, %252, %254, %256 in 1 : vector<1x8xf32>, vector<1x8xf32>, vector<1x8xf32>, vector<1x8xf32>, vector<1x8xf32>, vector<1x8xf32>, vector<1x8xf32>, vector<1x8xf32>, vector<1x8xf32>, vector<1x8xf32>, vector<1x8xf32>, vector<1x8xf32>, vector<1x8xf32>, vector<1x8xf32>, vector<1x8xf32>, vector<1x8xf32> -> vector<1x128xf32>
    %276 = tpu.concatenate %258, %260, %262, %264, %266, %268, %270, %272, %274 in 1 : vector<1x8xf32>, vector<1x8xf32>, vector<1x8xf32>, vector<1x8xf32>, vector<1x8xf32>, vector<1x8xf32>, vector<1x8xf32>, vector<1x8xf32>, vector<1x8xf32> -> vector<1x72xf32>
    %277 = tpu.concatenate %275, %276 in 1 : vector<1x128xf32>, vector<1x72xf32> -> vector<1x200xf32>
    %278 = arith.truncf %277 : vector<1x200xf32> to vector<1x200xbf16>
    %c0_356 = arith.constant 0 : index
    %c0_357 = arith.constant 0 : index
    %279 = vector.load %arg8[%c0_356, %c0_357] : memref<200x16xbf16, #tpu.memory_space<vmem>>, vector<200x16xbf16>
    %cst_358 = arith.constant dense<0.000000e+00> : vector<1x16xf32>
    %280 = tpu.matmul %278, %279, %cst_358 {dimension_numbers = #tpu.dot_dimension_numbers<[1], [0], [0], [1], [0, 0, 1, 1], [], []>} : vector<1x200xbf16>, vector<200x16xbf16>, vector<1x16xf32> -> vector<1x16xf32>
    %c0_359 = arith.constant 0 : index
    %c0_360 = arith.constant 0 : index
    %281 = vector.load %arg9[%c0_359, %c0_360] : memref<2x16xf32, #tpu.memory_space<vmem>>, vector<1x16xf32>
    %c1_361 = arith.constant 1 : index
    %c0_362 = arith.constant 0 : index
    %282 = vector.load %arg9[%c1_361, %c0_362] : memref<2x16xf32, #tpu.memory_space<vmem>>, vector<1x16xf32>
    %283 = arith.mulf %280, %281 : vector<1x16xf32>
    %284 = arith.addf %283, %282 : vector<1x16xf32>
    %285 = math.roundeven %284 : vector<1x16xf32>
    %c0_363 = arith.constant 0 : index
    %c0_364 = arith.constant 0 : index
    %c0_365 = arith.constant 0 : index
    %286 = vector.load %arg10[%c0_363, %c0_364, %c0_365] : memref<1x1x16xf32, #tpu.memory_space<vmem>>, vector<1x1x16xf32>
    %287 = vector.shape_cast %286 : vector<1x1x16xf32> to vector<1x16xf32>
    %288 = vector.shape_cast %285 : vector<1x16xf32> to vector<1x1x16xf32>
    tpu.vector_store %arg10[%c0_363, %c0_364, %c0_365], %288 {strides = array<i32>} : memref<1x1x16xf32, #tpu.memory_space<vmem>>, vector<1x1x16xf32>,
    return
  }
  func.func @transform_0(%arg0: i32) -> (i32, i32, i32, i32) {
    %c0_i32 = arith.constant 0 : i32
    %c0_i32_0 = arith.constant 0 : i32
    %c0_i32_1 = arith.constant 0 : i32
    %c0_i32_2 = arith.constant 0 : i32
    return %arg0, %c0_i32, %c0_i32_0, %c0_i32_1 : i32, i32, i32, i32
  }
  func.func @transform_1(%arg0: i32) -> (i32, i32) {
    %c0_i32 = arith.constant 0 : i32
    %c0_i32_0 = arith.constant 0 : i32
    %c0_i32_1 = arith.constant 0 : i32
    return %c0_i32, %c0_i32_0 : i32, i32
  }
  func.func @transform_2(%arg0: i32) -> (i32, i32) {
    %c0_i32 = arith.constant 0 : i32
    %c0_i32_0 = arith.constant 0 : i32
    %c0_i32_1 = arith.constant 0 : i32
    return %c0_i32, %c0_i32_0 : i32, i32
  }
  func.func @transform_3(%arg0: i32) -> (i32, i32) {
    %c0_i32 = arith.constant 0 : i32
    %c0_i32_0 = arith.constant 0 : i32
    %c0_i32_1 = arith.constant 0 : i32
    return %c0_i32, %c0_i32_0 : i32, i32
  }
  func.func @transform_4(%arg0: i32) -> (i32, i32) {
    %c0_i32 = arith.constant 0 : i32
    %c0_i32_0 = arith.constant 0 : i32
    %c0_i32_1 = arith.constant 0 : i32
    return %c0_i32, %c0_i32_0 : i32, i32
  }
  func.func @transform_5(%arg0: i32) -> (i32, i32) {
    %c0_i32 = arith.constant 0 : i32
    %c0_i32_0 = arith.constant 0 : i32
    %c0_i32_1 = arith.constant 0 : i32
    return %c0_i32, %c0_i32_0 : i32, i32
  }
  func.func @transform_6(%arg0: i32) -> (i32, i32) {
    %c0_i32 = arith.constant 0 : i32
    %c0_i32_0 = arith.constant 0 : i32
    %c0_i32_1 = arith.constant 0 : i32
    return %c0_i32, %c0_i32_0 : i32, i32
  }
  func.func @transform_7(%arg0: i32) -> (i32, i32) {
    %c0_i32 = arith.constant 0 : i32
    %c0_i32_0 = arith.constant 0 : i32
    %c0_i32_1 = arith.constant 0 : i32
    return %c0_i32, %c0_i32_0 : i32, i32
  }
  func.func @transform_8(%arg0: i32) -> (i32, i32) {
    %c0_i32 = arith.constant 0 : i32
    %c0_i32_0 = arith.constant 0 : i32
    %c0_i32_1 = arith.constant 0 : i32
    return %c0_i32, %c0_i32_0 : i32, i32
  }
  func.func @transform_9(%arg0: i32) -> (i32, i32, i32) {
    %c0_i32 = arith.constant 0 : i32
    %c0_i32_0 = arith.constant 0 : i32
    %c0_i32_1 = arith.constant 0 : i32
    return %arg0, %c0_i32, %c0_i32_0 : i32, i32, i32
  }
}

</mosaic_0001>

<bundles_post_ra>
// kernel: _ga_forward.1
= control target key start
LH: loop header
LB: loop body
LE: loop exit
PB: predicated region body
PF: predicated region fallthrough
CT: control target
= control target key end

     0   :  { %s6711_s0 = inlined_call_operand.vmem [shape: bf16[2,16,16,3], index: 0, kind: input, shape index: {}]   ;;  %s6712_s1 = inlined_call_operand.vmem [shape: bf16[75,8], index: 1, kind: input, shape index: {}]   ;;  %s6713_s2 = inlined_call_operand.vmem [shape: f32[2,8], index: 2, kind: input, shape index: {}]   ;;  %s6714_s3 = inlined_call_operand.vmem [shape: bf16[200,8], index: 3, kind: input, shape index: {}]   ;;  %s6715_s4 = inlined_call_operand.vmem [shape: f32[2,8], index: 4, kind: input, shape index: {}]   ;;  %s6716_s5 = inlined_call_operand.vmem [shape: bf16[200,8], index: 5, kind: input, shape index: {}]   ;;  %s6717_s6 = inlined_call_operand.vmem [shape: f32[2,8], index: 6, kind: input, shape index: {}]   ;;  %s6718_s7 = inlined_call_operand.vmem [shape: bf16[200,16], index: 7, kind: input, shape index: {}]   ;;  %s6719_s8 = inlined_call_operand.vmem [shape: f32[2,16], index: 8, kind: input, shape index: {}]   ;;  %s6720_s9 = inlined_call_operand.hbm [shape: f32[2,1,16], index: 9, kind: output, shape index: {}]  }
   0x1   :  { %6754 = sst [smem:[#allocation9_spill]] %s6711_s0 }
   0x2   :  { %6755 = sst [smem:[#allocation10_spill]] %s6712_s1 }
   0x3   :  { %6756 = sst [smem:[#allocation11_spill]] %s6713_s2 }
   0x4   :  { %6757 = sst [smem:[#allocation12_spill]] %s6714_s3 }
   0x5   :  { %6758 = sst [smem:[#allocation13_spill]] %s6715_s4 }
   0x6   :  { %14 = vsyncpa [#allocation7], 0 }
   0x7   :  { %16 = vsyncpa [#allocation7 + $0x1], 0  ;;  %s5271_s30 = smov 0   ;;  %s5273_s10 = smov 0  }
   0x8   :  { %s5275_s11 = smov 0   ;;  %s5277_s12 = smov 0  }
   0x9 LB: > { %s5292_s13 = sadd.s32 4294967295, %s5185_s12   ;;  %s4085_s14 = sadd.s32 4294967294, %s5185_s12   ;;  %s5185_s12 = sphi %s5277_s12, %s6796_s12   ;;  %s5181_s11 = sphi %s5275_s11, %s6795_s11   ;;  %s5177_s10 = sphi %s5273_s10, %s6794_s10   ;;  %s5173_s30 = sphi %s5271_s30, %s6793_s30  }
   0xa   : > { %s5296_s15 = sadd.s32 1, %s5185_s12   ;;  %s223_s16 = sadd.s32 1, %s5181_s11 }
   0xb   : > { %s220_s17 = ssub.s32 %s5185_s12, %s5296_s15  ;;  %p233_p0 = scmp.ne.s32.totalorder %s5181_s11, %s5177_s10 }
   0xc   : > { %p221_p1 = scmp.eq.s32.totalorder %s220_s17, 0  ;;  %p234_p2 = scmp.eq.s32.totalorder %s5292_s13, 1 }
   0xd   : > { %p239_p3 = scmp.ne.s32.totalorder %s5177_s10, %s5173_s30  ;;  %p240_p4 = scmp.eq.s32.totalorder %s4085_s14, 1 }
   0xe   : > { %s5307_s18 = scalar_select %p221_p1, %s5181_s11, %s223_s16  }
   0xf   : > { %p5309_p5 = por %p234_p2, %p233_p0  ;;  %p5313_p6 = por %p240_p4, %p239_p3 }
  0x10   : > { %p4088_p7 = scmp.ge.s32.totalorder %s5185_s12, 1  ;;  %p290_p8 = scmp.lt.s32.totalorder %s5185_s12, 3 }
  0x12   : > { %p291_p9 = pnand %p4088_p7, %p290_p8 }
  0x13   : > { %p325_p10 = scmp.lt.s32.totalorder (!%p291_p9), %s5292_s13, 1  ;;  %s6761_s0 = sld [smem:[#allocation9_spill]] (!%p291_p9) }
  0x14   : > { %294 = sbr.rel (%p291_p9) target bundleno = 1722 (0x6ba), region = 56  ;;  %s5188_s26 = smov (!%p291_p9), 6  }
  0x15   : > { %s5189_s27 = smov (!%p291_p9), 3   ;;  %s5190_s28 = smov (!%p291_p9), 9  }
  0x16   : > { %s5191_s29 = smov (!%p291_p9), 12   ;;  %s5192_s14 = smov (!%p291_p9), 15  }
  0x17   : > { %s5193_s16 = smov (!%p291_p9), 18   ;;  %s5194_s17 = smov (!%p291_p9), 21  }
  0x18   : > { %s5197_s23 = smov (!%p291_p9), 30   ;;  %s5198_s24 = smov (!%p291_p9), 33  }
  0x19   : > { %vm395_vm0 = vcmask 23552   ;;  %vm398_vm1 = vcmask 19456   ;;  %v5187_v0 = vmov 0.0   ;;  %s326_s21 = scalar_select %p325_p10, %s5292_s13, 1  ;;  %vm1919_vm2 = vcmask 1044480  }
  0x1a   : > { %406 = vst.msk [vmem:[#allocation2 + $0x48] sm:$0xff] %vm395_vm0, %v5187_v0  ;;  %407 = vst.msk [vmem:[#allocation2 + $0x50] sm:$0xff] %vm395_vm0, %v5187_v0  ;;  %s6762_s1 = sld [smem:[#allocation10_spill]]  ;;  %vm1920_vm3 = vcmask 1045504   ;;  %vm1376_vm4 = vcmask 48128   ;;  %vm1385_vm5 = vcmask 72704  }
  0x1b   : > { %408 = vst.msk [vmem:[#allocation2 + $0x58] sm:$0xf] %vm398_vm1, %v5187_v0  ;;  %414 = vst.msk [vmem:[#allocation2 + $0x88] sm:$0xf] %vm398_vm1, %v5187_v0  ;;  %s4151_s22 = sshll.u32 %s326_s21, 7  ;;  %s6726_s21 = smov 24  }
  0x1c   : > { %412 = vst.msk [vmem:[#allocation2 + $0x78] sm:$0xff] %vm395_vm0, %v5187_v0  ;;  %413 = vst.msk [vmem:[#allocation2 + $0x80] sm:$0xff] %vm395_vm0, %v5187_v0  ;;  %s5440_s25 = scalar_lea.vmem %s6761_s0, %s4151_s22  ;;  %s5196_s22 = smov 27   ;;  %vm1394_vm6 = vcmask 97280   ;;  %vm1403_vm7 = vcmask 121856   ;;  %vm1412_vm8 = vcmask 146432  }
  0x1d   : > { %396 = vst.msk [vmem:[#allocation2] sm:$0xff] %vm395_vm0, %v5187_v0  ;;  %397 = vst.msk [vmem:[#allocation2 + $0x8] sm:$0xff] %vm395_vm0, %v5187_v0  ;;  %v4216_v1 = vld [vmem:[%s5440_s25 + $0x8] sm:$0xff]   ;;  %v4218_v2 = vld [vmem:[%s5440_s25 + $0x18] sm:$0xff]   ;;  %vm6721_vm9 = vcmask 171008   ;;  %vm1430_vm10 = vcmask 195584  }
  0x1e   : > { %399 = vst.msk [vmem:[#allocation2 + $0x10] sm:$0xf] %vm398_vm1, %v5187_v0  ;;  %402 = vst.msk [vmem:[#allocation2 + $0x28] sm:$0xf] %vm398_vm1, %v5187_v0  ;;  %v4220_v3 = vld [vmem:[%s5440_s25 + $0x28] sm:$0xff]   ;;  %v4158_v4 = vunpack.c.l.bf16 %v4216_v1  ;;  %v4159_v5 = vunpack.c.h.bf16 %v4216_v1  ;;  %v4166_v6 = vunpack.c.l.bf16 %v4218_v2  ;;  %v4167_v7 = vunpack.c.h.bf16 %v4218_v2  ;;  %v4222_v8 = vld [vmem:[%s5440_s25 + $0x38] sm:$0xff]  }
  0x1f   : > { %400 = vst.msk [vmem:[#allocation2 + $0x18] sm:$0xff] %vm395_vm0, %v5187_v0  ;;  %401 = vst.msk [vmem:[#allocation2 + $0x20] sm:$0xff] %vm395_vm0, %v5187_v0  ;;  %v4221_v9 = vld [vmem:[%s5440_s25 + $0x30] sm:$0xff]   ;;  %v4223_v10 = vld [vmem:[%s5440_s25 + $0x40] sm:$0xff]   ;;  %v4174_v11 = vunpack.c.l.bf16 %v4220_v3  ;;  %v4175_v12 = vunpack.c.h.bf16 %v4220_v3  ;;  %v4182_v13 = vunpack.c.l.bf16 %v4222_v8  ;;  %v4183_v14 = vunpack.c.h.bf16 %v4222_v8  ;;  %s6767_s3 = sld [smem:[#allocation12_spill]]  ;;  %s6786_s0 = smov 32  }
  0x20   : > { %403 = vst.msk [vmem:[#allocation2 + $0x30] sm:$0xff] %vm395_vm0, %v5187_v0  ;;  %404 = vst.msk [vmem:[#allocation2 + $0x38] sm:$0xff] %vm395_vm0, %v5187_v0  ;;  %v4217_v15 = vld [vmem:[%s5440_s25 + $0x10] sm:$0xff]   ;;  %v4219_v16 = vld [vmem:[%s5440_s25 + $0x20] sm:$0xff]   ;;  %v4178_v18 = vunpack.c.l.bf16 %v4221_v9  ;;  %v4179_v19 = vunpack.c.h.bf16 %v4221_v9  ;;  %v4186_v20 = vunpack.c.l.bf16 %v4223_v10  ;;  %v4187_v21 = vunpack.c.h.bf16 %v4223_v10  ;;  %s6768_s2 = sld [smem:[#allocation11_spill]] }
  0x21   : > { %405 = vst.msk [vmem:[#allocation2 + $0x40] sm:$0xf] %vm398_vm1, %v5187_v0  ;;  %411 = vst.msk [vmem:[#allocation2 + $0x70] sm:$0xf] %vm398_vm1, %v5187_v0  ;;  %v4224_v17 = vld [vmem:[%s5440_s25 + $0x48] sm:$0xff]   ;;  %v4226_v22 = vld [vmem:[%s5440_s25 + $0x58] sm:$0xff]   ;;  %v4162_v25 = vunpack.c.l.bf16 %v4217_v15  ;;  %v4163_v26 = vunpack.c.h.bf16 %v4217_v15  ;;  %v4170_v27 = vunpack.c.l.bf16 %v4219_v16  ;;  %v4171_v28 = vunpack.c.h.bf16 %v4219_v16 }
  0x22   : > { %409 = vst.msk [vmem:[#allocation2 + $0x60] sm:$0xff] %vm395_vm0, %v5187_v0  ;;  %410 = vst.msk [vmem:[#allocation2 + $0x68] sm:$0xff] %vm395_vm0, %v5187_v0  ;;  %v4228_v23 = vld [vmem:[%s5440_s25 + $0x68] sm:$0xff]   ;;  %v4230_v24 = vld [vmem:[%s5440_s25 + $0x78] sm:$0xff]   ;;  %v4190_v31 = vunpack.c.l.bf16 %v4224_v17  ;;  %v4191_v32 = vunpack.c.h.bf16 %v4224_v17  ;;  %v4198_v33 = vunpack.c.l.bf16 %v4226_v22  ;;  %v4199_v34 = vunpack.c.h.bf16 %v4226_v22  ;;  %s6769_s4 = sld [smem:[#allocation13_spill]] }
  0x23   : > { %415 = vst.msk [vmem:[#allocation2 + $0x90] sm:$0xff] %vm395_vm0, %v5187_v0  ;;  %416 = vst.msk [vmem:[#allocation2 + $0x98] sm:$0xff] %vm395_vm0, %v5187_v0  ;;  %v4229_v29 = vld [vmem:[%s5440_s25 + $0x70] sm:$0xff]   ;;  %v4227_v35 = vld [vmem:[%s5440_s25 + $0x60] sm:$0xff]   ;;  %v4206_v36 = vunpack.c.l.bf16 %v4228_v23  ;;  %v4207_v37 = vunpack.c.h.bf16 %v4228_v23  ;;  %v4214_v38 = vunpack.c.l.bf16 %v4230_v24  ;;  %v4215_v39 = vunpack.c.h.bf16 %v4230_v24 }
  0x24   : > { %417 = vst.msk [vmem:[#allocation2 + $0xa0] sm:$0xf] %vm398_vm1, %v5187_v0  ;;  %420 = vst.msk [vmem:[#allocation2 + $0xb8] sm:$0xf] %vm398_vm1, %v5187_v0  ;;  %v4225_v30 = vld [vmem:[%s5440_s25 + $0x50] sm:$0xff]   ;;  %v4153_v40 = vld [vmem:[%s5440_s25] sm:$0xff]   ;;  %v4210_v41 = vunpack.c.l.bf16 %v4229_v29  ;;  %v4211_v42 = vunpack.c.h.bf16 %v4229_v29  ;;  %v4202_v45 = vunpack.c.l.bf16 %v4227_v35  ;;  %v4203_v46 = vunpack.c.h.bf16 %v4227_v35 }
  0x25   : > { %418 = vst.msk [vmem:[#allocation2 + $0xa8] sm:$0xff] %vm395_vm0, %v5187_v0  ;;  %419 = vst.msk [vmem:[#allocation2 + $0xb0] sm:$0xff] %vm395_vm0, %v5187_v0  ;;  %v4194_v43 = vunpack.c.l.bf16 %v4225_v30  ;;  %v4195_v44 = vunpack.c.h.bf16 %v4225_v30  ;;  %v4154_v47 = vunpack.c.l.bf16 %v4153_v40  ;;  %v4155_v48 = vunpack.c.h.bf16 %v4153_v40  ;;  %s5199_s25 = smov 36  }
  0x26   : > { %421 = vst.msk [vmem:[#allocation2 + $0xc0] sm:$0xff] %vm395_vm0, %v5187_v0  ;;  %422 = vst.msk [vmem:[#allocation2 + $0xc8] sm:$0xff] %vm395_vm0, %v5187_v0  ;;  %vm1439_vm11 = vcmask 220160   ;;  %vm1448_vm12 = vcmask 244736   ;;  %vm1457_vm13 = vcmask 269312   ;;  %vm1466_vm14 = vcmask 293888  }
  0x27   : > { %423 = vst.msk [vmem:[#allocation2 + $0xd0] sm:$0xf] %vm398_vm1, %v5187_v0  ;;  %426 = vst.msk [vmem:[#allocation2 + $0xe8] sm:$0xf] %vm398_vm1, %v5187_v0  ;;  %vm1475_vm15 = vcmask 318464  }
  0x28   : > { %424 = vst.msk [vmem:[#allocation2 + $0xd8] sm:$0xff] %vm395_vm0, %v5187_v0  ;;  %425 = vst.msk [vmem:[#allocation2 + $0xe0] sm:$0xff] %vm395_vm0, %v5187_v0 }
  0x29   : > { %427 = vst.msk [vmem:[#allocation2 + $0xf0] sm:$0xff] %vm395_vm0, %v5187_v0  ;;  %428 = vst.msk [vmem:[#allocation2 + $0xf8] sm:$0xff] %vm395_vm0, %v5187_v0 }
  0x2a   : > { %429 = vst.msk [vmem:[#allocation2 + $0x100] sm:$0xf] %vm398_vm1, %v5187_v0  ;;  %432 = vst.msk [vmem:[#allocation2 + $0x118] sm:$0xf] %vm398_vm1, %v5187_v0 }
  0x2b   : > { %430 = vst.msk [vmem:[#allocation2 + $0x108] sm:$0xff] %vm395_vm0, %v5187_v0  ;;  %431 = vst.msk [vmem:[#allocation2 + $0x110] sm:$0xff] %vm395_vm0, %v5187_v0 }
  0x2c   : > { %433 = vst.msk [vmem:[#allocation2 + $0x120] sm:$0xff] %vm395_vm0, %v5187_v0  ;;  %434 = vst.msk [vmem:[#allocation2 + $0x128] sm:$0xff] %vm395_vm0, %v5187_v0 }
  0x2d   : > { %435 = vst.msk [vmem:[#allocation2 + $0x130] sm:$0xf] %vm398_vm1, %v5187_v0  ;;  %438 = vst.msk [vmem:[#allocation2 + $0x148] sm:$0xf] %vm398_vm1, %v5187_v0 }
  0x2e   : > { %436 = vst.msk [vmem:[#allocation2 + $0x138] sm:$0xff] %vm395_vm0, %v5187_v0  ;;  %437 = vst.msk [vmem:[#allocation2 + $0x140] sm:$0xff] %vm395_vm0, %v5187_v0 }
  0x2f   : > { %439 = vst.msk [vmem:[#allocation2 + $0x150] sm:$0xff] %vm395_vm0, %v5187_v0  ;;  %440 = vst.msk [vmem:[#allocation2 + $0x158] sm:$0xff] %vm395_vm0, %v5187_v0 }
  0x30   : > { %441 = vst.msk [vmem:[#allocation2 + $0x160] sm:$0xf] %vm398_vm1, %v5187_v0  ;;  %444 = vst.msk [vmem:[#allocation2 + $0x178] sm:$0xf] %vm398_vm1, %v5187_v0 }
  0x31   : > { %442 = vst.msk [vmem:[#allocation2 + $0x168] sm:$0xff] %vm395_vm0, %v5187_v0  ;;  %443 = vst.msk [vmem:[#allocation2 + $0x170] sm:$0xff] %vm395_vm0, %v5187_v0 }
  0x32   : > { %445 = vst.msk [vmem:[#allocation2 + $0x180] sm:$0xff] %vm395_vm0, %v5187_v0  ;;  %446 = vst.msk [vmem:[#allocation2 + $0x188] sm:$0xff] %vm395_vm0, %v5187_v0 }
  0x33   : > { %447 = vst.msk [vmem:[#allocation2 + $0x190] sm:$0xf] %vm398_vm1, %v5187_v0  ;;  %450 = vst.msk [vmem:[#allocation2 + $0x1a8] sm:$0xf] %vm398_vm1, %v5187_v0 }
  0x34   : > { %448 = vst.msk [vmem:[#allocation2 + $0x198] sm:$0xff] %vm395_vm0, %v5187_v0  ;;  %449 = vst.msk [vmem:[#allocation2 + $0x1a0] sm:$0xff] %vm395_vm0, %v5187_v0 }
  0x35   : > { %451 = vst.msk [vmem:[#allocation2 + $0x1b0] sm:$0xff] %vm395_vm0, %v5187_v0  ;;  %452 = vst.msk [vmem:[#allocation2 + $0x1b8] sm:$0xff] %vm395_vm0, %v5187_v0 }
  0x36   : > { %453 = vst.msk [vmem:[#allocation2 + $0x1c0] sm:$0xf] %vm398_vm1, %v5187_v0  ;;  %vm1484_vm1 = vcmask 343040  }
  0x37   : > { %460 = vst.msk [vmem:[#allocation2 + $0x4a] sm:$0xff] %vm395_vm0, %v4158_v4  ;;  %461 = vst.msk [vmem:[#allocation2 + $0x52] sm:$0xff] %vm395_vm0, %v4159_v5 }
  0x38   : > { %464 = vst.msk [vmem:[#allocation2 + $0x7a] sm:$0xff] %vm395_vm0, %v4166_v6  ;;  %465 = vst.msk [vmem:[#allocation2 + $0x82] sm:$0xff] %vm395_vm0, %v4167_v7 }
  0x39   : > { %468 = vst.msk [vmem:[#allocation2 + $0xaa] sm:$0xff] %vm395_vm0, %v4174_v11  ;;  %469 = vst.msk [vmem:[#allocation2 + $0xb2] sm:$0xff] %vm395_vm0, %v4175_v12 }
  0x3a   : > { %472 = vst.msk [vmem:[#allocation2 + $0xda] sm:$0xff] %vm395_vm0, %v4182_v13  ;;  %473 = vst.msk [vmem:[#allocation2 + $0xe2] sm:$0xff] %vm395_vm0, %v4183_v14 }
  0x3b   : > { %470 = vst.msk [vmem:[#allocation2 + $0xc2] sm:$0xff] %vm395_vm0, %v4178_v18  ;;  %471 = vst.msk [vmem:[#allocation2 + $0xca] sm:$0xff] %vm395_vm0, %v4179_v19 }
  0x3c   : > { %474 = vst.msk [vmem:[#allocation2 + $0xf2] sm:$0xff] %vm395_vm0, %v4186_v20  ;;  %475 = vst.msk [vmem:[#allocation2 + $0xfa] sm:$0xff] %vm395_vm0, %v4187_v21 }
  0x3d   : > { %462 = vst.msk [vmem:[#allocation2 + $0x62] sm:$0xff] %vm395_vm0, %v4162_v25  ;;  %463 = vst.msk [vmem:[#allocation2 + $0x6a] sm:$0xff] %vm395_vm0, %v4163_v26 }
  0x3e   : > { %466 = vst.msk [vmem:[#allocation2 + $0x92] sm:$0xff] %vm395_vm0, %v4170_v27  ;;  %467 = vst.msk [vmem:[#allocation2 + $0x9a] sm:$0xff] %vm395_vm0, %v4171_v28  ;;  %v777_v49 = vld [vmem:[#allocation2 + $0x4b] ss:$2 sm:$0xff]  ;;  %v761_v51 = vld [vmem:[#allocation2 + $0x4a] ss:$2 sm:$0xff] }
  0x3f   : > { %476 = vst.msk [vmem:[#allocation2 + $0x10a] sm:$0xff] %vm395_vm0, %v4190_v31  ;;  %477 = vst.msk [vmem:[#allocation2 + $0x112] sm:$0xff] %vm395_vm0, %v4191_v32  ;;  %v779_v50 = vld [vmem:[#allocation2 + $0x7b] ss:$2 sm:$0xff]  ;;  %v763_v53 = vld [vmem:[#allocation2 + $0x7a] ss:$2 sm:$0xff] }
  0x40   : > { %480 = vst.msk [vmem:[#allocation2 + $0x13a] sm:$0xff] %vm395_vm0, %v4198_v33  ;;  %481 = vst.msk [vmem:[#allocation2 + $0x142] sm:$0xff] %vm395_vm0, %v4199_v34  ;;  %v4436_v52 = vpack.i.bf16 %v779_v50, %v777_v49  ;;  %v781_v54 = vld [vmem:[#allocation2 + $0xab] ss:$2 sm:$0xff]  ;;  %v4426_v56 = vpack.i.bf16 %v763_v53, %v761_v51  ;;  %v765_v57 = vld [vmem:[#allocation2 + $0xaa] ss:$2 sm:$0xff] }
  0x41   : > { %484 = vst.msk [vmem:[#allocation2 + $0x16a] sm:$0xff] %vm395_vm0, %v4206_v36  ;;  %485 = vst.msk [vmem:[#allocation2 + $0x172] sm:$0xff] %vm395_vm0, %v4207_v37  ;;  %v783_v55 = vld [vmem:[#allocation2 + $0xdb] ss:$2 sm:$0xff]  ;;  %v767_v58 = vld [vmem:[#allocation2 + $0xda] ss:$2 sm:$0xff] }
  0x42   : > { %488 = vst.msk [vmem:[#allocation2 + $0x19a] sm:$0xff] %vm395_vm0, %v4214_v38  ;;  %489 = vst.msk [vmem:[#allocation2 + $0x1a2] sm:$0xff] %vm395_vm0, %v4215_v39  ;;  %4437 = vrot.lane.b32.xlu1 %v4436_v52, %s5188_s26  ;;  %v4441_v59 = vpack.i.bf16 %v783_v55, %v781_v54  ;;  %4427 = vrot.lane.b32.xlu0 %v4426_v56, %s5189_s27  ;;  %v4431_v60 = vpack.i.bf16 %v767_v58, %v765_v57  ;;  %v797_v61 = vld [vmem:[#allocation2 + $0xac] ss:$2 sm:$0xff]  ;;  %v799_v62 = vld [vmem:[#allocation2 + $0xdc] ss:$2 sm:$0xff] }
  0x43   : > { %486 = vst.msk [vmem:[#allocation2 + $0x182] sm:$0xff] %vm395_vm0, %v4210_v41  ;;  %487 = vst.msk [vmem:[#allocation2 + $0x18a] sm:$0xff] %vm395_vm0, %v4211_v42  ;;  %v793_v63 = vld [vmem:[#allocation2 + $0x4c] ss:$2 sm:$0xff]  ;;  %v795_v1 = vld [vmem:[#allocation2 + $0x7c] ss:$2 sm:$0xff]  ;;  %v4451_v2 = vpack.i.bf16 %v799_v62, %v797_v61 }
  0x44   : > { %478 = vst.msk [vmem:[#allocation2 + $0x122] sm:$0xff] %vm395_vm0, %v4194_v43  ;;  %479 = vst.msk [vmem:[#allocation2 + $0x12a] sm:$0xff] %vm395_vm0, %v4195_v44  ;;  %v4446_v3 = vpack.i.bf16 %v795_v1, %v793_v63  ;;  %v813_v4 = vld [vmem:[#allocation2 + $0xc0] ss:$2 sm:$0xff]  ;;  %v815_v5 = vld [vmem:[#allocation2 + $0xf0] ss:$2 sm:$0xff] }
  0x45   : > { %482 = vst.msk [vmem:[#allocation2 + $0x152] sm:$0xff] %vm395_vm0, %v4202_v45  ;;  %483 = vst.msk [vmem:[#allocation2 + $0x15a] sm:$0xff] %vm395_vm0, %v4203_v46  ;;  %v809_v6 = vld [vmem:[#allocation2 + $0x60] ss:$2 sm:$0xff]  ;;  %v811_v7 = vld [vmem:[#allocation2 + $0x90] ss:$2 sm:$0xff]  ;;  %v4461_v8 = vpack.i.bf16 %v815_v5, %v813_v4 }
  0x46   : > { %458 = vst.msk [vmem:[#allocation2 + $0x32] sm:$0xff] %vm395_vm0, %v4154_v47  ;;  %459 = vst.msk [vmem:[#allocation2 + $0x3a] sm:$0xff] %vm395_vm0, %v4155_v48  ;;  %4442 = vrot.lane.b32.xlu1 %v4441_v59, %s5188_s26  ;;  %4432 = vrot.lane.b32.xlu0 %v4431_v60, %s5189_s27  ;;  %v4456_v9 = vpack.i.bf16 %v811_v7, %v809_v6  ;;  %v829_v10 = vld [vmem:[#allocation2 + $0xc1] ss:$2 sm:$0xff]  ;;  %v831_v11 = vld [vmem:[#allocation2 + $0xf1] ss:$2 sm:$0xff] }
  0x47   : > { %v825_v12 = vld [vmem:[#allocation2 + $0x61] ss:$2 sm:$0xff]  ;;  %v827_v13 = vld [vmem:[#allocation2 + $0x91] ss:$2 sm:$0xff]  ;;  %v4471_v14 = vpack.i.bf16 %v831_v11, %v829_v10  ;;  %v845_v16 = vld [vmem:[#allocation2 + $0xc2] ss:$2 sm:$0xff] }
  0x48   : > { %v4466_v15 = vpack.i.bf16 %v827_v13, %v825_v12  ;;  %v847_v17 = vld [vmem:[#allocation2 + $0xf2] ss:$2 sm:$0xff]  ;;  %v841_v18 = vld [vmem:[#allocation2 + $0x62] ss:$2 sm:$0xff]  ;;  %v861_v22 = vld [vmem:[#allocation2 + $0xc3] ss:$2 sm:$0xff] }
  0x49   : > { %v843_v19 = vld [vmem:[#allocation2 + $0x92] ss:$2 sm:$0xff]  ;;  %v4481_v20 = vpack.i.bf16 %v847_v17, %v845_v16  ;;  %v863_v23 = vld [vmem:[#allocation2 + $0xf3] ss:$2 sm:$0xff]  ;;  %v857_v24 = vld [vmem:[#allocation2 + $0x63] ss:$2 sm:$0xff] }
  0x4a   : > { %4452 = vrot.lane.b32.xlu1 %v4451_v2, %s5190_s28  ;;  %4447 = vrot.lane.b32.xlu0 %v4446_v3, %s5190_s28  ;;  %v4476_v21 = vpack.i.bf16 %v843_v19, %v841_v18  ;;  %v859_v25 = vld [vmem:[#allocation2 + $0x93] ss:$2 sm:$0xff]  ;;  %v4491_v26 = vpack.i.bf16 %v863_v23, %v861_v22  ;;  %v769_v28 = vld [vmem:[#allocation2 + $0x10a] ss:$2 sm:$0xff]  ;;  %v771_v29 = vld [vmem:[#allocation2 + $0x13a] ss:$2 sm:$0xff] }
  0x4b   : > { %v4486_v27 = vpack.i.bf16 %v859_v25, %v857_v24  ;;  %v873_v30 = vld [vmem:[#allocation2 + $0x64] ss:$2 sm:$0xff]  ;;  %v875_v31 = vld [vmem:[#allocation2 + $0x94] ss:$2 sm:$0xff]  ;;  %v4501_v32 = vpack.i.bf16 %v771_v29, %v769_v28  ;;  %v789_v40 = vld [vmem:[#allocation2 + $0x16b] ss:$2 sm:$0xff] }
  0x4c   : > { %v4496_v33 = vpack.i.bf16 %v875_v31, %v873_v30  ;;  %v773_v34 = vld [vmem:[#allocation2 + $0x16a] ss:$2 sm:$0xff]  ;;  %v775_v35 = vld [vmem:[#allocation2 + $0x19a] ss:$2 sm:$0xff]  ;;  %v791_v41 = vld [vmem:[#allocation2 + $0x19b] ss:$2 sm:$0xff] }
  0x4d   : > { %v877_v36 = vld [vmem:[#allocation2 + $0xc4] ss:$2 sm:$0xff]  ;;  %v879_v37 = vld [vmem:[#allocation2 + $0xf4] ss:$2 sm:$0xff]  ;;  %v4511_v38 = vpack.i.bf16 %v775_v35, %v773_v34  ;;  %v785_v42 = vld [vmem:[#allocation2 + $0x10b] ss:$2 sm:$0xff]  ;;  %v4521_v44 = vpack.i.bf16 %v791_v41, %v789_v40 }
  0x4e   : > { %4462 = vrot.lane.b32.xlu1 %v4461_v8, %s5191_s29  ;;  %4457 = vrot.lane.b32.xlu0 %v4456_v9, %s5191_s29  ;;  %v4506_v39 = vpack.i.bf16 %v879_v37, %v877_v36  ;;  %v787_v43 = vld [vmem:[#allocation2 + $0x13b] ss:$2 sm:$0xff]  ;;  %v805_v46 = vld [vmem:[#allocation2 + $0x16c] ss:$2 sm:$0xff]  ;;  %v807_v47 = vld [vmem:[#allocation2 + $0x19c] ss:$2 sm:$0xff] }
  0x4f   : > { %v4516_v45 = vpack.i.bf16 %v787_v43, %v785_v42  ;;  %v801_v48 = vld [vmem:[#allocation2 + $0x10c] ss:$2 sm:$0xff]  ;;  %v803_v49 = vld [vmem:[#allocation2 + $0x13c] ss:$2 sm:$0xff]  ;;  %v4531_v50 = vpack.i.bf16 %v807_v47, %v805_v46  ;;  %v837_v58 = vld [vmem:[#allocation2 + $0x181] ss:$2 sm:$0xff] }
  0x50   : > { %v4526_v51 = vpack.i.bf16 %v803_v49, %v801_v48  ;;  %v821_v52 = vld [vmem:[#allocation2 + $0x180] ss:$2 sm:$0xff]  ;;  %v823_v53 = vld [vmem:[#allocation2 + $0x1b0] ss:$2 sm:$0xff]  ;;  %v839_v59 = vld [vmem:[#allocation2 + $0x1b1] ss:$2 sm:$0xff] }
  0x51   : > { %v817_v54 = vld [vmem:[#allocation2 + $0x120] ss:$2 sm:$0xff]  ;;  %v819_v55 = vld [vmem:[#allocation2 + $0x150] ss:$2 sm:$0xff]  ;;  %v4541_v56 = vpack.i.bf16 %v823_v53, %v821_v52  ;;  %v833_v60 = vld [vmem:[#allocation2 + $0x121] ss:$2 sm:$0xff]  ;;  %v4551_v62 = vpack.i.bf16 %v839_v59, %v837_v58 }
  0x52   : > { %4472 = vrot.lane.b32.xlu1 %v4471_v14, %s5192_s14  ;;  %4467 = vrot.lane.b32.xlu0 %v4466_v15, %s5192_s14  ;;  %v4536_v57 = vpack.i.bf16 %v819_v55, %v817_v54  ;;  %v835_v61 = vld [vmem:[#allocation2 + $0x151] ss:$2 sm:$0xff]  ;;  %v853_v1 = vld [vmem:[#allocation2 + $0x182] ss:$2 sm:$0xff]  ;;  %v855_v2 = vld [vmem:[#allocation2 + $0x1b2] ss:$2 sm:$0xff] }
  0x53   : > { %v4546_v63 = vpack.i.bf16 %v835_v61, %v833_v60  ;;  %v849_v3 = vld [vmem:[#allocation2 + $0x122] ss:$2 sm:$0xff]  ;;  %v851_v4 = vld [vmem:[#allocation2 + $0x152] ss:$2 sm:$0xff]  ;;  %v4561_v5 = vpack.i.bf16 %v855_v2, %v853_v1  ;;  %v869_v7 = vld [vmem:[#allocation2 + $0x183] ss:$2 sm:$0xff] }
  0x54   : > { %v4556_v6 = vpack.i.bf16 %v851_v4, %v849_v3  ;;  %v871_v8 = vld [vmem:[#allocation2 + $0x1b3] ss:$2 sm:$0xff]  ;;  %v865_v9 = vld [vmem:[#allocation2 + $0x123] ss:$2 sm:$0xff]  ;;  %v885_v13 = vld [vmem:[#allocation2 + $0x184] ss:$2 sm:$0xff] }
  0x55   : > { %v867_v10 = vld [vmem:[#allocation2 + $0x153] ss:$2 sm:$0xff]  ;;  %v4571_v11 = vpack.i.bf16 %v871_v8, %v869_v7  ;;  %v887_v14 = vld [vmem:[#allocation2 + $0x1b4] ss:$2 sm:$0xff]  ;;  %v881_v15 = vld [vmem:[#allocation2 + $0x124] ss:$2 sm:$0xff] }
  0x56   : > { %4482 = vrot.lane.b32.xlu1 %v4481_v20, %s5193_s16  ;;  %4477 = vrot.lane.b32.xlu0 %v4476_v21, %s5193_s16  ;;  %v4566_v12 = vpack.i.bf16 %v867_v10, %v865_v9  ;;  %v883_v16 = vld [vmem:[#allocation2 + $0x154] ss:$2 sm:$0xff]  ;;  %v4581_v17 = vpack.i.bf16 %v887_v14, %v885_v13  ;;  %v510_v19 = vld [vmem:[#allocation2 + $0x61] ss:$2 sm:$0xff]  ;;  %v512_v20 = vld [vmem:[#allocation2 + $0x91] ss:$2 sm:$0xff] }
  0x57   : > { %v4576_v18 = vpack.i.bf16 %v883_v16, %v881_v15  ;;  %v506_v21 = vld [vmem:[#allocation2 + $0x1] ss:$2 sm:$0xff]  ;;  %v508_v22 = vld [vmem:[#allocation2 + $0x31] ss:$2 sm:$0xff]  ;;  %v526_v23 = vld [vmem:[#allocation2 + $0x62] ss:$2 sm:$0xff]  ;;  %v4591_v25 = vpack.i.bf16 %v512_v20, %v510_v19 }
  0x58   : > { %v528_v24 = vld [vmem:[#allocation2 + $0x92] ss:$2 sm:$0xff]  ;;  %v4586_v28 = vpack.i.bf16 %v508_v22, %v506_v21  ;;  %v542_v29 = vld [vmem:[#allocation2 + $0x63] ss:$2 sm:$0xff]  ;;  %v544_v30 = vld [vmem:[#allocation2 + $0x93] ss:$2 sm:$0xff] }
  0x59   : > { %v4601_v31 = vpack.i.bf16 %v528_v24, %v526_v23  ;;  %v558_v35 = vld [vmem:[#allocation2 + $0x64] ss:$2 sm:$0xff]  ;;  %v560_v36 = vld [vmem:[#allocation2 + $0x94] ss:$2 sm:$0xff]  ;;  %v4611_v37 = vpack.i.bf16 %v544_v30, %v542_v29  ;;  %v590_v47 = vld [vmem:[#allocation2 + $0x79] ss:$2 sm:$0xff] }
  0x5a   : > { %4492 = vrot.lane.b32.xlu1 %v4491_v26, %s5194_s17  ;;  %4487 = vrot.lane.b32.xlu0 %v4486_v27, %s5194_s17  ;;  %v522_v26 = vld [vmem:[#allocation2 + $0x2] ss:$2 sm:$0xff]  ;;  %v524_v27 = vld [vmem:[#allocation2 + $0x32] ss:$2 sm:$0xff]  ;;  %v4621_v43 = vpack.i.bf16 %v560_v36, %v558_v35  ;;  %v592_v48 = vld [vmem:[#allocation2 + $0xa9] ss:$2 sm:$0xff] }
  0x5b   : > { %v4596_v34 = vpack.i.bf16 %v524_v27, %v522_v26  ;;  %v574_v41 = vld [vmem:[#allocation2 + $0x78] ss:$2 sm:$0xff]  ;;  %v576_v42 = vld [vmem:[#allocation2 + $0xa8] ss:$2 sm:$0xff]  ;;  %v588_v52 = vld [vmem:[#allocation2 + $0x49] ss:$2 sm:$0xff]  ;;  %v4641_v55 = vpack.i.bf16 %v592_v48, %v590_v47 }
  0x5c   : > { %v4631_v49 = vpack.i.bf16 %v576_v42, %v574_v41  ;;  %v606_v53 = vld [vmem:[#allocation2 + $0x7a] ss:$2 sm:$0xff]  ;;  %v608_v54 = vld [vmem:[#allocation2 + $0xaa] ss:$2 sm:$0xff]  ;;  %v514_v59 = vld [vmem:[#allocation2 + $0xc1] ss:$2 sm:$0xff] }
  0x5d   : > { %v604_v58 = vld [vmem:[#allocation2 + $0x4a] ss:$2 sm:$0xff]  ;;  %v4651_v60 = vpack.i.bf16 %v608_v54, %v606_v53  ;;  %v620_v1 = vld [vmem:[#allocation2 + $0x4b] ss:$2 sm:$0xff] }
  0x5e   : > { %4502 = vrot.lane.b32.xlu1 %v4501_v32, %s5189_s27  ;;  %4497 = vrot.lane.b32.xlu0 %v4496_v33, %s6726_s21  ;;  %v538_v32 = vld [vmem:[#allocation2 + $0x3] ss:$2 sm:$0xff]  ;;  %v540_v33 = vld [vmem:[#allocation2 + $0x33] ss:$2 sm:$0xff]  ;;  %v634_v4 = vld [vmem:[#allocation2 + $0x1c] ss:$2 sm:$0xff] }
  0x5f   : > { %v4606_v40 = vpack.i.bf16 %v540_v33, %v538_v32  ;;  %v624_v7 = vld [vmem:[#allocation2 + $0xab] ss:$2 sm:$0xff]  ;;  %v530_v10 = vld [vmem:[#allocation2 + $0xc2] ss:$2 sm:$0xff] }
  0x60   : > { %v520_v13 = vld [vmem:[#allocation2 + $0x151] ss:$2 sm:$0xff]  ;;  %v649_v16 = vld [vmem:[#allocation2 + $0x30] ss:$2 sm:$0xff]  ;;  %v667_v29 = vld [vmem:[#allocation2 + $0x61] ss:$2 sm:$0xff] }
  0x61   : > { %v640_v19 = vld [vmem:[#allocation2 + $0xac] ss:$2 sm:$0xff]  ;;  %v546_v22 = vld [vmem:[#allocation2 + $0xc3] ss:$2 sm:$0xff]  ;;  %v548_v23 = vld [vmem:[#allocation2 + $0xf3] ss:$2 sm:$0xff] }
  0x62   : > { %4512 = vrot.lane.b32.xlu1 %v4511_v38, %s5189_s27  ;;  %4507 = vrot.lane.b32.xlu0 %v4506_v39, %s6726_s21  ;;  %v554_v38 = vld [vmem:[#allocation2 + $0x4] ss:$2 sm:$0xff]  ;;  %v556_v39 = vld [vmem:[#allocation2 + $0x34] ss:$2 sm:$0xff]  ;;  %v4701_v26 = vpack.i.bf16 %v548_v23, %v546_v22  ;;  %v550_v36 = vld [vmem:[#allocation2 + $0x123] ss:$2 sm:$0xff] }
  0x63   : > { %v4616_v46 = vpack.i.bf16 %v556_v39, %v554_v38  ;;  %v534_v24 = vld [vmem:[#allocation2 + $0x122] ss:$2 sm:$0xff] }
  0x64   : > { %v653_v30 = vld [vmem:[#allocation2 + $0x90] ss:$2 sm:$0xff] }
  0x65   : > { %v564_v35 = vld [vmem:[#allocation2 + $0xf4] ss:$2 sm:$0xff] }
  0x66   : > { %4522 = vrot.lane.b32.xlu1 %v4521_v44, %s5188_s26  ;;  %4517 = vrot.lane.b32.xlu0 %v4516_v45, %s5188_s26  ;;  %v570_v44 = vld [vmem:[#allocation2 + $0x18] ss:$2 sm:$0xff]  ;;  %v572_v45 = vld [vmem:[#allocation2 + $0x48] ss:$2 sm:$0xff] }
  0x67   : > { %v683_v41 = vld [vmem:[#allocation2 + $0x62] ss:$2 sm:$0xff] }
  0x68   : > { %v578_v48 = vld [vmem:[#allocation2 + $0xd8] ss:$2 sm:$0xff] }
  0x69   : > { %v610_v23 = vld [vmem:[#allocation2 + $0xda] ss:$2 sm:$0xff] }
  0x6a   : > { %4532 = vrot.lane.b32.xlu1 %v4531_v50, %s5190_s28  ;;  %4527 = vrot.lane.b32.xlu0 %v4526_v51, %s5190_s28  ;;  %v4626_v50 = vpack.i.bf16 %v572_v45, %v570_v44  ;;  %v586_v51 = vld [vmem:[#allocation2 + $0x19] ss:$2 sm:$0xff] }
  0x6b   : > { %v671_v44 = vld [vmem:[#allocation2 + $0xc1] ss:$2 sm:$0xff] }
  0x6e   : > { %4542 = vrot.lane.b32.xlu1 %v4541_v56, %s5191_s29  ;;  %4537 = vrot.lane.b32.xlu0 %v4536_v57, %s5191_s29  ;;  %v602_v56 = vld [vmem:[#allocation2 + $0x1a] ss:$2 sm:$0xff]  ;;  %v4636_v57 = vpack.i.bf16 %v588_v52, %v586_v51 }
  0x6f   : > { %v4646_v61 = vpack.i.bf16 %v604_v58, %v602_v56  ;;  %v566_v51 = vld [vmem:[#allocation2 + $0x124] ss:$2 sm:$0xff]  ;;  %v568_v52 = vld [vmem:[#allocation2 + $0x154] ss:$2 sm:$0xff]  ;;  %v697_v56 = vld [vmem:[#allocation2 + $0x33] ss:$2 sm:$0xff] }
  0x72   : > { %4552 = vrot.lane.b32.xlu1 %v4551_v62, %s5192_s14  ;;  %4547 = vrot.lane.b32.xlu0 %v4546_v63, %s5192_s14  ;;  %v516_v62 = vld [vmem:[#allocation2 + $0xf1] ss:$2 sm:$0xff] }
  0x73   : > { %v618_v63 = vld [vmem:[#allocation2 + $0x1b] ss:$2 sm:$0xff]  ;;  %v4661_v2 = vpack.i.bf16 %v516_v62, %v514_v59  ;;  %v685_v59 = vld [vmem:[#allocation2 + $0x92] ss:$2 sm:$0xff] }
  0x74   : > { %v4656_v3 = vpack.i.bf16 %v620_v1, %v618_v63  ;;  %v594_v1 = vld [vmem:[#allocation2 + $0xd9] ss:$2 sm:$0xff] }
  0x76   : > { %4562 = vrot.lane.b32.xlu1 %v4561_v5, %s5193_s16  ;;  %4557 = vrot.lane.b32.xlu0 %v4556_v6, %s5193_s16  ;;  %v636_v5 = vld [vmem:[#allocation2 + $0x4c] ss:$2 sm:$0xff]  ;;  %v622_v6 = vld [vmem:[#allocation2 + $0x7b] ss:$2 sm:$0xff] }
  0x77   : > { %v4671_v8 = vpack.i.bf16 %v636_v5, %v634_v4  ;;  %v4666_v9 = vpack.i.bf16 %v624_v7, %v622_v6  ;;  %v582_v4 = vld [vmem:[#allocation2 + $0x138] ss:$2 sm:$0xff]  ;;  %v584_v5 = vld [vmem:[#allocation2 + $0x168] ss:$2 sm:$0xff] }
  0x7a   : > { %4572 = vrot.lane.b32.xlu1 %v4571_v11, %s5194_s17  ;;  %4567 = vrot.lane.b32.xlu0 %v4566_v12, %s5194_s17  ;;  %v532_v11 = vld [vmem:[#allocation2 + $0xf2] ss:$2 sm:$0xff]  ;;  %v518_v12 = vld [vmem:[#allocation2 + $0x121] ss:$2 sm:$0xff] }
  0x7b   : > { %v4681_v14 = vpack.i.bf16 %v532_v11, %v530_v10  ;;  %v4676_v15 = vpack.i.bf16 %v520_v13, %v518_v12  ;;  %v715_v10 = vld [vmem:[#allocation2 + $0x64] ss:$2 sm:$0xff]  ;;  %v5201_v12 = vmov 65535  }
  0x7c   : > { %v5081_v11 = vld [vmem:[%s6762_s1 + $0x20] sm:$0x3f]   ;;  %v1921_v13 = vsel %vm1919_vm2, 4294967295, %v5201_v12  ;;  %vm1493_vm2 = vcmask 367616  }
  0x7e   : > { %4582 = vrot.lane.b32.xlu1 %v4581_v17, %s6726_s21  ;;  %4577 = vrot.lane.b32.xlu0 %v4576_v18, %s6726_s21  ;;  %v651_v17 = vld [vmem:[#allocation2 + $0x60] ss:$2 sm:$0xff] }
  0x7f   : > { %v638_v18 = vld [vmem:[#allocation2 + $0x7c] ss:$2 sm:$0xff]  ;;  %v4691_v20 = vpack.i.bf16 %v651_v17, %v649_v16  ;;  %v703_v16 = vld [vmem:[#allocation2 + $0xc3] ss:$2 sm:$0xff]  ;;  %v1922_v17 = vsel %vm1920_vm3, %v1921_v13, 0  ;;  %vm1854_vm3 = vcmask 392192  }
  0x80   : > { %v4686_v21 = vpack.i.bf16 %v640_v19, %v638_v18  ;;  %v1924_v19 = vand.u32 %v5081_v11, %v1922_v17  ;;  %v751_v13 = vld [vmem:[#allocation2 + $0xd9] ss:$2 sm:$0xff]  ;;  %v5084_v17 = vld [vmem:[%s6762_s1 + $0x8] sm:$0xff]  }
  0x82   : > { %4592 = vrot.lane.b32.xlu1 %v4591_v25, %s5189_s27  ;;  %4587 = vrot.lane.b32.xlu0 %v4586_v28, %s5189_s27  ;;  %v536_v25 = vld [vmem:[#allocation2 + $0x152] ss:$2 sm:$0xff]  ;;  %v665_v28 = vld [vmem:[#allocation2 + $0x31] ss:$2 sm:$0xff] }
  0x83   : > { %v4696_v27 = vpack.i.bf16 %v536_v25, %v534_v24  ;;  %v4711_v32 = vpack.i.bf16 %v667_v29, %v665_v28  ;;  %v598_v28 = vld [vmem:[#allocation2 + $0x139] ss:$2 sm:$0xff]  ;;  %v600_v29 = vld [vmem:[#allocation2 + $0x169] ss:$2 sm:$0xff]  ;;  %4240 = vmatprep.subr.bf16.mxu0 %v1924_v19 }
  0x84   : > { %4241 = vmatpush3.bf16.msra.mxu0 %v1924_v19 }
  0x86   : > { %4602 = vrot.lane.b32.xlu1 %v4601_v31, %s5188_s26  ;;  %4597 = vrot.lane.b32.xlu0 %v4596_v34, %s5188_s26  ;;  %v655_v31 = vld [vmem:[#allocation2 + $0xc0] ss:$2 sm:$0xff] }
  0x87   : > { %v4706_v33 = vpack.i.bf16 %v655_v31, %v653_v30  ;;  %v562_v34 = vld [vmem:[#allocation2 + $0xc4] ss:$2 sm:$0xff] }
  0x88   : > { %v4721_v38 = vpack.i.bf16 %v564_v35, %v562_v34  ;;  %v5585_v31 = vld [vmem:[#allocation2 + $0x48] ss:$2 sm:$0xff] }
  0x89   : > { %v5593_v35 = vld [vmem:[#allocation2 + $0xc4] ss:$2 sm:$0xff] }
  0x8a   : > { %4612 = vrot.lane.b32.xlu1 %v4611_v37, %s5190_s28  ;;  %4607 = vrot.lane.b32.xlu0 %v4606_v40, %s5190_s28  ;;  %v552_v37 = vld [vmem:[#allocation2 + $0x153] ss:$2 sm:$0xff]  ;;  %v681_v40 = vld [vmem:[#allocation2 + $0x32] ss:$2 sm:$0xff] }
  0x8b   : > { %v4716_v39 = vpack.i.bf16 %v552_v37, %v550_v36  ;;  %v5595_v36 = vld [vmem:[#allocation2 + $0xdb] ss:$2 sm:$0xff] }
  0x8c   : > { %v5082_v37 = vld [vmem:[%s6762_s1 + $0x18] sm:$0xff]  }
  0x8d   : > { %4242 = vmatprep.subr.bf16.mxu0 %v5082_v37 }
  0x8e   : > { %4622 = vrot.lane.b32.xlu1 %v4621_v43, %s5191_s29  ;;  %4617 = vrot.lane.b32.xlu0 %v4616_v46, %s5191_s29  ;;  %v669_v43 = vld [vmem:[#allocation2 + $0x91] ss:$2 sm:$0xff]  ;;  %v4731_v46 = vpack.i.bf16 %v683_v41, %v681_v40 }
  0x8f   : > { %v4726_v47 = vpack.i.bf16 %v671_v44, %v669_v43  ;;  %v5603_v41 = vld [vmem:[#allocation2 + $0x10b] ss:$2 sm:$0xff]  ;;  %v5605_v43 = vld [vmem:[#allocation2 + $0x13a] ss:$2 sm:$0xff]  ;;  %v5607_v44 = vld [vmem:[#allocation2 + $0x16a] ss:$2 sm:$0xff]  ;;  %4243 = vmatpush3.bf16.msra.mxu0 %v5082_v37 }
  0x92   : > { %4632 = vrot.lane.b32.xlu1 %v4631_v49, %s5192_s14  ;;  %4627 = vrot.lane.b32.xlu0 %v4626_v50, %s5192_s14  ;;  %v580_v49 = vld [vmem:[#allocation2 + $0x108] ss:$2 sm:$0xff] }
  0x93   : > { %v4741_v54 = vpack.i.bf16 %v580_v49, %v578_v48 }
  0x96   : > { %4642 = vrot.lane.b32.xlu1 %v4641_v55, %s5193_s16  ;;  %4637 = vrot.lane.b32.xlu0 %v4636_v57, %s5193_s16  ;;  %v4736_v55 = vpack.i.bf16 %v568_v52, %v566_v51  ;;  %v699_v57 = vld [vmem:[#allocation2 + $0x63] ss:$2 sm:$0xff] }
  0x97   : > { %v4751_v62 = vpack.i.bf16 %v699_v57, %v697_v56  ;;  %v4801_v57 = vpack.i.bf16 %v5603_v41, %v5595_v36 }
  0x9a   : > { %4652 = vrot.lane.b32.xlu1 %v4651_v60, %s5194_s17  ;;  %4647 = vrot.lane.b32.xlu0 %v4646_v61, %s5194_s17  ;;  %v687_v60 = vld [vmem:[#allocation2 + $0xc2] ss:$2 sm:$0xff] }
  0x9b   : > { %v4746_v63 = vpack.i.bf16 %v687_v60, %v685_v59  ;;  %v4796_v59 = vpack.i.bf16 %v5607_v44, %v5605_v43  ;;  %v5083_v60 = vld [vmem:[%s6762_s1 + $0x10] sm:$0xff]  }
  0x9c   : > { %4244 = vmatprep.subr.bf16.mxu0 %v5083_v60 }
  0x9d   : > { %4245 = vmatpush3.bf16.msra.mxu0 %v5083_v60 }
  0x9e   : > { %4662 = vrot.lane.b32.xlu1 %v4661_v2, %s5189_s27  ;;  %4657 = vrot.lane.b32.xlu0 %v4656_v3, %s6726_s21  ;;  %v596_v2 = vld [vmem:[#allocation2 + $0x109] ss:$2 sm:$0xff] }
  0x9f   : > { %v4761_v7 = vpack.i.bf16 %v596_v2, %v594_v1  ;;  %4246 = vmatprep.subr.bf16.mxu0 %v5084_v17 }
  0xa1   : > { %4247 = vmatpush3.bf16.msra.mxu0 %v5084_v17  ;;  %v663_v17 = vld [vmem:[#allocation2 + $0x180] ss:$2 sm:$0xff] }
  0xa2   : > { %4672 = vrot.lane.b32.xlu1 %v4671_v8, %s5196_s22  ;;  %4667 = vrot.lane.b32.xlu0 %v4666_v9, %s6726_s21  ;;  %v713_v8 = vld [vmem:[#allocation2 + $0x34] ss:$2 sm:$0xff]  ;;  %v4756_v9 = vpack.i.bf16 %v584_v5, %v582_v4 }
  0xa3   : > { %v4771_v22 = vpack.i.bf16 %v715_v10, %v713_v8 }
  0xa6   : > { %4682 = vrot.lane.b32.xlu1 %v4681_v14, %s5188_s26  ;;  %4677 = vrot.lane.b32.xlu0 %v4676_v15, %s5189_s27  ;;  %v701_v15 = vld [vmem:[#allocation2 + $0x93] ss:$2 sm:$0xff]  ;;  %s5202_s27 = smov 42  }
  0xaa   : > { %4692 = vrot.lane.b32.xlu1 %v4691_v20, %s5197_s23  ;;  %4687 = vrot.lane.b32.xlu0 %v4686_v21, %s5196_s22  ;;  %v747_v20 = vld [vmem:[#allocation2 + $0x79] ss:$2 sm:$0xff]  ;;  %v745_v21 = vld [vmem:[#allocation2 + $0x49] ss:$2 sm:$0xff] }
  0xae   : > { %4702 = vrot.lane.b32.xlu1 %v4701_v26, %s5190_s28  ;;  %4697 = vrot.lane.b32.xlu0 %v4696_v27, %s5188_s26  ;;  %s5200_s26 = smov 39   ;;  %v4766_v26 = vpack.i.bf16 %v703_v16, %v701_v15  ;;  %v612_v27 = vld [vmem:[#allocation2 + $0x10a] ss:$2 sm:$0xff] }
  0xaf   : > { %v4781_v40 = vpack.i.bf16 %v612_v27, %v610_v23  ;;  %v735_v27 = vld [vmem:[#allocation2 + $0xd8] ss:$2 sm:$0xff] }
  0xb2   : > { %4712 = vrot.lane.b32.xlu1 %v4711_v32, %s5198_s24  ;;  %4707 = vrot.lane.b32.xlu0 %v4706_v33, %s5197_s23  ;;  %v5587_v32 = vld [vmem:[#allocation2 + $0x78] ss:$2 sm:$0xff] }
  0xb3   : > { %v5589_v33 = vld [vmem:[#allocation2 + $0x94] ss:$2 sm:$0xff]  ;;  %v4791_v51 = vpack.i.bf16 %v5587_v32, %v5585_v31 }
  0xb4   : > { %v5548_v42 = vpop.permute.xlu1 %4437  ;;  %v5550_v45 = vpop.permute.xlu0 %4427  ;;  %v4786_v52 = vpack.i.bf16 %v5593_v35, %v5589_v33 }
  0xb5   : > { %v4430_v24 = vunpack.i.h.bf16 %v5550_v45  ;;  %v4429_v25 = vunpack.i.l.bf16 %v5550_v45 }
  0xb6   : > { %4722 = vrot.lane.b32.xlu1 %v4721_v38, %s5191_s29  ;;  %4717 = vrot.lane.b32.xlu0 %v4716_v39, %s5190_s28  ;;  %v4440_v38 = vunpack.i.h.bf16 %v5548_v42  ;;  %v4439_v39 = vunpack.i.l.bf16 %v5548_v42  ;;  %s5203_s28 = smov 45  }
  0xb7   : > { %v1759_v45 = vsel %vm395_vm0, %v747_v20, %v4430_v24 }
  0xb8   : > { %v5554_v50 = vpop.permute.xlu1 %4442  ;;  %v5556_v53 = vpop.permute.xlu0 %4432 }
  0xb9   : > { %v4435_v2 = vunpack.i.h.bf16 %v5556_v53  ;;  %v4434_v4 = vunpack.i.l.bf16 %v5556_v53  ;;  %v4444_v23 = vunpack.i.l.bf16 %v5554_v50 }
  0xba   : > { %4732 = vrot.lane.b32.xlu1 %v4731_v46, %s5199_s25  ;;  %4727 = vrot.lane.b32.xlu0 %v4726_v47, %s5198_s24  ;;  %v1758_v46 = vsel %vm395_vm0, %v745_v21, %v4429_v25  ;;  %v4776_v47 = vpack.i.bf16 %v600_v29, %v598_v28 }
  0xbb   : > { %v1761_v28 = vsel %vm395_vm0, %v751_v13, %v4435_v2 }
  0xbc   : > { %v5560_v58 = vpop.permute.xlu1 %4452  ;;  %v5562_v61 = vpop.permute.xlu0 %4447 }
  0xbd   : > { %v4450_v42 = vunpack.i.h.bf16 %v5562_v61  ;;  %v4449_v48 = vunpack.i.l.bf16 %v5562_v61  ;;  %v1766_v61 = vsel %vm1376_vm4, %v1758_v46, %v4439_v39  ;;  %v4455_v35 = vunpack.i.h.bf16 %v5560_v58 }
  0xbe   : > { %4742 = vrot.lane.b32.xlu1 %v4741_v54, %s5192_s14  ;;  %4737 = vrot.lane.b32.xlu0 %v4736_v55, %s5191_s29  ;;  %v4454_v36 = vunpack.i.l.bf16 %v5560_v58  ;;  %s6732_s29 = smov 16  }
  0xbf   : > { %v1774_v8 = vsel %vm1385_vm5, %v1766_v61, %v4449_v48 }
  0xc0   : > { %v5566_v3 = vpop.permute.xlu1 %4462  ;;  %v5568_v6 = vpop.permute.xlu0 %4457 }
  0xc1   : > { %v4460_v54 = vunpack.i.h.bf16 %v5568_v6  ;;  %v4459_v55 = vunpack.i.l.bf16 %v5568_v6  ;;  %v4465_v41 = vunpack.i.h.bf16 %v5566_v3  ;;  %v4464_v43 = vunpack.i.l.bf16 %v5566_v3 }
  0xc2   : > { %4752 = vrot.lane.b32.xlu1 %v4751_v62, %s5200_s26  ;;  %4747 = vrot.lane.b32.xlu0 %v4746_v63, %s5199_s25  ;;  %v1767_v62 = vsel %vm1376_vm4, %v1759_v45, %v4440_v38 }
  0xc3   : > { %v1782_v53 = vsel %vm1394_vm6, %v1774_v8, %v4459_v55  ;;  %v632_v55 = vld [vmem:[#allocation2 + $0x16b] ss:$2 sm:$0xff] }
  0xc4   : > { %v5575_v14 = vpop.permute.xlu1 %4472  ;;  %v5577_v18 = vpop.permute.xlu0 %4467 }
  0xc5   : > { %v4470_v63 = vunpack.i.h.bf16 %v5577_v18  ;;  %v4469_v1 = vunpack.i.l.bf16 %v5577_v18  ;;  %v4475_v58 = vunpack.i.h.bf16 %v5575_v14  ;;  %v4474_v46 = vunpack.i.l.bf16 %v5575_v14 }
  0xc6   : > { %4762 = vrot.lane.b32.xlu1 %v4761_v7, %s5193_s16  ;;  %4757 = vrot.lane.b32.xlu0 %v4756_v9, %s5192_s14  ;;  %v749_v7 = vld [vmem:[#allocation2 + $0xa9] ss:$2 sm:$0xff]  ;;  %v1775_v9 = vsel %vm1385_vm5, %v1767_v62, %v4450_v42  ;;  %s6728_s14 = smov 96  }
  0xc7   : > { %v1783_v15 = vsel %vm1394_vm6, %v1775_v9, %v4460_v54  ;;  %v1790_v18 = vsel %vm1403_vm7, %v1782_v53, %v4469_v1  ;;  %v1760_v29 = vsel %vm395_vm0, %v749_v7, %v4434_v4  ;;  %v630_v54 = vld [vmem:[#allocation2 + $0x13b] ss:$2 sm:$0xff] }
  0xc8   : > { %v5583_v30 = vpop.permute.xlu1 %4482  ;;  %v5591_v34 = vpop.permute.xlu0 %4477  ;;  %v1791_v19 = vsel %vm1403_vm7, %v1783_v15, %v4470_v63  ;;  %v1768_v45 = vsel %vm1376_vm4, %v1760_v29, %v4444_v23  ;;  %v4816_v4 = vpack.i.bf16 %v632_v55, %v630_v54  ;;  %v677_v23 = vld [vmem:[#allocation2 + $0x151] ss:$2 sm:$0xff]  ;;  %v693_v29 = vld [vmem:[#allocation2 + $0x152] ss:$2 sm:$0xff] }
  0xc9   : > { %v4480_v5 = vunpack.i.h.bf16 %v5591_v34  ;;  %v4479_v6 = vunpack.i.l.bf16 %v5591_v34  ;;  %v644_v34 = vld [vmem:[#allocation2 + $0x10c] ss:$2 sm:$0xff]  ;;  %v4485_v48 = vunpack.i.h.bf16 %v5583_v30 }
  0xca   : > { %4772 = vrot.lane.b32.xlu1 %v4771_v22, %s5202_s27  ;;  %4767 = vrot.lane.b32.xlu0 %v4766_v26, %s5200_s26  ;;  %v4445_v22 = vunpack.i.h.bf16 %v5554_v50  ;;  %v733_v26 = vld [vmem:[#allocation2 + $0xa8] ss:$2 sm:$0xff] }
  0xcb   : > { %v1798_v24 = vsel %vm1412_vm8, %v1790_v18, %v4479_v6  ;;  %v1799_v25 = vsel %vm1412_vm8, %v1791_v19, %v4480_v5  ;;  %v642_v50 = vld [vmem:[#allocation2 + $0xdc] ss:$2 sm:$0xff]  ;;  %v4806_v44 = vpack.i.bf16 %v735_v27, %v733_v26  ;;  %v673_v26 = vld [vmem:[#allocation2 + $0xf1] ss:$2 sm:$0xff]  ;;  %v675_v27 = vld [vmem:[#allocation2 + $0x121] ss:$2 sm:$0xff] }
  0xcc   : > { %v5614_v49 = vpop.permute.xlu1 %4492  ;;  %v4488_v56 = vpop.permute.xlu0 %4487  ;;  %v1769_v42 = vsel %vm1376_vm4, %v1761_v28, %v4445_v22  ;;  %v646_v5 = vld [vmem:[#allocation2 + $0x13c] ss:$2 sm:$0xff] }
  0xcd   : > { %v4490_v10 = vunpack.i.h.bf16 %v4488_v56  ;;  %v4489_v11 = vunpack.i.l.bf16 %v4488_v56  ;;  %v1776_v56 = vsel %vm1385_vm5, %v1768_v45, %v4454_v36  ;;  %v1777_v14 = vsel %vm1385_vm5, %v1769_v42, %v4455_v35  ;;  %v657_v19 = vld [vmem:[#allocation2 + $0xf0] ss:$2 sm:$0xff]  ;;  %v5713_v35 = vld [vmem:[#allocation2 + $0x153] ss:$2 sm:$0xff]  ;;  %v5715_v36 = vld [vmem:[#allocation2 + $0x183] ss:$2 sm:$0xff] }
  0xce   : > { %4782 = vrot.lane.b32.xlu1 %v4781_v40, %s5194_s17  ;;  %4777 = vrot.lane.b32.xlu0 %v4776_v47, %s5193_s16  ;;  %v5085_v40 = vld [vmem:[%s6762_s1] sm:$0xff]   ;;  %v4821_v47 = vpack.i.bf16 %v644_v34, %v642_v50  ;;  %v1784_v61 = vsel %vm1394_vm6, %v1776_v56, %v4464_v43  ;;  %v5737_v42 = vld [vmem:[#allocation2 + $0x108] ss:$2 sm:$0xff]  ;;  %v4871_v56 = vpack.i.bf16 %v5715_v36, %v5713_v35  ;;  %s6730_s16 = smov 8   ;;  %s6787_s1 = smov 72  }
  0xcf   : > { %v1806_v32 = vsel %vm6721_vm9, %v1798_v24, %v4489_v11  ;;  %v1807_v33 = vsel %vm6721_vm9, %v1799_v25, %v4490_v10  ;;  %4248 = vmatprep.subr.bf16.mxu0 %v5085_v40  ;;  %v1792_v1 = vsel %vm1403_vm7, %v1784_v61, %v4474_v46  ;;  %v679_v25 = vld [vmem:[#allocation2 + $0x181] ss:$2 sm:$0xff]  ;;  %v691_v50 = vld [vmem:[#allocation2 + $0x122] ss:$2 sm:$0xff]  ;;  %v4846_v46 = vpack.i.bf16 %v675_v27, %v673_v26 }
  0xd0   : > { %v5641_v12 = vpop.permute.xlu1 %4502  ;;  %v4498_v16 = vpop.permute.xlu0 %4497  ;;  %4249 = vmatpush3.bf16.msra.mxu0 %v5085_v40  ;;  %v5723_v40 = vld [vmem:[#allocation2 + $0x154] ss:$2 sm:$0xff]  ;;  %v4851_v43 = vpack.i.bf16 %v679_v25, %v677_v23  ;;  %v5730_v45 = vld [vmem:[#allocation2 + $0x124] ss:$2 sm:$0xff] }
  0xd1   : > { %v4500_v20 = vunpack.i.h.bf16 %v4498_v16  ;;  %v4499_v21 = vunpack.i.l.bf16 %v4498_v16  ;;  %v661_v16 = vld [vmem:[#allocation2 + $0x150] ss:$2 sm:$0xff] }
  0xd2   : > { %4792 = vrot.lane.b32.xlu1 %v4791_v51, %s5203_s28  ;;  %4787 = vrot.lane.b32.xlu0 %v4786_v52, %s5202_s27  ;;  %v4484_v51 = vunpack.i.l.bf16 %v5583_v30  ;;  %v1785_v30 = vsel %vm1394_vm6, %v1777_v14, %v4465_v41  ;;  %v4841_v24 = vpack.i.bf16 %v663_v17, %v661_v16  ;;  %v5725_v41 = vld [vmem:[#allocation2 + $0x184] ss:$2 sm:$0xff] }
  0xd3   : > { %v1814_v38 = vsel %vm1430_vm10, %v1806_v32, %v4499_v21  ;;  %v1815_v39 = vsel %vm1430_vm10, %v1807_v33, %v4500_v20  ;;  %v1793_v2 = vsel %vm1403_vm7, %v1785_v30, %v4475_v58  ;;  %v659_v20 = vld [vmem:[#allocation2 + $0x120] ss:$2 sm:$0xff] }
  0xd4   : > { %v5658_v31 = vpop.permute.xlu1 %4512  ;;  %v4508_v37 = vpop.permute.xlu0 %4507  ;;  %v4811_v52 = vpack.i.bf16 %v1815_v39, %v1814_v38  ;;  %v1800_v6 = vsel %vm1412_vm8, %v1792_v1, %v4484_v51  ;;  %v1801_v7 = vsel %vm1412_vm8, %v1793_v2, %v4485_v48  ;;  %v4836_v28 = vpack.i.bf16 %v659_v20, %v657_v19  ;;  %v695_v32 = vld [vmem:[#allocation2 + $0x182] ss:$2 sm:$0xff]  ;;  %v689_v33 = vld [vmem:[#allocation2 + $0xf2] ss:$2 sm:$0xff]  ;;  %v5721_v39 = vld [vmem:[#allocation2 + $0x123] ss:$2 sm:$0xff] }
  0xd5   : > { %v4510_v62 = vunpack.i.h.bf16 %v4508_v37  ;;  %v4509_v63 = vunpack.i.l.bf16 %v4508_v37  ;;  %v5717_v37 = vld [vmem:[#allocation2 + $0xf3] ss:$2 sm:$0xff]  ;;  %v5732_v58 = vld [vmem:[#allocation2 + $0x168] ss:$2 sm:$0xff]  ;;  %v5739_v48 = vld [vmem:[#allocation2 + $0x138] ss:$2 sm:$0xff]  ;;  %v4856_v54 = vpack.i.bf16 %v691_v50, %v689_v33  ;;  %v4515_v61 = vunpack.i.h.bf16 %v5658_v31 }
  0xd6   : > { %4802 = vrot.lane.b32.xlu1 %v4801_v57, %s6726_s21  ;;  %4797 = vrot.lane.b32.xlu0 %v4796_v59, %s5194_s17  ;;  %v4495_v57 = vunpack.i.h.bf16 %v5614_v49  ;;  %v4494_v59 = vunpack.i.l.bf16 %v5614_v49  ;;  %s6738_s17 = smov 48   ;;  %v648_v49 = vld [vmem:[#allocation2 + $0x16c] ss:$2 sm:$0xff]  ;;  %v4866_v14 = vpack.i.bf16 %v5721_v39, %v5717_v37  ;;  %v4514_v30 = vunpack.i.l.bf16 %v5658_v31  ;;  %v753_v31 = vld [vmem:[#allocation2 + $0x109] ss:$2 sm:$0xff] }
  0xd7   : > { %v4831_v13 = vpack.i.bf16 %v648_v49, %v646_v5  ;;  %v4505_v1 = vunpack.i.h.bf16 %v5641_v12  ;;  %v4504_v2 = vunpack.i.l.bf16 %v5641_v12  ;;  %v759_v5 = vld [vmem:[#allocation2 + $0x199] ss:$2 sm:$0xff] }
  0xd8   : > { %v5679_v3 = vpop.permute.xlu1 %4522  ;;  %v5685_v60 = vpop.permute.xlu0 %4517  ;;  %v1808_v10 = vsel %vm6721_vm9, %v1800_v6, %v4494_v59  ;;  %v1809_v11 = vsel %vm6721_vm9, %v1801_v7, %v4495_v57  ;;  %v4881_v57 = vpack.i.bf16 %v5725_v41, %v5723_v40  ;;  %v755_v7 = vld [vmem:[#allocation2 + $0x139] ss:$2 sm:$0xff]  ;;  %v1765_v20 = vsel %vm395_vm0, %v759_v5, %v4515_v61 }
  0xd9   : > { %v1816_v53 = vsel %vm1430_vm10, %v1808_v10, %v4509_v63  ;;  %v1817_v15 = vsel %vm1430_vm10, %v1809_v11, %v4510_v62  ;;  %v4886_v63 = vpack.i.bf16 %v5739_v48, %v5737_v42  ;;  %v4525_v49 = vunpack.i.h.bf16 %v5679_v3 }
  0xda   : > { %4812 = vrot.lane.b32.xlu1 %v4811_v52, %s6738_s17  ;;  %4807 = vrot.lane.b32.xlu0 %v4806_v44, %s5203_s28  ;;  %v4826_v22 = vpack.i.bf16 %v1817_v15, %v1816_v53  ;;  %v5728_v44 = vld [vmem:[#allocation2 + $0xf4] ss:$2 sm:$0xff]  ;;  %v4861_v52 = vpack.i.bf16 %v695_v32, %v693_v29  ;;  %v4524_v6 = vunpack.i.l.bf16 %v5679_v3  ;;  %v4520_v10 = vunpack.i.h.bf16 %v5685_v60 }
  0xdb   : > { %v4876_v59 = vpack.i.bf16 %v5730_v45, %v5728_v44  ;;  %v4519_v11 = vunpack.i.l.bf16 %v5685_v60  ;;  %v1773_v25 = vsel %vm1376_vm4, %v1765_v20, %v4525_v49 }
  0xdc   : > { %v5695_v8 = vpop.permute.xlu1 %4532  ;;  %v5697_v9 = vpop.permute.xlu0 %4527 }
  0xdd   : > { %v4534_v53 = vunpack.i.l.bf16 %v5695_v8  ;;  %v4530_v12 = vunpack.i.h.bf16 %v5697_v9  ;;  %v4529_v16 = vunpack.i.l.bf16 %v5697_v9 }
  0xde   : > { %4822 = vrot.lane.b32.xlu1 %v4821_v47, %s5196_s22  ;;  %4817 = vrot.lane.b32.xlu0 %v4816_v4, %s6726_s21  ;;  %v5735_v47 = vld [vmem:[#allocation2 + $0x198] ss:$2 sm:$0xff]  ;;  %v757_v4 = vld [vmem:[#allocation2 + $0x169] ss:$2 sm:$0xff] }
  0xdf   : > { %v4891_v62 = vpack.i.bf16 %v5735_v47, %v5732_v58 }
  0xe0   : > { %v5705_v18 = vpop.permute.xlu1 %4542  ;;  %v5707_v21 = vpop.permute.xlu0 %4537 }
  0xe1   : > { %v4545_v17 = vunpack.i.h.bf16 %v5705_v18  ;;  %v4544_v3 = vunpack.i.l.bf16 %v5705_v18  ;;  %v4540_v60 = vunpack.i.h.bf16 %v5707_v21  ;;  %v4539_v23 = vunpack.i.l.bf16 %v5707_v21 }
  0xe2   : > { %4832 = vrot.lane.b32.xlu1 %v4831_v13, %s5196_s22  ;;  %4827 = vrot.lane.b32.xlu0 %v4826_v22, %s6738_s17  ;;  %v4535_v13 = vunpack.i.h.bf16 %v5695_v8  ;;  %v1764_v22 = vsel %vm395_vm0, %v757_v4, %v4514_v30  ;;  %v1763_v8 = vsel %vm395_vm0, %v755_v7, %v4505_v1  ;;  %s6748_s22 = smov 32  }
  0xe3   : > { %v1772_v9 = vsel %vm1376_vm4, %v1764_v22, %v4524_v6  ;;  %v1771_v18 = vsel %vm1376_vm4, %v1763_v8, %v4520_v10 }
  0xe4   : > { %v5711_v34 = vpop.permute.xlu1 %4552  ;;  %v5719_v38 = vpop.permute.xlu0 %4547  ;;  %v1780_v27 = vsel %vm1385_vm5, %v1772_v9, %v4534_v53  ;;  %v1781_v21 = vsel %vm1385_vm5, %v1773_v25, %v4535_v13  ;;  %v1779_v32 = vsel %vm1385_vm5, %v1771_v18, %v4530_v12 }
  0xe5   : > { %v1788_v33 = vsel %vm1394_vm6, %v1780_v27, %v4544_v3  ;;  %v1789_v50 = vsel %vm1394_vm6, %v1781_v21, %v4545_v17  ;;  %v1787_v37 = vsel %vm1394_vm6, %v1779_v32, %v4540_v60  ;;  %v4555_v39 = vunpack.i.h.bf16 %v5711_v34 }
  0xe6   : > { %4842 = vrot.lane.b32.xlu1 %v4841_v24, %s5197_s23  ;;  %4837 = vrot.lane.b32.xlu0 %v4836_v28, %s5197_s23  ;;  %v1762_v24 = vsel %vm395_vm0, %v753_v31, %v4504_v2  ;;  %s6722_s23 = smov 80  }
  0xe7   : > { %v1770_v26 = vsel %vm1376_vm4, %v1762_v24, %v4519_v11 }
  0xe8   : > { %v5741_v51 = vpop.permute.xlu1 %4562  ;;  %v5743_v55 = vpop.permute.xlu0 %4557  ;;  %v1778_v29 = vsel %vm1385_vm5, %v1770_v26, %v4529_v16 }
  0xe9   : > { %v1786_v36 = vsel %vm1394_vm6, %v1778_v29, %v4539_v23  ;;  %v4564_v61 = vunpack.i.l.bf16 %v5741_v51  ;;  %v4560_v30 = vunpack.i.h.bf16 %v5743_v55  ;;  %v4559_v1 = vunpack.i.l.bf16 %v5743_v55 }
  0xea   : > { %4852 = vrot.lane.b32.xlu1 %v4851_v43, %s5198_s24  ;;  %4847 = vrot.lane.b32.xlu0 %v4846_v46, %s5198_s24  ;;  %v4554_v43 = vunpack.i.l.bf16 %v5711_v34  ;;  %v4550_v46 = vunpack.i.h.bf16 %v5719_v38  ;;  %s6743_s24 = smov 40  }
  0xec   : > { %v4573_v15 = vpop.permute.xlu1 %4572  ;;  %v4568_v19 = vpop.permute.xlu0 %4567  ;;  %v1795_v10 = vsel %vm1403_vm7, %v1787_v37, %v4550_v46 }
  0xed   : > { %v4575_v2 = vunpack.i.h.bf16 %v4573_v15  ;;  %v4574_v4 = vunpack.i.l.bf16 %v4573_v15  ;;  %v4570_v34 = vunpack.i.h.bf16 %v4568_v19  ;;  %v1803_v15 = vsel %vm1412_vm8, %v1795_v10, %v4560_v30  ;;  %v496_v30 = vld [vmem:[#allocation2 + $0x90] ss:$2 sm:$0xff] }
  0xee   : > { %4862 = vrot.lane.b32.xlu1 %v4861_v52, %s5199_s25  ;;  %4857 = vrot.lane.b32.xlu0 %v4856_v54, %s5199_s25  ;;  %v4549_v52 = vunpack.i.l.bf16 %v5719_v38  ;;  %v4565_v54 = vunpack.i.h.bf16 %v5741_v51  ;;  %v1796_v38 = vsel %vm1403_vm7, %v1788_v33, %v4554_v43  ;;  %v1797_v51 = vsel %vm1403_vm7, %v1789_v50, %v4555_v39  ;;  %s6734_s25 = smov 88  }
  0xef   : > { %v1804_v11 = vsel %vm1412_vm8, %v1796_v38, %v4564_v61  ;;  %v1811_v44 = vsel %vm6721_vm9, %v1803_v15, %v4570_v34  ;;  %v494_v61 = vld [vmem:[#allocation2 + $0x60] ss:$2 sm:$0xff]  ;;  %v492_v34 = vld [vmem:[#allocation2 + $0x30] ss:$2 sm:$0xff] }
  0xf0   : > { %v4583_v28 = vpop.permute.xlu1 %4582  ;;  %v4578_v35 = vpop.permute.xlu0 %4577  ;;  %v1794_v55 = vsel %vm1403_vm7, %v1786_v36, %v4549_v52  ;;  %v1805_v13 = vsel %vm1412_vm8, %v1797_v51, %v4565_v54  ;;  %v1812_v40 = vsel %vm6721_vm9, %v1804_v11, %v4574_v4  ;;  %v490_v4 = vld [vmem:[#allocation2] ss:$2 sm:$0xff] }
  0xf1   : > { %v4585_v49 = vunpack.i.h.bf16 %v4583_v28  ;;  %v4584_v6 = vunpack.i.l.bf16 %v4583_v28  ;;  %v4580_v7 = vunpack.i.h.bf16 %v4578_v35  ;;  %v1802_v53 = vsel %vm1412_vm8, %v1794_v55, %v4559_v1 }
  0xf2   : > { %4872 = vrot.lane.b32.xlu1 %v4871_v56, %s5200_s26  ;;  %4867 = vrot.lane.b32.xlu0 %v4866_v14, %s5200_s26  ;;  %v4569_v56 = vunpack.i.l.bf16 %v4568_v19  ;;  %v4579_v14 = vunpack.i.l.bf16 %v4578_v35  ;;  %v1813_v41 = vsel %vm6721_vm9, %v1805_v13, %v4575_v2  ;;  %s6724_s26 = smov 104  }
  0xf3   : > { %v1820_v16 = vsel %vm1430_vm10, %v1812_v40, %v4584_v6  ;;  %v1821_v17 = vsel %vm1430_vm10, %v1813_v41, %v4585_v49 }
  0xf4   : > { %v5803_v5 = vpop.permute.xlu1 %4592  ;;  %v5805_v31 = vpop.permute.xlu0 %4587  ;;  %v1810_v3 = vsel %vm6721_vm9, %v1802_v53, %v4569_v56  ;;  %v4901_v20 = vpack.i.bf16 %v1821_v17, %v1820_v16 }
  0xf5   : > { %v1818_v45 = vsel %vm1430_vm10, %v1810_v3, %v4579_v14  ;;  %v4595_v46 = vunpack.i.h.bf16 %v5803_v5  ;;  %v4594_v52 = vunpack.i.l.bf16 %v5803_v5  ;;  %v4590_v1 = vunpack.i.h.bf16 %v5805_v31 }
  0xf6   : > { %4882 = vrot.lane.b32.xlu1 %v4881_v57, %s5202_s27  ;;  %4877 = vrot.lane.b32.xlu0 %v4876_v59, %s5202_s27  ;;  %v1819_v59 = vsel %vm1430_vm10, %v1811_v44, %v4580_v7  ;;  %v4589_v2 = vunpack.i.l.bf16 %v5805_v31  ;;  %s6751_s27 = smov 56  }
  0xf7   : > { %v4896_v60 = vpack.i.bf16 %v1819_v59, %v1818_v45  ;;  %v1371_v49 = vsel %vm395_vm0, %v496_v30, %v4595_v46  ;;  %v1370_v6 = vsel %vm395_vm0, %v494_v61, %v4594_v52  ;;  %v1369_v14 = vsel %vm395_vm0, %v492_v34, %v4590_v1 }
  0xf8   : > { %v5823_v12 = vpop.permute.xlu1 %4602  ;;  %v5827_v57 = vpop.permute.xlu0 %4597  ;;  %v1368_v7 = vsel %vm395_vm0, %v490_v4, %v4589_v2 }
  0xf9   : > { %v4605_v38 = vunpack.i.h.bf16 %v5823_v12  ;;  %v4604_v5 = vunpack.i.l.bf16 %v5823_v12  ;;  %v4600_v31 = vunpack.i.h.bf16 %v5827_v57  ;;  %v4599_v55 = vunpack.i.l.bf16 %v5827_v57 }
  0xfa   : > { %4892 = vrot.lane.b32.xlu1 %v4891_v62, %s5203_s28  ;;  %4887 = vrot.lane.b32.xlu0 %v4886_v63, %s5203_s28  ;;  %s6773_s28 = smov 80  }
  0xfb   : > { %v1379_v57 = vsel %vm1376_vm4, %v1370_v6, %v4604_v5  ;;  %v1380_v17 = vsel %vm1376_vm4, %v1371_v49, %v4605_v38  ;;  %v1377_v59 = vsel %vm1376_vm4, %v1368_v7, %v4599_v55 }
  0xfc   : > { %v5843_v19 = vpop.permute.xlu1 %4612  ;;  %v5845_v22 = vpop.permute.xlu0 %4607 }
  0xfd   : > { %v4615_v10 = vunpack.i.h.bf16 %v5843_v19  ;;  %v4614_v11 = vunpack.i.l.bf16 %v5843_v19  ;;  %v4610_v13 = vunpack.i.h.bf16 %v5845_v22  ;;  %v4609_v53 = vunpack.i.l.bf16 %v5845_v22 }
  0xfe   : > { %4902 = vrot.lane.b32.xlu1 %v4901_v20, %s6738_s17  ;;  %4897 = vrot.lane.b32.xlu0 %v4896_v60, %s6738_s17  ;;  %v1378_v19 = vsel %vm1376_vm4, %v1369_v14, %v4600_v31 }
  0xff   : > { %v1388_v60 = vsel %vm1385_vm5, %v1379_v57, %v4614_v11  ;;  %v1387_v46 = vsel %vm1385_vm5, %v1378_v19, %v4610_v13 }
 0x100   : > { %v5849_v58 = vpop.permute.xlu1 %4622  ;;  %v5851_v47 = vpop.permute.xlu0 %4617 }
 0x101   : > { %v4625_v15 = vunpack.i.h.bf16 %v5849_v58  ;;  %v4624_v12 = vunpack.i.l.bf16 %v5849_v58  ;;  %v4620_v40 = vunpack.i.h.bf16 %v5851_v47  ;;  %v4619_v41 = vunpack.i.l.bf16 %v5851_v47 }
 0x102   : > { %v1389_v58 = vsel %vm1385_vm5, %v1380_v17, %v4615_v10  ;;  %v1386_v47 = vsel %vm1385_vm5, %v1377_v59, %v4609_v53 }
 0x103   : > { %v1398_v52 = vsel %vm1394_vm6, %v1389_v58, %v4625_v15  ;;  %v1395_v61 = vsel %vm1394_vm6, %v1386_v47, %v4619_v41  ;;  %v1396_v30 = vsel %vm1394_vm6, %v1387_v46, %v4620_v40  ;;  %v500_v40 = vld [vmem:[#allocation2 + $0xf0] ss:$2 sm:$0xff] }
 0x104   : > { %v5853_v62 = vpop.permute.xlu1 %4632  ;;  %v5855_v23 = vpop.permute.xlu0 %4627 }
 0x105   : > { %v4635_v3 = vunpack.i.h.bf16 %v5853_v62  ;;  %v4634_v44 = vunpack.i.l.bf16 %v5853_v62  ;;  %v4630_v20 = vunpack.i.h.bf16 %v5855_v23  ;;  %v4629_v22 = vunpack.i.l.bf16 %v5855_v23 }
 0x106   : > { %v1397_v62 = vsel %vm1394_vm6, %v1388_v60, %v4624_v12  ;;  %v498_v12 = vld [vmem:[#allocation2 + $0xc0] ss:$2 sm:$0xff] }
 0x107   : > { %v1406_v23 = vsel %vm1403_vm7, %v1397_v62, %v4634_v44  ;;  %v1407_v2 = vsel %vm1403_vm7, %v1398_v52, %v4635_v3  ;;  %v1404_v6 = vsel %vm1403_vm7, %v1395_v61, %v4629_v22  ;;  %v1405_v38 = vsel %vm1403_vm7, %v1396_v30, %v4630_v20 }
 0x108   : > { %v5857_v42 = vpop.permute.xlu1 %4642  ;;  %v5859_v48 = vpop.permute.xlu0 %4637 }
 0x109   : > { %v4645_v4 = vunpack.i.h.bf16 %v5857_v42  ;;  %v4644_v34 = vunpack.i.l.bf16 %v5857_v42  ;;  %v4640_v5 = vunpack.i.h.bf16 %v5859_v48  ;;  %v4639_v7 = vunpack.i.l.bf16 %v5859_v48 }
 0x10b   : > { %v1415_v15 = vsel %vm1412_vm8, %v1406_v23, %v4644_v34 }
 0x10c   : > { %v5861_v63 = vpop.permute.xlu1 %4652  ;;  %v5863_v8 = vpop.permute.xlu0 %4647 }
 0x10d   : > { %v4655_v14 = vunpack.i.h.bf16 %v5861_v63  ;;  %v4654_v31 = vunpack.i.l.bf16 %v5861_v63  ;;  %v4650_v55 = vunpack.i.h.bf16 %v5863_v8  ;;  %v4649_v10 = vunpack.i.l.bf16 %v5863_v8 }
 0x10e   : > { %v1416_v63 = vsel %vm1412_vm8, %v1407_v2, %v4645_v4 }
 0x10f   : > { %v1424_v44 = vsel %vm6721_vm9, %v1415_v15, %v4654_v31  ;;  %v1425_v59 = vsel %vm6721_vm9, %v1416_v63, %v4655_v14 }
 0x110   : > { %v5865_v24 = vpop.permute.xlu1 %4662  ;;  %v5867_v9 = vpop.permute.xlu0 %4657 }
 0x111   : > { %v4665_v42 = vunpack.i.h.bf16 %v5865_v24  ;;  %v4664_v11 = vunpack.i.l.bf16 %v5865_v24  ;;  %v4660_v13 = vunpack.i.h.bf16 %v5867_v9  ;;  %v4659_v53 = vunpack.i.l.bf16 %v5867_v9 }
 0x112   : > { %v1413_v24 = vsel %vm1412_vm8, %v1404_v6, %v4639_v7  ;;  %v1414_v9 = vsel %vm1412_vm8, %v1405_v38, %v4640_v5 }
 0x113   : > { %v1422_v19 = vsel %vm6721_vm9, %v1413_v24, %v4649_v10  ;;  %v1373_v20 = vsel %vm395_vm0, %v500_v40, %v4665_v42  ;;  %v1372_v22 = vsel %vm395_vm0, %v498_v12, %v4664_v11 }
 0x114   : > { %v5869_v25 = vpop.permute.xlu1 %4672  ;;  %v5871_v18 = vpop.permute.xlu0 %4667  ;;  %v1431_v60 = vsel %vm1430_vm10, %v1422_v19, %v4659_v53 }
 0x115   : > { %v4675_v8 = vunpack.i.h.bf16 %v5869_v25  ;;  %v4674_v41 = vunpack.i.l.bf16 %v5869_v25  ;;  %v4670_v17 = vunpack.i.h.bf16 %v5871_v18  ;;  %v4669_v3 = vunpack.i.l.bf16 %v5871_v18 }
 0x116   : > { %v1423_v25 = vsel %vm6721_vm9, %v1414_v9, %v4650_v55  ;;  %vm1906_vm9 = vcmask 613376  }
 0x117   : > { %v1432_v58 = vsel %vm1430_vm10, %v1423_v25, %v4660_v13  ;;  %v1440_v18 = vsel %vm1439_vm11, %v1431_v60, %v4674_v41  ;;  %v1434_v30 = vsel %vm1430_vm10, %v1425_v59, %v4670_v17  ;;  %v1433_v23 = vsel %vm1430_vm10, %v1424_v44, %v4669_v3  ;;  %v504_v17 = vld [vmem:[#allocation2 + $0x150] ss:$2 sm:$0xff] }
 0x118   : > { %v5873_v26 = vpop.permute.xlu1 %4682  ;;  %v5875_v27 = vpop.permute.xlu0 %4677  ;;  %v1441_v46 = vsel %vm1439_vm11, %v1432_v58, %v4675_v8 }
 0x119   : > { %v4685_v34 = vunpack.i.h.bf16 %v5873_v26  ;;  %v4684_v6 = vunpack.i.l.bf16 %v5873_v26  ;;  %v4679_v7 = vunpack.i.l.bf16 %v5875_v27 }
 0x11b   : > { %v6017_v63 = vsel %vm1376_vm4, %v1372_v22, %v4684_v6 }
 0x11c   : > { %v5877_v21 = vpop.permute.xlu1 %4692  ;;  %v5879_v28 = vpop.permute.xlu0 %4687 }
 0x11d   : > { %v4695_v62 = vunpack.i.h.bf16 %v5877_v21  ;;  %v4694_v52 = vunpack.i.l.bf16 %v5877_v21  ;;  %v4680_v21 = vunpack.i.h.bf16 %v5875_v27  ;;  %v4689_v8 = vunpack.i.l.bf16 %v5879_v28 }
 0x11f   : > { %v1450_v10 = vsel %vm1448_vm12, %v1441_v46, %v4695_v62  ;;  %v1375_v62 = vsel %vm395_vm0, %v504_v17, %v4680_v21 }
 0x120   : > { %v5881_v29 = vpop.permute.xlu1 %4702  ;;  %v5883_v32 = vpop.permute.xlu0 %4697 }
 0x124   : > { %v5885_v33 = vpop.permute.xlu1 %4712  ;;  %v5887_v50 = vpop.permute.xlu0 %4707 }
 0x125   : > { %v4715_v2 = vunpack.i.h.bf16 %v5885_v33  ;;  %v4714_v4 = vunpack.i.l.bf16 %v5885_v33  ;;  %v1449_v33 = vsel %vm1448_vm12, %v1440_v18, %v4694_v52  ;;  %v4709_v22 = vunpack.i.l.bf16 %v5887_v50 }
 0x127   : > { %v1458_v11 = vsel %vm1457_vm13, %v1449_v33, %v4714_v4  ;;  %v1459_v13 = vsel %vm1457_vm13, %v1450_v10, %v4715_v2 }
 0x128   : > { %v5889_v35 = vpop.permute.xlu1 %4722  ;;  %v5891_v36 = vpop.permute.xlu0 %4717 }
 0x129   : > { %v4724_v17 = vunpack.i.l.bf16 %v5889_v35 }
 0x12c   : > { %v5893_v37 = vpop.permute.xlu1 %4732  ;;  %v5895_v39 = vpop.permute.xlu0 %4727 }
 0x12d   : > { %v4735_v38 = vunpack.i.h.bf16 %v5893_v37  ;;  %v4734_v5 = vunpack.i.l.bf16 %v5893_v37  ;;  %v4730_v58 = vunpack.i.h.bf16 %v5895_v39 }
 0x12f   : > { %v1467_v12 = vsel %vm1466_vm14, %v1458_v11, %v4734_v5  ;;  %v1468_v40 = vsel %vm1466_vm14, %v1459_v13, %v4735_v38 }
 0x130   : > { %v5897_v43 = vpop.permute.xlu1 %4742  ;;  %v5901_v54 = vpop.permute.xlu0 %4737 }
 0x134   : > { %v5905_v56 = vpop.permute.xlu1 %4752  ;;  %v5911_v51 = vpop.permute.xlu0 %4747 }
 0x135   : > { %v4755_v14 = vunpack.i.h.bf16 %v5905_v56  ;;  %v4754_v31 = vunpack.i.l.bf16 %v5905_v56  ;;  %v6014_v56 = vsel %vm1376_vm4, %v1373_v20, %v4685_v34  ;;  %v4710_v20 = vunpack.i.h.bf16 %v5887_v50 }
 0x136   : > { %v4750_v52 = vunpack.i.h.bf16 %v5911_v51  ;;  %v4749_v2 = vunpack.i.l.bf16 %v5911_v51  ;;  %v1442_v34 = vsel %vm1439_vm11, %v1433_v23, %v4689_v8 }
 0x137   : > { %v1476_v41 = vsel %vm1475_vm15, %v1467_v12, %v4754_v31  ;;  %v1477_v24 = vsel %vm1475_vm15, %v1468_v40, %v4755_v14  ;;  %v1451_v14 = vsel %vm1448_vm12, %v1442_v34, %v4709_v22  ;;  %v4720_v22 = vunpack.i.h.bf16 %v5891_v36 }
 0x138   : > { %v5925_v16 = vpop.permute.xlu1 %4762  ;;  %v5931_v45 = vpop.permute.xlu0 %4757 }
 0x13c   : > { %v5945_v1 = vpop.permute.xlu1 %4772  ;;  %v5951_v49 = vpop.permute.xlu0 %4767 }
 0x13d   : > { %v4775_v26 = vunpack.i.h.bf16 %v5945_v1  ;;  %v4774_v42 = vunpack.i.l.bf16 %v5945_v1  ;;  %v4690_v1 = vunpack.i.h.bf16 %v5879_v28  ;;  %v4770_v38 = vunpack.i.h.bf16 %v5951_v49 }
 0x13f   : > { %v1485_v3 = vsel %vm1484_vm1, %v1476_v41, %v4774_v42  ;;  %v1486_v44 = vsel %vm1484_vm1, %v1477_v24, %v4775_v26  ;;  %v1443_v6 = vsel %vm1439_vm11, %v1434_v30, %v4690_v1  ;;  %v4704_v26 = vunpack.i.l.bf16 %v5881_v29 }
 0x140   : > { %v5965_v48 = vpop.permute.xlu1 %4782  ;;  %v5971_v57 = vpop.permute.xlu0 %4777  ;;  %v1452_v21 = vsel %vm1448_vm12, %v1443_v6, %v4710_v20 }
 0x141   : > { %v1461_v30 = vsel %vm1457_vm13, %v1452_v21, %v4730_v58  ;;  %v4745_v58 = vunpack.i.h.bf16 %v5897_v43 }
 0x142   : > { %v1470_v11 = vsel %vm1466_vm14, %v1461_v30, %v4750_v52  ;;  %v4739_v52 = vunpack.i.l.bf16 %v5901_v54 }
 0x143   : > { %v1479_v40 = vsel %vm1475_vm15, %v1470_v11, %v4770_v38  ;;  %v4785_v38 = vunpack.i.h.bf16 %v5965_v48 }
 0x144   : > { %v4793_v47 = vpop.permute.xlu1 %4792  ;;  %v5989_v61 = vpop.permute.xlu0 %4787 }
 0x145   : > { %v4795_v53 = vunpack.i.h.bf16 %v4793_v47  ;;  %v4794_v15 = vunpack.i.l.bf16 %v4793_v47  ;;  %v4729_v47 = vunpack.i.l.bf16 %v5895_v39  ;;  %v4769_v39 = vunpack.i.l.bf16 %v5951_v49 }
 0x146   : > { %v4790_v31 = vunpack.i.h.bf16 %v5989_v61  ;;  %v4789_v51 = vunpack.i.l.bf16 %v5989_v61  ;;  %v4705_v49 = vunpack.i.h.bf16 %v5881_v29  ;;  %v4700_v61 = vunpack.i.h.bf16 %v5883_v32 }
 0x147   : > { %v1494_v60 = vsel %vm1493_vm2, %v1485_v3, %v4794_v15  ;;  %v1495_v28 = vsel %vm1493_vm2, %v1486_v44, %v4795_v53  ;;  %v1460_v23 = vsel %vm1457_vm13, %v1451_v14, %v4729_v47  ;;  %v502_v53 = vld [vmem:[#allocation2 + $0x120] ss:$2 sm:$0xff]  ;;  %v4699_v15 = vunpack.i.l.bf16 %v5883_v32 }
 0x148   : > { %v6003_v55 = vpop.permute.xlu1 %4802  ;;  %v6009_v37 = vpop.permute.xlu0 %4797  ;;  %v1469_v42 = vsel %vm1466_vm14, %v1460_v23, %v4749_v2  ;;  %v1488_v29 = vsel %vm1484_vm1, %v1479_v40, %v4790_v31  ;;  %v1374_v32 = vsel %vm395_vm0, %v502_v53, %v4679_v7  ;;  %v4744_v47 = vunpack.i.l.bf16 %v5897_v43 }
 0x149   : > { %v1478_v12 = vsel %vm1475_vm15, %v1469_v42, %v4769_v39  ;;  %v1383_v7 = vsel %vm1376_vm4, %v1374_v32, %v4699_v15  ;;  %v4764_v2 = vunpack.i.l.bf16 %v5925_v16  ;;  %v4779_v31 = vunpack.i.l.bf16 %v5971_v57 }
 0x14a   : > { %v1487_v8 = vsel %vm1484_vm1, %v1478_v12, %v4789_v51  ;;  %v4805_v23 = vunpack.i.h.bf16 %v6003_v55  ;;  %v4804_v30 = vunpack.i.l.bf16 %v6003_v55  ;;  %vm6763_vm0 = vcmask 171008  }
 0x14b   : > { %v4800_v11 = vunpack.i.h.bf16 %v6009_v37  ;;  %v4799_v53 = vunpack.i.l.bf16 %v6009_v37 }
 0x14c   : > { %v4813_v9 = vpop.permute.xlu1 %4812  ;;  %v4808_v25 = vpop.permute.xlu0 %4807 }
 0x14d   : > { %v4815_v59 = vunpack.i.h.bf16 %v4813_v9  ;;  %v4814_v19 = vunpack.i.l.bf16 %v4813_v9  ;;  %v4810_v33 = vunpack.i.h.bf16 %v4808_v25  ;;  %v4809_v10 = vunpack.i.l.bf16 %v4808_v25 }
 0x14e   : > { %v4725_v9 = vunpack.i.h.bf16 %v5889_v35  ;;  %v1390_v35 = vsel %vm1385_vm5, %v6017_v63, %v4704_v26  ;;  %v4740_v63 = vunpack.i.h.bf16 %v5901_v54  ;;  %v4784_v54 = vunpack.i.l.bf16 %v5965_v48 }
 0x14f   : > { %v1855_v18 = vsel %vm1854_vm3, %v1494_v60, %v4814_v19  ;;  %v1856_v46 = vsel %vm1854_vm3, %v1495_v28, %v4815_v59  ;;  %v1496_v3 = vsel %vm1493_vm2, %v1487_v8, %v4809_v10  ;;  %v1497_v44 = vsel %vm1493_vm2, %v1488_v29, %v4810_v33 }
 0x150   : > { %v6038_v4 = vpop.permute.xlu1 %4822  ;;  %v1863_v50 = vpack.c.bf16 %v1856_v46, %v1855_v18  ;;  %v6044_v5 = vpop.permute.xlu0 %4817  ;;  %v1391_v59 = vsel %vm1385_vm5, %v6014_v56, %v4705_v49  ;;  %v4719_v60 = vunpack.i.l.bf16 %v5891_v36  ;;  %v1384_v56 = vsel %vm1376_vm4, %v1375_v62, %v4700_v61  ;;  %vm6764_vm4 = vmmov %vm6763_vm0 }
 0x151   : > { %v1399_v18 = vsel %vm1394_vm6, %v1390_v35, %v4724_v17  ;;  %v1400_v46 = vsel %vm1394_vm6, %v1391_v59, %v4725_v9  ;;  %v4765_v36 = vunpack.i.h.bf16 %v5925_v16  ;;  %v4760_v62 = vunpack.i.h.bf16 %v5931_v45 }
 0x152   : > { %4250 = vmatprep.mubr.msk.bf16.mxu0 %vm1906_vm9, %v1863_v50  ;;  %v4759_v50 = vunpack.i.l.bf16 %v5931_v45  ;;  %v1392_v43 = vsel %vm1385_vm5, %v1383_v7, %v4719_v60  ;;  %v1393_v6 = vsel %vm1385_vm5, %v1384_v56, %v4720_v22  ;;  %v1408_v14 = vsel %vm1403_vm7, %v1399_v18, %v4744_v47  ;;  %vm6765_vm5 = vmmov %vm6763_vm0 }
 0x153   : > { %v1409_v21 = vsel %vm1403_vm7, %v1400_v46, %v4745_v58  ;;  %v4780_v16 = vunpack.i.h.bf16 %v5971_v57  ;;  %v1401_v45 = vsel %vm1394_vm6, %v1392_v43, %v4739_v52  ;;  %v1402_v51 = vsel %vm1394_vm6, %v1393_v6, %v4740_v63  ;;  %vm6766_vm6 = vmmov %vm6763_vm0 }
 0x154   : > { %v6057_v13 = vpop.permute.xlu1 %4832  ;;  %v4828_v1 = vpop.permute.xlu0 %4827  ;;  %v1417_v33 = vsel %vm1412_vm8, %v1408_v14, %v4764_v2  ;;  %v1418_v48 = vsel %vm1412_vm8, %v1409_v21, %v4765_v36  ;;  %v1410_v10 = vsel %vm1403_vm7, %v1401_v45, %v4759_v50  ;;  %v1411_v49 = vsel %vm1403_vm7, %v1402_v51, %v4760_v62 }
 0x155   : > { %v4830_v41 = vunpack.i.h.bf16 %v4828_v1  ;;  %v4829_v24 = vunpack.i.l.bf16 %v4828_v1  ;;  %v1426_v42 = vsel %vm6763_vm0, %v1417_v33, %v4784_v54  ;;  %v1427_v57 = vsel %vm6764_vm4, %v1418_v48, %v4785_v38 }
 0x156   : > { %v1419_v55 = vsel %vm1412_vm8, %v1410_v10, %v4779_v31  ;;  %v1420_v15 = vsel %vm1412_vm8, %v1411_v49, %v4780_v16  ;;  %v4820_v12 = vunpack.i.h.bf16 %v6044_v5  ;;  %v4819_v40 = vunpack.i.l.bf16 %v6044_v5 }
 0x157   : > { %v1857_v19 = vsel %vm1854_vm3, %v1496_v3, %v4829_v24  ;;  %v1858_v25 = vsel %vm1854_vm3, %v1497_v44, %v4830_v41  ;;  %v1435_v1 = vsel %vm1430_vm10, %v1426_v42, %v4804_v30  ;;  %v1436_v8 = vsel %vm1430_vm10, %v1427_v57, %v4805_v23 }
 0x158   : > { %v6076_v20 = vpop.permute.xlu1 %4842  ;;  %v1864_v28 = vpack.c.bf16 %v1858_v25, %v1857_v19  ;;  %v6082_v27 = vpop.permute.xlu0 %4837  ;;  %v4835_v29 = vunpack.i.h.bf16 %v6057_v13  ;;  %v4834_v41 = vunpack.i.l.bf16 %v6057_v13  ;;  %v4825_v24 = vunpack.i.h.bf16 %v6038_v4 }
 0x159   : > { %v4824_v37 = vunpack.i.l.bf16 %v6038_v4  ;;  %v4845_v9 = vunpack.i.h.bf16 %v6076_v20  ;;  %v4844_v17 = vunpack.i.l.bf16 %v6076_v20  ;;  %v1428_v44 = vsel %vm6765_vm5, %v1419_v55, %v4799_v53 }
 0x15a   : > { %4251 = vmatmul.mubr.msk.bf16.vlgmr.msra.gmra.mxu0 %vm1906_vm9, %v1864_v28  ;;  %v1429_v5 = vsel %vm6766_vm6, %v1420_v15, %v4800_v11  ;;  %v4840_v32 = vunpack.i.h.bf16 %v6082_v27  ;;  %v4839_v59 = vunpack.i.l.bf16 %v6082_v27  ;;  %v1437_v13 = vsel %vm1430_vm10, %v1428_v44, %v4819_v40 }
 0x15b   : > { %v1438_v25 = vsel %vm1430_vm10, %v1429_v5, %v4820_v12  ;;  %v1446_v20 = vsel %vm1439_vm11, %v1437_v13, %v4834_v41  ;;  %v1444_v7 = vsel %vm1439_vm11, %v1435_v1, %v4824_v37  ;;  %v1445_v56 = vsel %vm1439_vm11, %v1436_v8, %v4825_v24 }
 0x15c   : > { %v6097_v34 = vpop.permute.xlu1 %4852  ;;  %v4848_v39 = vpop.permute.xlu0 %4847  ;;  %v1447_v22 = vsel %vm1439_vm11, %v1438_v25, %v4835_v29  ;;  %v1455_v27 = vsel %vm1448_vm12, %v1446_v20, %v4844_v17  ;;  %v1454_v18 = vsel %vm1448_vm12, %v1445_v56, %v4840_v32  ;;  %v1453_v46 = vsel %vm1448_vm12, %v1444_v7, %v4839_v59 }
 0x15d   : > { %v4855_v4 = vunpack.i.h.bf16 %v6097_v34  ;;  %v4854_v35 = vunpack.i.l.bf16 %v6097_v34  ;;  %v4850_v60 = vunpack.i.h.bf16 %v4848_v39  ;;  %v4849_v28 = vunpack.i.l.bf16 %v4848_v39 }
 0x15e   : > { %v1456_v58 = vsel %vm1448_vm12, %v1447_v22, %v4845_v9  ;;  %vm2049_vm7 = vcmask 64512   ;;  %vm2051_vm8 = vcmask 60416   ;;  %v5205_v20 = vmov 0   ;;  %v6240_v22 = vld [vmem:[%s6768_s2] ss:$0 sm:$0xff] }
 0x15f   : > { %v1464_v2 = vsel %vm1457_vm13, %v1455_v27, %v4854_v35  ;;  %v1465_v62 = vsel %vm1457_vm13, %v1456_v58, %v4855_v4  ;;  %v1462_v43 = vsel %vm1457_vm13, %v1453_v46, %v4849_v28  ;;  %v1463_v6 = vsel %vm1457_vm13, %v1454_v18, %v4850_v60  ;;  %2059 = vst.msk [vmem:[#allocation3 + $0x40] sm:$0xff] %vm2049_vm7, %v5187_v0  ;;  %v5086_v35 = vld [vmem:[%s6767_s3 + $0x38] sm:$0xff]   ;;  %v6245_v28 = vld [vmem:[%s6768_s2 + $0x1] ss:$0 sm:$0xff]  ;;  %s6780_s2 = smov 64  }
 0x160   : > { %v4863_v26 = vpop.permute.xlu1 %4862  ;;  %v4858_v61 = vpop.permute.xlu0 %4857  ;;  %2060 = vst.msk [vmem:[#allocation3 + $0x48] sm:$0xf] %vm2051_vm8, %v5187_v0  ;;  %2052 = vst.msk [vmem:[#allocation3 + $0x8] sm:$0xf] %vm2051_vm8, %v5187_v0  ;;  %2741 = vmatprep.subr.bf16.mxu1 %v5205_v20  ;;  %3373 = vmatprep.subr.bf16.mxu0 %v5205_v20  ;;  %vm2737_vm0 = vcmask 1043456   ;;  %vm2472_vm4 = vcmask 130048  }
 0x161   : > { %v4865_v63 = vunpack.i.h.bf16 %v4863_v26  ;;  %v4864_v52 = vunpack.i.l.bf16 %v4863_v26  ;;  %v4860_v50 = vunpack.i.h.bf16 %v4858_v61  ;;  %v4859_v34 = vunpack.i.l.bf16 %v4858_v61  ;;  %2050 = vst.msk [vmem:[#allocation3] sm:$0xff] %vm2049_vm7, %v5187_v0  ;;  %2053 = vst.msk [vmem:[#allocation3 + $0x10] sm:$0xff] %vm2049_vm7, %v5187_v0  ;;  %2742 = vmatpush1.bf16.msra.mxu1 %v5086_v35 }
 0x162   : > { %2054 = vst.msk [vmem:[#allocation3 + $0x18] sm:$0xf] %vm2051_vm8, %v5187_v0  ;;  %2056 = vst.msk [vmem:[#allocation3 + $0x28] sm:$0xf] %vm2051_vm8, %v5187_v0  ;;  %2743 = vmatprep.subr.bf16.mxu1 %v5205_v20  ;;  %vm2477_vm5 = vcmask 261120   ;;  %vm2480_vm6 = vcmask 326656  }
 0x163   : > { %v1473_v45 = vsel %vm1466_vm14, %v1464_v2, %v4864_v52  ;;  %v1474_v51 = vsel %vm1466_vm14, %v1465_v62, %v4865_v63  ;;  %v1471_v48 = vsel %vm1466_vm14, %v1462_v43, %v4859_v34  ;;  %v1472_v10 = vsel %vm1466_vm14, %v1463_v6, %v4860_v50  ;;  %2055 = vst.msk [vmem:[#allocation3 + $0x20] sm:$0xff] %vm2049_vm7, %v5187_v0 }
 0x164   : > { %v4873_v3 = vpop.permute.xlu1 %4872  ;;  %v4868_v19 = vpop.permute.xlu0 %4867  ;;  %2057 = vst.msk [vmem:[#allocation3 + $0x30] sm:$0xff] %vm2049_vm7, %v5187_v0  ;;  %2061 = vst.msk [vmem:[#allocation3 + $0x50] sm:$0xff] %vm2049_vm7, %v5187_v0 }
 0x165   : > { %v4875_v38 = vunpack.i.h.bf16 %v4873_v3  ;;  %v4874_v54 = vunpack.i.l.bf16 %v4873_v3  ;;  %v4870_v39 = vunpack.i.h.bf16 %v4868_v19  ;;  %v4869_v14 = vunpack.i.l.bf16 %v4868_v19  ;;  %2058 = vst.msk [vmem:[#allocation3 + $0x38] sm:$0xf] %vm2051_vm8, %v5187_v0  ;;  %2062 = vst.msk [vmem:[#allocation3 + $0x58] sm:$0xf] %vm2051_vm8, %v5187_v0 }
 0x166   : > { %2063 = vst.msk [vmem:[#allocation3 + $0x60] sm:$0xff] %vm2049_vm7, %v5187_v0  ;;  %2065 = vst.msk [vmem:[#allocation3 + $0x70] sm:$0xff] %vm2049_vm7, %v5187_v0 }
 0x167   : > { %v1482_v42 = vsel %vm1475_vm15, %v1473_v45, %v4874_v54  ;;  %v1483_v57 = vsel %vm1475_vm15, %v1474_v51, %v4875_v38  ;;  %v1480_v61 = vsel %vm1475_vm15, %v1471_v48, %v4869_v14  ;;  %v1481_v55 = vsel %vm1475_vm15, %v1472_v10, %v4870_v39  ;;  %2064 = vst.msk [vmem:[#allocation3 + $0x68] sm:$0xf] %vm2051_vm8, %v5187_v0 }
 0x168   : > { %v4883_v47 = vpop.permute.xlu1 %4882  ;;  %v4878_v36 = vpop.permute.xlu0 %4877  ;;  %2066 = vst.msk [vmem:[#allocation3 + $0x78] sm:$0xf] %vm2051_vm8, %v5187_v0  ;;  %2068 = vst.msk [vmem:[#allocation3 + $0x88] sm:$0xf] %vm2051_vm8, %v5187_v0 }
 0x169   : > { %v4885_v21 = vunpack.i.h.bf16 %v4883_v47  ;;  %v4884_v16 = vunpack.i.l.bf16 %v4883_v47  ;;  %v4880_v23 = vunpack.i.h.bf16 %v4878_v36  ;;  %v4879_v30 = vunpack.i.l.bf16 %v4878_v36  ;;  %2067 = vst.msk [vmem:[#allocation3 + $0x80] sm:$0xff] %vm2049_vm7, %v5187_v0  ;;  %2069 = vst.msk [vmem:[#allocation3 + $0x90] sm:$0xff] %vm2049_vm7, %v5187_v0 }
 0x16a   : > { %2070 = vst.msk [vmem:[#allocation3 + $0x98] sm:$0xf] %vm2051_vm8, %v5187_v0  ;;  %2072 = vst.msk [vmem:[#allocation3 + $0xa8] sm:$0xf] %vm2051_vm8, %v5187_v0 }
 0x16b   : > { %v1491_v15 = vsel %vm1484_vm1, %v1482_v42, %v4884_v16  ;;  %v1492_v12 = vsel %vm1484_vm1, %v1483_v57, %v4885_v21  ;;  %v1489_v1 = vsel %vm1484_vm1, %v1480_v61, %v4879_v30  ;;  %v1490_v8 = vsel %vm1484_vm1, %v1481_v55, %v4880_v23  ;;  %2071 = vst.msk [vmem:[#allocation3 + $0xa0] sm:$0xff] %vm2049_vm7, %v5187_v0 }
 0x16c   : > { %v4893_v31 = vpop.permute.xlu1 %4892  ;;  %v4888_v33 = vpop.permute.xlu0 %4887  ;;  %2810 = vst.msk [vmem:[#allocation4] sm:$0xff] %vm2049_vm7, %v5187_v0  ;;  %2811 = vst.msk [vmem:[#allocation4 + $0x8] sm:$0xff] %vm2049_vm7, %v5187_v0 }
 0x16d   : > { %v4895_v49 = vunpack.i.h.bf16 %v4893_v31  ;;  %v4894_v26 = vunpack.i.l.bf16 %v4893_v31  ;;  %v4890_v11 = vunpack.i.h.bf16 %v4888_v33  ;;  %v4889_v53 = vunpack.i.l.bf16 %v4888_v33  ;;  %2812 = vst.msk [vmem:[#allocation4 + $0x10] sm:$0xff] %vm2049_vm7, %v5187_v0  ;;  %2813 = vst.msk [vmem:[#allocation4 + $0x18] sm:$0xff] %vm2049_vm7, %v5187_v0 }
 0x16e   : > { %2814 = vst.msk [vmem:[#allocation4 + $0x20] sm:$0xff] %vm2049_vm7, %v5187_v0  ;;  %2815 = vst.msk [vmem:[#allocation4 + $0x28] sm:$0xff] %vm2049_vm7, %v5187_v0 }
 0x16f   : > { %v1500_v37 = vsel %vm1493_vm2, %v1491_v15, %v4894_v26  ;;  %v1501_v9 = vsel %vm1493_vm2, %v1492_v12, %v4895_v49  ;;  %v1498_v44 = vsel %vm1493_vm2, %v1489_v1, %v4889_v53  ;;  %v1499_v5 = vsel %vm1493_vm2, %v1490_v8, %v4890_v11  ;;  %2816 = vst.msk [vmem:[#allocation4 + $0x30] sm:$0xff] %vm2049_vm7, %v5187_v0 }
 0x170   : > { %v4903_v40 = vpop.permute.xlu1 %4902  ;;  %v4898_v24 = vpop.permute.xlu0 %4897 }
 0x171   : > { %v4905_v29 = vunpack.i.h.bf16 %v4903_v40  ;;  %v4904_v41 = vunpack.i.l.bf16 %v4903_v40  ;;  %v4900_v17 = vunpack.i.h.bf16 %v4898_v24  ;;  %v4899_v3 = vunpack.i.l.bf16 %v4898_v24 }
 0x173   : > { %v1861_v32 = vsel %vm1854_vm3, %v1500_v37, %v4904_v41  ;;  %v1862_v59 = vsel %vm1854_vm3, %v1501_v9, %v4905_v29  ;;  %v1859_v13 = vsel %vm1854_vm3, %v1498_v44, %v4899_v3  ;;  %v1860_v25 = vsel %vm1854_vm3, %v1499_v5, %v4900_v17 }
 0x174   : > { %v1866_v19 = vpack.c.bf16 %v1862_v59, %v1861_v32  ;;  %v1865_v4 = vpack.c.bf16 %v1860_v25, %v1859_v13 }
 0x176   : > { %4254 = vmatprep.mubr.msk.bf16.mxu0 %vm1906_vm9, %v1865_v4 }
 0x177   : > { %4255 = vmatmul.mubr.msk.bf16.gmra.mxu0 %vm1906_vm9, %v1866_v19 }
 0x21a   : > { %v4252_v60 = vpop.f32.mrf.mxu0 }
 0x21b   : > { %v1999_v7 = vmul.f32 %v4252_v60, %v6240_v22 }
 0x21c   : > { %v1960_v56 = vpop.f32.mrf.mxu0 }
 0x21d   : > { %v2011_v27 = vadd.f32 %v6245_v28, %v1999_v7  ;;  %v1997_v58 = vmul.f32 %v6240_v22, %v1960_v56 }
 0x21e   : > { %v4253_v47 = vpop.f32.mrf.mxu0 }
 0x21f   : > { %v2019_v18 = vmax.f32 %v2011_v27, 0.0  ;;  %v2009_v46 = vadd.f32 %v6245_v28, %v1997_v58  ;;  %v2000_v63 = vmul.f32 %v4253_v47, %v6240_v22 }
 0x220   : > { %v1963_v52 = vpop.f32.mrf.mxu0 }
 0x221   : > { %v4276_v36 = vcvt.f32.s32 %v2019_v18  ;;  %v2017_v2 = vmax.f32 %v2009_v46, 0.0  ;;  %v2012_v62 = vadd.f32 %v6245_v28, %v2000_v63  ;;  %v1998_v50 = vmul.f32 %v6240_v22, %v1963_v52 }
 0x222   : > { %v4274_v6 = vand.u32 2147483647, %v2019_v18  ;;  %v4279_v14 = vand.u32 2147483648, %v2019_v18 }
 0x223   : > { %v4277_v34 = vcvt.s32.f32 %v4276_v36  ;;  %v4260_v43 = vcvt.f32.s32 %v2017_v2  ;;  %v2020_v38 = vmax.f32 %v2012_v62, 0.0  ;;  %v2010_v54 = vadd.f32 %v6245_v28, %v1998_v50 }
 0x224   : > { %v4258_v21 = vand.u32 2147483647, %v2017_v2  ;;  %v4263_v30 = vand.u32 2147483648, %v2017_v2  ;;  %vm4275_vm9 = vcmp.lt.f32.partialorder %v4274_v6, 8388608.0 }
 0x225   : > { %v4278_v39 = vand.u32 2147483647, %v4277_v34  ;;  %v4261_v16 = vcvt.s32.f32 %v4260_v43  ;;  %v4284_v31 = vcvt.f32.s32 %v2020_v38  ;;  %v2018_v45 = vmax.f32 %v2010_v54, 0.0 }
 0x226   : > { %vm4259_vm11 = vcmp.lt.f32.partialorder %v4258_v21, 8388608.0  ;;  %v4282_v26 = vand.u32 2147483647, %v2020_v38  ;;  %v4287_v11 = vand.u32 2147483648, %v2020_v38 }
 0x227   : > { %v4280_v51 = vor.u32 %v4279_v14, %v4278_v39  ;;  %v4262_v23 = vand.u32 2147483647, %v4261_v16  ;;  %v4285_v33 = vcvt.s32.f32 %v4284_v31  ;;  %v4268_v48 = vcvt.f32.s32 %v2018_v45 }
 0x228   : > { %v4266_v55 = vand.u32 2147483647, %v2018_v45  ;;  %v4271_v15 = vand.u32 2147483648, %v2018_v45  ;;  %vm4283_vm12 = vcmp.lt.f32.partialorder %v4282_v26, 8388608.0 }
 0x229   : > { %v4281_v10 = vsel %vm4275_vm9, %v4280_v51, %v2019_v18  ;;  %v4264_v49 = vor.u32 %v4263_v30, %v4262_v23  ;;  %v4286_v57 = vand.u32 2147483647, %v4285_v33  ;;  %v4269_v53 = vcvt.s32.f32 %v4268_v48 }
 0x22a   : > { %v2035_v42 = vmax.f32 %v4281_v10, 0.0  ;;  %vm4267_vm13 = vcmp.lt.f32.partialorder %v4266_v55, 8388608.0  ;;  %vm6753_vm9 = vcmask 457728  }
 0x22b   : > { %v4265_v61 = vsel %vm4259_vm11, %v4264_v49, %v2017_v2  ;;  %v4288_v1 = vor.u32 %v4287_v11, %v4286_v57  ;;  %v4270_v8 = vand.u32 2147483647, %v4269_v53  ;;  %vm2488_vm11 = vcmask 523264  }
 0x22c   : > { %v2043_v12 = vmin.f32 %v2035_v42, 255.0  ;;  %v2033_v40 = vmax.f32 %v4265_v61, 0.0 }
 0x22d   : > { %v4289_v41 = vsel %vm4283_vm12, %v4288_v1, %v2020_v38  ;;  %v4272_v24 = vor.u32 %v4271_v15, %v4270_v8  ;;  %v2100_v8 = vld [vmem:[#allocation3 + $0x2] ss:$2 sm:$0xf]  ;;  %vm2491_vm12 = vcmask 588800  }
 0x22e   : > { %2078 = vst.msk [vmem:[#allocation3 + $0x42] sm:$0xff] %vm2049_vm7, %v2043_v12  ;;  %v2041_v29 = vmin.f32 %v2033_v40, 255.0  ;;  %v2036_v37 = vmax.f32 %v4289_v41, 0.0  ;;  %v5087_v40 = vld [vmem:[%s6767_s3 + $0x30] sm:$0xff]  }
 0x22f   : > { %v4273_v9 = vsel %vm4267_vm13, %v4272_v24, %v2018_v45  ;;  %2744 = vmatpush1.bf16.msra.mxu1 %v5087_v40  ;;  %vm6740_vm13 = vcmask 654336  }
 0x230   : > { %2076 = vst.msk [vmem:[#allocation3 + $0x22] sm:$0xff] %vm2049_vm7, %v2041_v29  ;;  %v2044_v17 = vmin.f32 %v2036_v37, 255.0  ;;  %v2034_v3 = vmax.f32 %v4273_v9, 0.0  ;;  %v2092_v29 = vld [vmem:[#allocation3 + $0x1] ss:$2 sm:$0xf]  ;;  %2745 = vmatprep.subr.bf16.mxu1 %v5205_v20 }
 0x232   : > { %2079 = vst.msk [vmem:[#allocation3 + $0x52] sm:$0xff] %vm2049_vm7, %v2044_v17  ;;  %v2042_v44 = vmin.f32 %v2034_v3, 255.0 }
 0x234   : > { %2077 = vst.msk [vmem:[#allocation3 + $0x32] sm:$0xff] %vm2049_vm7, %v2042_v44  ;;  %v2116_v44 = vld [vmem:[#allocation3 + $0x4] ss:$2 sm:$0xf] }
 0x235   : > { %v2104_v37 = vld [vmem:[#allocation3 + $0x42] ss:$2 sm:$0xf]  ;;  %v2096_v9 = vld [vmem:[#allocation3 + $0x41] ss:$2 sm:$0xf] }
 0x237   : > { %v4256_v5 = vpop.f32.mrf.mxu0  ;;  %v2102_v41 = vld [vmem:[#allocation3 + $0x22] ss:$2 sm:$0xf]  ;;  %v2094_v24 = vld [vmem:[#allocation3 + $0x21] ss:$2 sm:$0xf] }
 0x238   : > { %v2003_v32 = vmul.f32 %v4256_v5, %v6240_v22  ;;  %v2120_v5 = vld [vmem:[#allocation3 + $0x44] ss:$2 sm:$0xf] }
 0x239   : > { %v1976_v59 = vpop.f32.mrf.mxu0 }
 0x23a   : > { %v2015_v19 = vadd.f32 %v6245_v28, %v2003_v32  ;;  %v2001_v13 = vmul.f32 %v6240_v22, %v1976_v59  ;;  %v2108_v32 = vld [vmem:[#allocation3 + $0x3] ss:$2 sm:$0xf] }
 0x23b   : > { %v4257_v25 = vpop.f32.mrf.mxu0  ;;  %v2112_v59 = vld [vmem:[#allocation3 + $0x43] ss:$2 sm:$0xf] }
 0x23c   : > { %v2023_v4 = vmax.f32 %v2015_v19, 0.0  ;;  %v2013_v35 = vadd.f32 %v6245_v28, %v2001_v13  ;;  %v2004_v60 = vmul.f32 %v4257_v25, %v6240_v22  ;;  %v2306_v19 = vcombine.low %v2100_v8, %v2102_v41  ;;  %v2181_v41 = vld [vmem:[#allocation3 + $0x42] ss:$2 sm:$0xf] }
 0x23d   : > { %v1979_v7 = vpop.f32.mrf.mxu0  ;;  %v2294_v25 = vcombine.low %v2092_v29, %v2094_v24 }
 0x23e   : > { %v4308_v56 = vcvt.f32.s32 %v2023_v4  ;;  %v2021_v27 = vmax.f32 %v2013_v35, 0.0  ;;  %v2016_v58 = vadd.f32 %v6245_v28, %v2004_v60  ;;  %v2002_v47 = vmul.f32 %v6240_v22, %v1979_v7  ;;  %v2118_v7 = vld [vmem:[#allocation3 + $0x24] ss:$2 sm:$0xf] }
 0x23f   : > { %v4306_v63 = vand.u32 2147483647, %v2023_v4  ;;  %v4311_v62 = vand.u32 2147483648, %v2023_v4 }
 0x240   : > { %v4309_v18 = vcvt.s32.f32 %v4308_v56  ;;  %v4292_v46 = vcvt.f32.s32 %v2021_v27  ;;  %v2024_v52 = vmax.f32 %v2016_v58, 0.0  ;;  %v2014_v36 = vadd.f32 %v6245_v28, %v2002_v47  ;;  %v2110_v56 = vld [vmem:[#allocation3 + $0x23] ss:$2 sm:$0xf] }
 0x241   : > { %v4290_v50 = vand.u32 2147483647, %v2021_v27  ;;  %v4295_v39 = vand.u32 2147483648, %v2021_v27  ;;  %vm4307_vm14 = vcmp.lt.f32.partialorder %v4306_v63, 8388608.0 }
 0x242   : > { %v4310_v2 = vand.u32 2147483647, %v4309_v18  ;;  %v4293_v34 = vcvt.s32.f32 %v4292_v46  ;;  %v4316_v43 = vcvt.f32.s32 %v2024_v52  ;;  %v2022_v6 = vmax.f32 %v2014_v36, 0.0  ;;  %v2249_v63 = vld [vmem:[#allocation3 + $0xa0] ss:$2 sm:$0xf] }
 0x243   : > { %vm4291_vm15 = vcmp.lt.f32.partialorder %v4290_v50, 8388608.0  ;;  %v4314_v31 = vand.u32 2147483647, %v2024_v52  ;;  %v4319_v23 = vand.u32 2147483648, %v2024_v52  ;;  %v2330_v36 = vcombine.low %v2116_v44, %v2118_v7  ;;  %v5088_v7 = vld [vmem:[%s6767_s3 + $0x28] sm:$0xff]  }
 0x244   : > { %v4312_v38 = vor.u32 %v4311_v62, %v4310_v2  ;;  %v4294_v54 = vand.u32 2147483647, %v4293_v34  ;;  %v4317_v14 = vcvt.s32.f32 %v4316_v43  ;;  %v4300_v21 = vcvt.f32.s32 %v2022_v6  ;;  %v2243_v62 = vld [vmem:[#allocation3 + $0x40] ss:$2 sm:$0xf]  ;;  %2746 = vmatpush1.bf16.msra.mxu1 %v5088_v7 }
 0x245   : > { %v4298_v33 = vand.u32 2147483647, %v2022_v6  ;;  %v4303_v48 = vand.u32 2147483648, %v2022_v6  ;;  %vm4315_vm1 = vcmp.lt.f32.partialorder %v4314_v31, 8388608.0  ;;  %v2318_v2 = vcombine.low %v2108_v32, %v2110_v56  ;;  %2747 = vmatprep.subr.bf16.mxu1 %v5205_v20 }
 0x246   : > { %v4313_v16 = vsel %vm4307_vm14, %v4312_v38, %v2023_v4  ;;  %v4296_v22 = vor.u32 %v4295_v39, %v4294_v54  ;;  %v4318_v51 = vand.u32 2147483647, %v4317_v14  ;;  %v4301_v28 = vcvt.s32.f32 %v4300_v21  ;;  %v2163_v50 = vld [vmem:[#allocation3 + $0x20] ss:$2 sm:$0xf] }
 0x247   : > { %v2039_v45 = vmax.f32 %v4313_v16, 0.0  ;;  %vm4299_vm2 = vcmp.lt.f32.partialorder %v4298_v33, 8388608.0  ;;  %v2165_v39 = vld [vmem:[#allocation3 + $0x40] ss:$2 sm:$0xf]  ;;  %vm2497_vm14 = vcmask 719872  }
 0x248   : > { %v4297_v30 = vsel %vm4291_vm15, %v4296_v22, %v2021_v27  ;;  %v4320_v26 = vor.u32 %v4319_v23, %v4318_v51  ;;  %v4302_v42 = vand.u32 2147483647, %v4301_v28  ;;  %v2257_v16 = vld [vmem:[#allocation3 + $0xa1] ss:$2 sm:$0xf]  ;;  %vm2500_vm15 = vcmask 785408  }
 0x249   : > { %v2047_v10 = vmin.f32 %v2039_v45, 255.0  ;;  %v2037_v49 = vmax.f32 %v4297_v30, 0.0  ;;  %v2402_v45 = vcombine.low %v2163_v50, %v2165_v39  ;;  %v2251_v51 = vld [vmem:[#allocation3 + $0x41] ss:$2 sm:$0xf] }
 0x24a   : > { %v4321_v11 = vsel %vm4315_vm1, %v4320_v26, %v2024_v52  ;;  %v4304_v53 = vor.u32 %v4303_v48, %v4302_v42  ;;  %v2171_v23 = vld [vmem:[#allocation3 + $0x21] ss:$2 sm:$0xf]  ;;  %v2134_v32 = vld [vmem:[#allocation3 + $0x31] ss:$2 sm:$0xf] }
 0x24b   : > { %2082 = vst.msk [vmem:[#allocation3 + $0x82] sm:$0xff] %vm2049_vm7, %v2047_v10  ;;  %v2045_v57 = vmin.f32 %v2037_v49, 255.0  ;;  %v2040_v61 = vmax.f32 %v4321_v11, 0.0  ;;  %v2173_v49 = vld [vmem:[#allocation3 + $0x41] ss:$2 sm:$0xf] }
 0x24c   : > { %v4305_v55 = vsel %vm4299_vm2, %v4304_v53, %v2022_v6  ;;  %v2219_v56 = vld [vmem:[#allocation3 + $0x32] ss:$2 sm:$0xf]  ;;  %vm2503_vm1 = vcmask 850944   ;;  %vm6746_vm2 = vcmask 916480  }
 0x24d   : > { %2080 = vst.msk [vmem:[#allocation3 + $0x62] sm:$0xff] %vm2049_vm7, %v2045_v57  ;;  %v2048_v15 = vmin.f32 %v2040_v61, 255.0  ;;  %v2038_v12 = vmax.f32 %v4305_v55, 0.0  ;;  %v2265_v57 = vld [vmem:[#allocation3 + $0xa2] ss:$2 sm:$0xf]  ;;  %v2414_v61 = vcombine.low %v2171_v23, %v2173_v49 }
 0x24e   : > { %v2259_v55 = vld [vmem:[#allocation3 + $0x42] ss:$2 sm:$0xf]  ;;  %v2140_v39 = vld [vmem:[#allocation3 + $0x12] ss:$2 sm:$0xf] }
 0x24f   : > { %2083 = vst.msk [vmem:[#allocation3 + $0x92] sm:$0xff] %vm2049_vm7, %v2048_v15  ;;  %v2046_v1 = vmin.f32 %v2038_v12, 255.0  ;;  %v2179_v15 = vld [vmem:[#allocation3 + $0x22] ss:$2 sm:$0xf] }
 0x250   : > { %v2426_v44 = vcombine.low %v2179_v15, %v2181_v41  ;;  %v5091_v15 = vld [vmem:[%s6767_s3 + $0x10] sm:$0xff]   ;;  %v2267_v41 = vld [vmem:[#allocation3 + $0x43] ss:$2 sm:$0xf] }
 0x251   : > { %2081 = vst.msk [vmem:[#allocation3 + $0x72] sm:$0xff] %vm2049_vm7, %v2046_v1 }
 0x252   : > { %v2247_v34 = vld [vmem:[#allocation3 + $0x80] ss:$2 sm:$0xf]  ;;  %v2255_v28 = vld [vmem:[#allocation3 + $0x81] ss:$2 sm:$0xf] }
 0x253   : > { %v2169_v43 = vld [vmem:[#allocation3 + $0x80] ss:$2 sm:$0xf]  ;;  %v2561_v31 = vcombine.low %v2247_v34, %v2249_v63  ;;  %v2177_v30 = vld [vmem:[#allocation3 + $0x81] ss:$2 sm:$0xf]  ;;  %v2573_v53 = vcombine.low %v2255_v28, %v2257_v16 }
 0x254   : > { %v2106_v17 = vld [vmem:[#allocation3 + $0x62] ss:$2 sm:$0xf]  ;;  %v2098_v3 = vld [vmem:[#allocation3 + $0x61] ss:$2 sm:$0xf] }
 0x255   : > { %v2307_v13 = vcombine.low %v2104_v37, %v2106_v17  ;;  %v2295_v4 = vcombine.low %v2096_v9, %v2098_v3  ;;  %v2122_v35 = vld [vmem:[#allocation3 + $0x64] ss:$2 sm:$0xf]  ;;  %v2114_v60 = vld [vmem:[#allocation3 + $0x63] ss:$2 sm:$0xf] }
 0x256   : > { %v2331_v47 = vcombine.low %v2120_v5, %v2122_v35  ;;  %v2319_v18 = vcombine.low %v2112_v59, %v2114_v60  ;;  %v2245_v46 = vld [vmem:[#allocation3 + $0x60] ss:$2 sm:$0xf]  ;;  %v2253_v21 = vld [vmem:[#allocation3 + $0x61] ss:$2 sm:$0xf] }
 0x257   : > { %v4911_v27 = vpack.i.bf16 %v2307_v13, %v2306_v19  ;;  %v4906_v58 = vpack.i.bf16 %v2295_v4, %v2294_v25  ;;  %v2167_v52 = vld [vmem:[#allocation3 + $0x60] ss:$2 sm:$0xf]  ;;  %v2560_v54 = vcombine.low %v2243_v62, %v2245_v46  ;;  %v2175_v22 = vld [vmem:[#allocation3 + $0x61] ss:$2 sm:$0xf]  ;;  %v2572_v10 = vcombine.low %v2251_v51, %v2253_v21 }
 0x258   : > { %v4921_v6 = vpack.i.bf16 %v2331_v47, %v2330_v36  ;;  %v4916_v38 = vpack.i.bf16 %v2319_v18, %v2318_v2  ;;  %v2403_v14 = vcombine.low %v2167_v52, %v2169_v43  ;;  %v2415_v26 = vcombine.low %v2175_v22, %v2177_v30  ;;  %v2261_v42 = vld [vmem:[#allocation3 + $0x62] ss:$2 sm:$0xf]  ;;  %v2191_v37 = vld [vmem:[#allocation3 + $0x63] ss:$2 sm:$0xf] }
 0x259   : > { %4912 = vrot.lane.b32.xlu1 %v4911_v27, %s6732_s29  ;;  %4907 = vrot.lane.b32.xlu0 %v4906_v58, %s6730_s16  ;;  %v4931_v33 = vpack.i.bf16 %v2561_v31, %v2560_v54  ;;  %v2183_v11 = vld [vmem:[#allocation3 + $0x62] ss:$2 sm:$0xf]  ;;  %v4941_v1 = vpack.i.bf16 %v2573_v53, %v2572_v10  ;;  %v2584_v29 = vcombine.low %v2259_v55, %v2261_v42  ;;  %v2132_v9 = vld [vmem:[#allocation3 + $0x11] ss:$2 sm:$0xf] }
 0x25a   : > { %v4926_v48 = vpack.i.bf16 %v2403_v14, %v2402_v45  ;;  %v2263_v12 = vld [vmem:[#allocation3 + $0x82] ss:$2 sm:$0xf]  ;;  %v4936_v8 = vpack.i.bf16 %v2415_v26, %v2414_v61  ;;  %v2138_v17 = vld [vmem:[#allocation3 + $0x71] ss:$2 sm:$0xf]  ;;  %v2354_v46 = vcombine.low %v2132_v9, %v2134_v32 }
 0x25b   : > { %v2185_v40 = vld [vmem:[#allocation3 + $0x82] ss:$2 sm:$0xf]  ;;  %v2585_v3 = vcombine.low %v2263_v12, %v2265_v57  ;;  %v2187_v5 = vld [vmem:[#allocation3 + $0x23] ss:$2 sm:$0xf] }
 0x25c   : > { %v2427_v24 = vcombine.low %v2183_v11, %v2185_v40  ;;  %v2193_v59 = vld [vmem:[#allocation3 + $0x83] ss:$2 sm:$0xf]  ;;  %v2136_v19 = vld [vmem:[#allocation3 + $0x51] ss:$2 sm:$0xf] }
 0x25d   : > { %4922 = vrot.lane.b32.xlu1 %v4921_v6, %s6748_s22  ;;  %4917 = vrot.lane.b32.xlu0 %v4916_v38, %s6726_s21  ;;  %v4951_v13 = vpack.i.bf16 %v2585_v3, %v2584_v29  ;;  %v2189_v4 = vld [vmem:[#allocation3 + $0x43] ss:$2 sm:$0xf]  ;;  %v2439_v35 = vcombine.low %v2191_v37, %v2193_v59  ;;  %v2355_v60 = vcombine.low %v2136_v19, %v2138_v17  ;;  %v2223_v27 = vld [vmem:[#allocation3 + $0x72] ss:$2 sm:$0xf] }
 0x25e   : > { %v4946_v25 = vpack.i.bf16 %v2427_v24, %v2426_v44  ;;  %v2124_v58 = vld [vmem:[#allocation3 + $0x10] ss:$2 sm:$0xf]  ;;  %v2438_v18 = vcombine.low %v2187_v5, %v2189_v4  ;;  %v5089_v2 = vld [vmem:[%s6767_s3 + $0x20] sm:$0xff]   ;;  %v5090_v51 = vld [vmem:[%s6767_s3 + $0x18] sm:$0xff]  }
 0x25f   : > { %v2130_v47 = vld [vmem:[#allocation3 + $0x70] ss:$2 sm:$0xf]  ;;  %v4966_v50 = vpack.i.bf16 %v2355_v60, %v2354_v46  ;;  %v2227_v38 = vld [vmem:[#allocation3 + $0x33] ss:$2 sm:$0xf]  ;;  %2748 = vmatpush1.bf16.msra.mxu1 %v5089_v2 }
 0x260   : > { %v2126_v63 = vld [vmem:[#allocation3 + $0x30] ss:$2 sm:$0xf]  ;;  %v4956_v62 = vpack.i.bf16 %v2439_v35, %v2438_v18  ;;  %v2231_v54 = vld [vmem:[#allocation3 + $0x73] ss:$2 sm:$0xf]  ;;  %2749 = vmatprep.subr.bf16.mxu1 %v5205_v20 }
 0x261   : > { %4932 = vrot.lane.b32.xlu1 %v4931_v33, %s6748_s22  ;;  %4927 = vrot.lane.b32.xlu0 %v4926_v48, %s6722_s23  ;;  %v2128_v52 = vld [vmem:[#allocation3 + $0x50] ss:$2 sm:$0xf]  ;;  %v2342_v16 = vcombine.low %v2124_v58, %v2126_v63  ;;  %v2233_v45 = vld [vmem:[#allocation3 + $0x93] ss:$2 sm:$0xf] }
 0x262   : > { %v2225_v36 = vld [vmem:[#allocation3 + $0x92] ss:$2 sm:$0xf]  ;;  %v2343_v6 = vcombine.low %v2128_v52, %v2130_v47  ;;  %v2229_v30 = vld [vmem:[#allocation3 + $0x53] ss:$2 sm:$0xf]  ;;  %v2537_v33 = vcombine.low %v2231_v54, %v2233_v45 }
 0x263   : > { %v2221_v34 = vld [vmem:[#allocation3 + $0x52] ss:$2 sm:$0xf]  ;;  %v2525_v43 = vcombine.low %v2223_v27, %v2225_v36  ;;  %v2148_v26 = vld [vmem:[#allocation3 + $0x13] ss:$2 sm:$0xf]  ;;  %v2536_v57 = vcombine.low %v2227_v38, %v2229_v30  ;;  %2750 = vmatpush1.bf16.msra.mxu1 %v5090_v51 }
 0x264   : > { %v2146_v14 = vld [vmem:[#allocation3 + $0x72] ss:$2 sm:$0xf]  ;;  %v2524_v21 = vcombine.low %v2219_v56, %v2221_v34  ;;  %v4961_v28 = vpack.i.bf16 %v2343_v6, %v2342_v16  ;;  %v2154_v42 = vld [vmem:[#allocation3 + $0x73] ss:$2 sm:$0xf]  ;;  %2751 = vmatprep.subr.bf16.mxu1 %v5205_v20 }
 0x265   : > { %4942 = vrot.lane.b32.xlu1 %v4941_v1, %s6743_s24  ;;  %4937 = vrot.lane.b32.xlu0 %v4936_v8, %s6734_s25  ;;  %v2142_v22 = vld [vmem:[#allocation3 + $0x32] ss:$2 sm:$0xf]  ;;  %v2150_v53 = vld [vmem:[#allocation3 + $0x33] ss:$2 sm:$0xf]  ;;  %v4986_v12 = vpack.i.bf16 %v2537_v33, %v2536_v57 }
 0x266   : > { %v2144_v31 = vld [vmem:[#allocation3 + $0x52] ss:$2 sm:$0xf]  ;;  %v4976_v23 = vpack.i.bf16 %v2525_v43, %v2524_v21  ;;  %v2366_v11 = vcombine.low %v2140_v39, %v2142_v22  ;;  %v2152_v61 = vld [vmem:[#allocation3 + $0x53] ss:$2 sm:$0xf]  ;;  %v2378_v44 = vcombine.low %v2148_v26, %v2150_v53 }
 0x267   : > { %v2367_v48 = vcombine.low %v2144_v31, %v2146_v14  ;;  %v2235_v10 = vld [vmem:[#allocation3 + $0x34] ss:$2 sm:$0xf]  ;;  %v2379_v29 = vcombine.low %v2152_v61, %v2154_v42  ;;  %v2269_v24 = vld [vmem:[#allocation3 + $0x63] ss:$2 sm:$0xf]  ;;  %2752 = vmatpush1.bf16.msra.mxu1 %v5091_v15 }
 0x268   : > { %v2239_v49 = vld [vmem:[#allocation3 + $0x74] ss:$2 sm:$0xf]  ;;  %v2273_v37 = vld [vmem:[#allocation3 + $0xa3] ss:$2 sm:$0xf]  ;;  %v2596_v4 = vcombine.low %v2267_v41, %v2269_v24  ;;  %2753 = vmatprep.subr.bf16.mxu1 %v5205_v20 }
 0x269   : > { %4952 = vrot.lane.b32.xlu1 %v4951_v13, %s6738_s17  ;;  %4947 = vrot.lane.b32.xlu0 %v4946_v25, %s6728_s14  ;;  %v2241_v55 = vld [vmem:[#allocation3 + $0x94] ss:$2 sm:$0xf]  ;;  %v4971_v40 = vpack.i.bf16 %v2367_v48, %v2366_v11  ;;  %v2271_v59 = vld [vmem:[#allocation3 + $0x83] ss:$2 sm:$0xf]  ;;  %v4981_v25 = vpack.i.bf16 %v2379_v29, %v2378_v44 }
 0x26a   : > { %v2237_v1 = vld [vmem:[#allocation3 + $0x54] ss:$2 sm:$0xf]  ;;  %v2549_v8 = vcombine.low %v2239_v49, %v2241_v55  ;;  %v5092_v19 = vld [vmem:[%s6767_s3 + $0x8] sm:$0xff]   ;;  %v2597_v58 = vcombine.low %v2271_v59, %v2273_v37  ;;  %v5093_v52 = vld [vmem:[%s6767_s3] sm:$0xff]   ;;  %s6741_s23 = smov 120  }
 0x26b   : > { %v2156_v9 = vld [vmem:[#allocation3 + $0x14] ss:$2 sm:$0xf]  ;;  %v2548_v3 = vcombine.low %v2235_v10, %v2237_v1  ;;  %v2275_v60 = vld [vmem:[#allocation3 + $0x44] ss:$2 sm:$0xf]  ;;  %2754 = vmatpush1.bf16.msra.mxu1 %v5092_v19 }
 0x26c   : > { %v2162_v17 = vld [vmem:[#allocation3 + $0x74] ss:$2 sm:$0xf]  ;;  %v2277_v7 = vld [vmem:[#allocation3 + $0x64] ss:$2 sm:$0xf]  ;;  %v5001_v36 = vpack.i.bf16 %v2597_v58, %v2596_v4  ;;  %2755 = vmatprep.subr.bf16.mxu1 %v5205_v20 }
 0x26d   : > { %4957 = vrot.lane.b32.xlu0 %v4956_v62, %s6724_s26  ;;  %4967 = vrot.lane.b32.xlu1 %v4966_v50, %s6738_s17  ;;  %v2158_v5 = vld [vmem:[#allocation3 + $0x34] ss:$2 sm:$0xf]  ;;  %v4996_v13 = vpack.i.bf16 %v2549_v8, %v2548_v3  ;;  %v2281_v56 = vld [vmem:[#allocation3 + $0xa4] ss:$2 sm:$0xf]  ;;  %v2608_v62 = vcombine.low %v2275_v60, %v2277_v7 }
 0x26e   : > { %v2160_v32 = vld [vmem:[#allocation3 + $0x54] ss:$2 sm:$0xf]  ;;  %v2199_v27 = vld [vmem:[#allocation3 + $0x64] ss:$2 sm:$0xf]  ;;  %v2390_v47 = vcombine.low %v2156_v9, %v2158_v5 }
 0x26f   : > { %v2391_v35 = vcombine.low %v2160_v32, %v2162_v17  ;;  %s6749_s26 = smov 64   ;;  %v2279_v18 = vld [vmem:[#allocation3 + $0x84] ss:$2 sm:$0xf]  ;;  %v5094_v43 = vld [vmem:[%s6767_s3 + $0x60] ss:$0 sps:$4 sm:$0xff]   ;;  %2756 = vmatpush1.bf16.msra.mxu1 %v5093_v52 }
 0x270   : > { %v2195_v46 = vld [vmem:[#allocation3 + $0x24] ss:$2 sm:$0xf]  ;;  %v2207_v6 = vld [vmem:[#allocation3 + $0x70] ss:$2 sm:$0xf]  ;;  %v2609_v38 = vcombine.low %v2279_v18, %v2281_v56  ;;  %2763 = vmatprep.subr.bf16.mxu1 %v5205_v20 }
 0x271   : > { %4977 = vrot.lane.b32.xlu1 %v4976_v23, %s6730_s16  ;;  %4962 = vrot.lane.b32.xlu0 %v4961_v28, %s6743_s24  ;;  %v2201_v63 = vld [vmem:[#allocation3 + $0x84] ss:$2 sm:$0xf]  ;;  %v4991_v2 = vpack.i.bf16 %v2391_v35, %v2390_v47  ;;  %s6747_s16 = smov 72   ;;  %v2739_v31 = vsel %vm2737_vm0, %v5094_v43, 0  ;;  %v5095_v23 = vld [vmem:[%s6767_s3 + $0x58] sm:$0xff]  }
 0x272   : > { %v2197_v50 = vld [vmem:[#allocation3 + $0x44] ss:$2 sm:$0xf]  ;;  %v2451_v34 = vcombine.low %v2199_v27, %v2201_v63  ;;  %v2203_v39 = vld [vmem:[#allocation3 + $0x30] ss:$2 sm:$0xf]  ;;  %v5011_v21 = vpack.i.bf16 %v2609_v38, %v2608_v62 }
 0x273   : > { %v2450_v54 = vcombine.low %v2195_v46, %v2197_v50  ;;  %v2209_v14 = vld [vmem:[#allocation3 + $0x90] ss:$2 sm:$0xf]  ;;  %2764 = vmatpush2.bf16.msra.mxu1 %v2739_v31  ;;  %v5097_v33 = vld [vmem:[%s6767_s3 + $0x48] sm:$0xff]   ;;  %v5098_v48 = vld [vmem:[%s6767_s3 + $0x40] sm:$0xff]   ;;  %s6770_s17 = smov 40  }
 0x274   : > { %v2463_v22 = vcombine.low %v2207_v6, %v2209_v14  ;;  %v2205_v45 = vld [vmem:[#allocation3 + $0x50] ss:$2 sm:$0xf]  ;;  %2765 = vmatprep.subr.bf16.mxu1 %v5205_v20  ;;  %v2084_v55 = vld [vmem:[#allocation3] ss:$2 sm:$0xf] }
 0x275   : > { %4987 = vrot.lane.b32.xlu1 %v4986_v12, %s6732_s29  ;;  %4972 = vrot.lane.b32.xlu0 %v4971_v40, %s6751_s27  ;;  %v5006_v16 = vpack.i.bf16 %v2451_v34, %v2450_v54  ;;  %v2462_v51 = vcombine.low %v2203_v39, %v2205_v45  ;;  %v5096_v30 = vld [vmem:[%s6767_s3 + $0x50] sm:$0xff]   ;;  %v2086_v15 = vld [vmem:[#allocation3 + $0x20] ss:$2 sm:$0xf]  ;;  %s6771_s29 = smov 48   ;;  %s6772_s14 = smov 88  }
 0x276   : > { %v2090_v12 = vld [vmem:[#allocation3 + $0x60] ss:$2 sm:$0xf]  ;;  %v2286_v24 = vcombine.low %v2084_v55, %v2086_v15  ;;  %v2211_v60 = vld [vmem:[#allocation3 + $0x31] ss:$2 sm:$0xf] }
 0x277   : > { %v5016_v28 = vpack.i.bf16 %v2463_v22, %v2462_v51  ;;  %2766 = vmatpush2.bf16.msra.mxu1 %v5095_v23  ;;  %v2088_v8 = vld [vmem:[#allocation3 + $0x40] ss:$2 sm:$0xf]  ;;  %v2215_v7 = vld [vmem:[#allocation3 + $0x71] ss:$2 sm:$0xf] }
 0x278   : > { %2767 = vmatprep.subr.bf16.mxu1 %v5205_v20  ;;  %v2287_v37 = vcombine.low %v2088_v8, %v2090_v12  ;;  %v2213_v58 = vld [vmem:[#allocation3 + $0x51] ss:$2 sm:$0xf]  ;;  %s6774_s24 = smov 16   ;;  %s6778_s25 = smov 56  }
 0x279   : > { %4997 = vrot.lane.b32.xlu1 %v4996_v13, %s6726_s21  ;;  %4982 = vrot.lane.b32.xlu0 %v4981_v25, %s6749_s26  ;;  %s6736_s21 = smov 112   ;;  %v2217_v47 = vld [vmem:[#allocation3 + $0x91] ss:$2 sm:$0xf]  ;;  %v2516_v63 = vcombine.low %v2211_v60, %v2213_v58 }
 0x27a   : > { %v2517_v52 = vcombine.low %v2215_v7, %v2217_v47 }
 0x27b   : > { %2768 = vmatpush2.bf16.msra.mxu1 %v5096_v30 }
 0x27c   : > { %2769 = vmatprep.subr.bf16.mxu1 %v5205_v20 }
 0x27d   : > { %5002 = vrot.lane.b32.xlu1 %v5001_v36, %s6751_s27  ;;  %4992 = vrot.lane.b32.xlu0 %v4991_v2, %s6747_s16 }
 0x27f   : > { %2770 = vmatpush2.bf16.msra.mxu1 %v5097_v33 }
 0x280   : > { %2771 = vmatprep.subr.bf16.mxu1 %v5205_v20 }
 0x281   : > { %5012 = vrot.lane.b32.xlu1 %v5011_v21, %s6749_s26  ;;  %5007 = vrot.lane.b32.xlu0 %v5006_v16, %s6736_s21  ;;  %s6779_s21 = smov 104  }
 0x283   : > { %2772 = vmatpush2.bf16.msra.mxu1 %v5098_v48 }
 0x284   : > { %3702 = vmatprep.subr.bf16.mxu1 %v5205_v20 }
 0x285   : > { %5017 = vrot.lane.b32.xlu0 %v5016_v28, %s6741_s23  ;;  %s6775_s23 = smov 8  }
 0x2cb   : > { %v4913_v10 = vpop.permute.xlu1 %4912  ;;  %v4908_v49 = vpop.permute.xlu0 %4907 }
 0x2cc   : > { %v4910_v40 = vunpack.i.h.bf16 %v4908_v49  ;;  %v4909_v1 = vunpack.i.l.bf16 %v4908_v49  ;;  %v4915_v9 = vunpack.i.h.bf16 %v4913_v10  ;;  %v4914_v17 = vunpack.i.l.bf16 %v4913_v10 }
 0x2ce   : > { %v2470_v3 = vsel %vm2049_vm7, %v2286_v24, %v4909_v1  ;;  %v2471_v44 = vsel %vm2049_vm7, %v2287_v37, %v4910_v40 }
 0x2cf   : > { %v4923_v26 = vpop.permute.xlu1 %4922  ;;  %v4918_v42 = vpop.permute.xlu0 %4917  ;;  %v2473_v4 = vsel %vm2472_vm4, %v2470_v3, %v4914_v17  ;;  %v2474_v35 = vsel %vm2472_vm4, %v2471_v44, %v4915_v9 }
 0x2d0   : > { %v4920_v5 = vunpack.i.h.bf16 %v4918_v42  ;;  %v4919_v32 = vunpack.i.l.bf16 %v4918_v42  ;;  %v4925_v13 = vunpack.i.h.bf16 %v4923_v26  ;;  %v4924_v25 = vunpack.i.l.bf16 %v4923_v26 }
 0x2d2   : > { %v2475_v56 = vsel %vm1430_vm10, %v2473_v4, %v4919_v32  ;;  %v2476_v27 = vsel %vm1430_vm10, %v2474_v35, %v4920_v5 }
 0x2d3   : > { %v6343_v57 = vpop.permute.xlu1 %4932  ;;  %v6345_v11 = vpop.permute.xlu0 %4927  ;;  %v2478_v62 = vsel %vm2477_vm5, %v2475_v56, %v4924_v25  ;;  %v2479_v50 = vsel %vm2477_vm5, %v2476_v27, %v4925_v13 }
 0x2d4   : > { %v4935_v36 = vunpack.i.h.bf16 %v6343_v57  ;;  %v4934_v2 = vunpack.i.l.bf16 %v6343_v57  ;;  %v4930_v34 = vunpack.i.h.bf16 %v6345_v11  ;;  %v4929_v43 = vunpack.i.l.bf16 %v6345_v11 }
 0x2d7   : > { %v6347_v53 = vpop.permute.xlu1 %4942  ;;  %v6349_v61 = vpop.permute.xlu0 %4937 }
 0x2d8   : > { %v4945_v6 = vunpack.i.h.bf16 %v6347_v53  ;;  %v4944_v38 = vunpack.i.l.bf16 %v6347_v53  ;;  %v4940_v54 = vunpack.i.h.bf16 %v6349_v61  ;;  %v4939_v39 = vunpack.i.l.bf16 %v6349_v61 }
 0x2db   : > { %v6351_v29 = vpop.permute.xlu1 %4952  ;;  %v6353_v41 = vpop.permute.xlu0 %4947 }
 0x2dc   : > { %v4955_v31 = vunpack.i.h.bf16 %v6351_v29  ;;  %v4954_v45 = vunpack.i.l.bf16 %v6351_v29  ;;  %v4950_v28 = vunpack.i.h.bf16 %v6353_v41  ;;  %v4949_v30 = vunpack.i.l.bf16 %v6353_v41 }
 0x2df   : > { %v6357_v59 = vpop.permute.xlu0 %4957  ;;  %v6359_v19 = vpop.permute.xlu1 %4967 }
 0x2e0   : > { %v4960_v10 = vunpack.i.h.bf16 %v6357_v59  ;;  %v4959_v49 = vunpack.i.l.bf16 %v6357_v59  ;;  %v4970_v26 = vunpack.i.h.bf16 %v6359_v19  ;;  %v4969_v42 = vunpack.i.l.bf16 %v6359_v19 }
 0x2e3   : > { %v4978_v18 = vpop.permute.xlu1 %4977  ;;  %v4963_v46 = vpop.permute.xlu0 %4962 }
 0x2e4   : > { %v4965_v14 = vunpack.i.h.bf16 %v4963_v46  ;;  %v4964_v21 = vunpack.i.l.bf16 %v4963_v46  ;;  %v4980_v51 = vunpack.i.h.bf16 %v4978_v18  ;;  %v4979_v23 = vunpack.i.l.bf16 %v4978_v18 }
 0x2e6   : > { %v2482_v57 = vsel %vm2480_vm6, %v2479_v50, %v4965_v14  ;;  %v2481_v53 = vsel %vm2480_vm6, %v2478_v62, %v4964_v21  ;;  %v2617_v1 = vsel %vm2049_vm7, %v2517_v52, %v4980_v51  ;;  %v2616_v8 = vsel %vm2049_vm7, %v2516_v63, %v4979_v23 }
 0x2e7   : > { %v4988_v16 = vpop.permute.xlu1 %4987  ;;  %v4973_v22 = vpop.permute.xlu0 %4972  ;;  %v2483_v3 = vsel %vm1854_vm3, %v2481_v53, %v4969_v42  ;;  %v2484_v44 = vsel %vm1854_vm3, %v2482_v57, %v4970_v26 }
 0x2e8   : > { %v4990_v33 = vunpack.i.h.bf16 %v4988_v16  ;;  %v4989_v48 = vunpack.i.l.bf16 %v4988_v16  ;;  %v4975_v55 = vunpack.i.h.bf16 %v4973_v22  ;;  %v4974_v15 = vunpack.i.l.bf16 %v4973_v22 }
 0x2ea   : > { %v2618_v24 = vsel %vm2472_vm4, %v2616_v8, %v4989_v48  ;;  %v2619_v37 = vsel %vm2472_vm4, %v2617_v1, %v4990_v33  ;;  %v2486_v59 = vsel %vm6753_vm9, %v2483_v3, %v4974_v15  ;;  %v2487_v19 = vsel %vm6753_vm9, %v2484_v44, %v4975_v55  ;;  %v5100_v55 = vld [vmem:[%s6716_s5 + $0x30] sm:$0xff]   ;;  %v5101_v15 = vld [vmem:[%s6716_s5 + $0x28] sm:$0xff]   ;;  %v4117_v8 = vld [vmem:[%s6769_s4 + $0x1] ss:$0 sm:$0xff] }
 0x2eb   : > { %v4998_v12 = vpop.permute.xlu1 %4997  ;;  %v4983_v40 = vpop.permute.xlu0 %4982 }
 0x2ec   : > { %v5000_v29 = vunpack.i.h.bf16 %v4998_v12  ;;  %v4999_v41 = vunpack.i.l.bf16 %v4998_v12  ;;  %v4985_v9 = vunpack.i.h.bf16 %v4983_v40  ;;  %v4984_v17 = vunpack.i.l.bf16 %v4983_v40  ;;  %v5102_v12 = vld [vmem:[%s6716_s5 + $0x20] sm:$0xff]  }
 0x2ed   : > { %v4116_v40 = vld [vmem:[%s6769_s4] ss:$0 sm:$0xff]  ;;  %s6782_s4 = smov 120  }
 0x2ee   : > { %v2620_v5 = vsel %vm1430_vm10, %v2618_v24, %v4999_v41  ;;  %v2621_v32 = vsel %vm1430_vm10, %v2619_v37, %v5000_v29  ;;  %v2489_v58 = vsel %vm2488_vm11, %v2486_v59, %v4984_v17  ;;  %v2490_v47 = vsel %vm2488_vm11, %v2487_v19, %v4985_v9 }
 0x2ef   : > { %v2622_v13 = vsel %vm2477_vm5, %v2620_v5, %v4934_v2  ;;  %v2623_v25 = vsel %vm2477_vm5, %v2621_v32, %v4935_v36  ;;  %v5003_v4 = vpop.permute.xlu1 %5002  ;;  %v4993_v35 = vpop.permute.xlu0 %4992 }
 0x2f0   : > { %v5005_v60 = vunpack.i.h.bf16 %v5003_v4  ;;  %v5004_v7 = vunpack.i.l.bf16 %v5003_v4  ;;  %v4995_v56 = vunpack.i.h.bf16 %v4993_v35  ;;  %v4994_v27 = vunpack.i.l.bf16 %v4993_v35 }
 0x2f1   : > { %v2624_v18 = vsel %vm2480_vm6, %v2622_v13, %v4944_v38  ;;  %v2625_v46 = vsel %vm2480_vm6, %v2623_v25, %v4945_v6 }
 0x2f2   : > { %v2492_v63 = vsel %vm2491_vm12, %v2489_v58, %v4994_v27  ;;  %v2493_v52 = vsel %vm2491_vm12, %v2490_v47, %v4995_v56  ;;  %v2626_v36 = vsel %vm1854_vm3, %v2624_v18, %v4954_v45  ;;  %v2627_v2 = vsel %vm1854_vm3, %v2625_v46, %v4955_v31 }
 0x2f3   : > { %v2495_v62 = vsel %vm6740_vm13, %v2492_v63, %v4929_v43  ;;  %v2496_v50 = vsel %vm6740_vm13, %v2493_v52, %v4930_v34  ;;  %v5013_v14 = vpop.permute.xlu1 %5012  ;;  %v5008_v38 = vpop.permute.xlu0 %5007  ;;  %v2628_v6 = vsel %vm6753_vm9, %v2626_v36, %v5004_v7  ;;  %v2629_v21 = vsel %vm6753_vm9, %v2627_v2, %v5005_v60  ;;  %v5103_v2 = vld [vmem:[%s6716_s5 + $0x18] sm:$0xff]  }
 0x2f4   : > { %v2498_v16 = vsel %vm2497_vm14, %v2495_v62, %v4939_v39  ;;  %v2499_v22 = vsel %vm2497_vm14, %v2496_v50, %v4940_v54  ;;  %v5015_v31 = vunpack.i.h.bf16 %v5013_v14  ;;  %v5014_v43 = vunpack.i.l.bf16 %v5013_v14 }
 0x2f5   : > { %v5010_v45 = vunpack.i.h.bf16 %v5008_v38  ;;  %v5009_v11 = vunpack.i.l.bf16 %v5008_v38  ;;  %v2501_v34 = vsel %vm2500_vm15, %v2498_v16, %v4949_v30  ;;  %v2502_v51 = vsel %vm2500_vm15, %v2499_v22, %v4950_v28 }
 0x2f6   : > { %v2504_v23 = vsel %vm2503_vm1, %v2501_v34, %v4959_v49  ;;  %v2505_v33 = vsel %vm2503_vm1, %v2502_v51, %v4960_v10  ;;  %v2630_v48 = vsel %vm2488_vm11, %v2628_v6, %v5014_v43  ;;  %v2631_v39 = vsel %vm2488_vm11, %v2629_v21, %v5015_v31  ;;  %v5099_v49 = vld [vmem:[%s6716_s5 + $0x38] sm:$0xff]   ;;  %v2855_v21 = vld [vmem:[#allocation4 + $0xb] ss:$2 sm:$0x3]  ;;  %v5104_v43 = vld [vmem:[%s6716_s5 + $0x10] sm:$0xff]  }
 0x2f7   : > { %v5018_v26 = vpop.permute.xlu0 %5017  ;;  %v2633_v61 = vpack.c.bf16 %v2631_v39, %v2630_v48  ;;  %vm6745_vm13 = vcmask 982016   ;;  %v2507_v57 = vsel %vm6746_vm2, %v2504_v23, %v5009_v11  ;;  %v2508_v53 = vsel %vm6746_vm2, %v2505_v33, %v5010_v45  ;;  %3374 = vmatpush1.bf16.msra.mxu0 %v5099_v49  ;;  %v2851_v31 = vld [vmem:[#allocation4 + $0xa] ss:$2 sm:$0x3] }
 0x2f8   : > { %v5020_v54 = vunpack.i.h.bf16 %v5018_v26  ;;  %v5019_v42 = vunpack.i.l.bf16 %v5018_v26  ;;  %3375 = vmatprep.subr.bf16.mxu0 %v5205_v20  ;;  %v5219_v62 = vmov 1983009808   ;;  %v2927_v14 = vlaneseq  ;;  %v2859_v45 = vld [vmem:[#allocation4 + $0xc] ss:$2 sm:$0x3] }
 0x2f9   : > { %4115 = vmatprep.mubr.msk.bf16.mxu1 %vm2491_vm12, %v2633_v61  ;;  %v2925_v50 = vunpack.c.l.s4 %v5219_v62  ;;  %v2839_v11 = vld [vmem:[#allocation4 + $0x4] ss:$2 sm:$0x3]  ;;  %v2904_v51 = vld [vmem:[#allocation4 + $0x30] ss:$2 sm:$0x3] }
 0x2fa   : > { %v2510_v28 = vsel %vm6745_vm13, %v2507_v57, %v5019_v42  ;;  %v2511_v30 = vsel %vm6745_vm13, %v2508_v53, %v5020_v54  ;;  %v2928_v22 = vshrl.u32 %v2927_v14, 7  ;;  %v2908_v23 = vld [vmem:[#allocation4 + $0x31] ss:$2 sm:$0x3] }
 0x2fb   : > { %v2632_v10 = vpack.c.bf16 %v2511_v30, %v2510_v28  ;;  %3376 = vmatpush1.bf16.msra.mxu0 %v5100_v55  ;;  %v2926_v16 = vunpack.c.0.s8 %v2925_v50  ;;  %v2912_v33 = vld [vmem:[#allocation4 + $0x32] ss:$2 sm:$0x3]  ;;  %v2843_v54 = vld [vmem:[#allocation4 + $0x8] ss:$2 sm:$0x3] }
 0x2fc   : > { %3377 = vmatprep.subr.bf16.mxu0 %v5205_v20  ;;  %v2847_v42 = vld [vmem:[#allocation4 + $0x9] ss:$2 sm:$0x3] }
 0x2fd   : > { %2774 = vmatmul.mubr.bf16.vlgmr.msra.gmra.mxu1 %v2632_v10  ;;  %v6464_v39 = vsub.s32 %v2926_v16, %v2928_v22 }
 0x2ff   : > { %3378 = vmatpush1.bf16.msra.mxu0 %v5101_v15 }
 0x300   : > { %3379 = vmatprep.subr.bf16.mxu0 %v5205_v20 }
 0x303   : > { %3380 = vmatpush1.bf16.msra.mxu0 %v5102_v12 }
 0x304   : > { %3381 = vmatprep.subr.bf16.mxu0 %v5205_v20 }
 0x307   : > { %3382 = vmatpush1.bf16.msra.mxu0 %v5103_v2 }
 0x308   : > { %3383 = vmatprep.subr.bf16.mxu0 %v5205_v20 }
 0x30b   : > { %3384 = vmatpush1.bf16.msra.mxu0 %v5104_v43  ;;  %v5105_v43 = vld [vmem:[%s6716_s5 + $0x8] sm:$0xff]  }
 0x30c   : > { %3385 = vmatprep.subr.bf16.mxu0 %v5205_v20 }
 0x30f   : > { %3386 = vmatpush1.bf16.msra.mxu0 %v5105_v43 }
 0x310   : > { %3387 = vmatprep.subr.bf16.mxu0 %v5205_v20 }
 0x3bd   : > { %v2775_v1 = vpop.f32.mrf.mxu1 }
 0x3be   : > { %v2788_v29 = vmul.f32 %v4116_v40, %v2775_v1 }
 0x3bf   : > { %v2777_v41 = vpop.f32.mrf.mxu1 }
 0x3c0   : > { %v2794_v24 = vadd.f32 %v4117_v8, %v2788_v29 }
 0x3c1   : > { %v2778_v37 = vpop.f32.mrf.mxu1 }
 0x3c2   : > { %v2796_v9 = vmax.f32 %v2794_v24, 0.0  ;;  %v2789_v17 = vmul.f32 %v4116_v40, %v2778_v37 }
 0x3c3   : > { %v2780_v3 = vpop.f32.mrf.mxu1 }
 0x3c4   : > { %v4324_v44 = vcvt.f32.s32 %v2796_v9  ;;  %v2795_v5 = vadd.f32 %v4117_v8, %v2789_v17  ;;  %v4322_v19 = vand.u32 2147483647, %v2796_v9  ;;  %v4327_v25 = vand.u32 2147483648, %v2796_v9 }
 0x3c6   : > { %v4325_v32 = vcvt.s32.f32 %v4324_v44  ;;  %v2797_v59 = vmax.f32 %v2795_v5, 0.0  ;;  %vm4323_vm13 = vcmp.lt.f32.partialorder %v4322_v19, 8388608.0 }
 0x3c8   : > { %v4326_v13 = vand.u32 2147483647, %v4325_v32  ;;  %v4332_v4 = vcvt.f32.s32 %v2797_v59  ;;  %v4330_v7 = vand.u32 2147483647, %v2797_v59  ;;  %v4335_v58 = vand.u32 2147483648, %v2797_v59 }
 0x3ca   : > { %v4328_v35 = vor.u32 %v4327_v25, %v4326_v13  ;;  %v4333_v60 = vcvt.s32.f32 %v4332_v4  ;;  %vm4331_vm2 = vcmp.lt.f32.partialorder %v4330_v7, 8388608.0  ;;  %v2831_v4 = vld [vmem:[#allocation4 + $0x2] ss:$2 sm:$0x3] }
 0x3cc   : > { %v4329_v56 = vsel %vm4323_vm13, %v4328_v35, %v2796_v9  ;;  %v4334_v27 = vand.u32 2147483647, %v4333_v60  ;;  %v2827_v60 = vld [vmem:[#allocation4 + $0x1] ss:$2 sm:$0x3]  ;;  %vm6784_vm13 = vcmask 916480  }
 0x3cd   : > { %v2800_v47 = vmax.f32 %v4329_v56, 0.0 }
 0x3ce   : > { %v4336_v18 = vor.u32 %v4335_v58, %v4334_v27 }
 0x3cf   : > { %v2802_v46 = vmin.f32 %v2800_v47, 255.0 }
 0x3d0   : > { %v4337_v63 = vsel %vm4331_vm2, %v4336_v18, %v2797_v59  ;;  %vm6785_vm2 = vcmask 982016  }
 0x3d1   : > { %v2806_v52 = vcombine.high %v2802_v46, %v2802_v46  ;;  %2819 = vst.msk [vmem:[#allocation4 + $0x12] sm:$0xf] %vm2051_vm8, %v2802_v46  ;;  %v2801_v36 = vmax.f32 %v4337_v63, 0.0 }
 0x3d3   : > { %2820 = vst.msk [vmem:[#allocation4 + $0x1a] sm:$0xf] %vm2051_vm8, %v2806_v52  ;;  %v2803_v38 = vmin.f32 %v2801_v36, 255.0 }
 0x3d5   : > { %v2807_v6 = vcombine.high %v2803_v38, %v2803_v38  ;;  %2821 = vst.msk [vmem:[#allocation4 + $0x22] sm:$0xf] %vm2051_vm8, %v2803_v38 }
 0x3d7   : > { %2822 = vst.msk [vmem:[#allocation4 + $0x2a] sm:$0xf] %vm2051_vm8, %v2807_v6  ;;  %vm6783_vm8 = vcmask 654336  }
 0x3d8   : > { %v2841_v34 = vld [vmem:[#allocation4 + $0x14] ss:$2 sm:$0x3]  ;;  %v2866_v59 = vld [vmem:[#allocation4 + $0x11] ss:$2 sm:$0x3] }
 0x3d9   : > { %v2973_v61 = vcombine.low %v2839_v11, %v2841_v34  ;;  %v2862_v13 = vld [vmem:[#allocation4 + $0x10] ss:$2 sm:$0x3]  ;;  %v2829_v63 = vld [vmem:[#allocation4 + $0x11] ss:$2 sm:$0x3] }
 0x3da   : > { %v2857_v48 = vld [vmem:[#allocation4 + $0x1b] ss:$2 sm:$0x3]  ;;  %v2853_v26 = vld [vmem:[#allocation4 + $0x1a] ss:$2 sm:$0x3]  ;;  %v2934_v6 = vcombine.low %v2827_v60, %v2829_v63 }
 0x3db   : > { %v3025_v57 = vcombine.low %v2855_v21, %v2857_v48  ;;  %v3012_v53 = vcombine.low %v2851_v31, %v2853_v26  ;;  %v2861_v28 = vld [vmem:[#allocation4 + $0x1c] ss:$2 sm:$0x3]  ;;  %v2845_v30 = vld [vmem:[#allocation4 + $0x18] ss:$2 sm:$0x3]  ;;  %v2980_v41 = vrot.slane %v2973_v61, %v6464_v39 }
 0x3dc   : > { %v3038_v10 = vcombine.low %v2859_v45, %v2861_v28  ;;  %v2902_v49 = vld [vmem:[#allocation4 + $0x20] ss:$2 sm:$0x3]  ;;  %v2906_v55 = vld [vmem:[#allocation4 + $0x21] ss:$2 sm:$0x3]  ;;  %v2986_v9 = vcombine.low %v2843_v54, %v2845_v30  ;;  %v2941_v26 = vrot.slane %v2934_v6, %v6464_v39 }
 0x3dd   : > { %v3032_v15 = vrot.slane %v3025_v57, %v6464_v39  ;;  %v3019_v12 = vrot.slane %v3012_v53, %v6464_v39  ;;  %v3194_v40 = vcombine.low %v2902_v49, %v2904_v51  ;;  %v3207_v1 = vcombine.low %v2906_v55, %v2908_v23  ;;  %v2849_v8 = vld [vmem:[#allocation4 + $0x19] ss:$2 sm:$0x3]  ;;  %v2910_v29 = vld [vmem:[#allocation4 + $0x22] ss:$2 sm:$0x3] }
 0x3de   : > { %v3220_v24 = vcombine.low %v2910_v29, %v2912_v33  ;;  %v2999_v17 = vcombine.low %v2847_v42, %v2849_v8  ;;  %v3045_v3 = vrot.slane %v3038_v10, %v6464_v39  ;;  %v2868_v19 = vld [vmem:[#allocation4 + $0x21] ss:$2 sm:$0x3]  ;;  %v2864_v25 = vld [vmem:[#allocation4 + $0x20] ss:$2 sm:$0x3]  ;;  %v2993_v56 = vrot.slane %v2986_v9, %v6464_v39 }
 0x3df   : > { %3033 = vrot.lane.b32.xlu0 %v3032_v15, %s6749_s26  ;;  %3020 = vrot.lane.b32.xlu1 %v3019_v12, %s6751_s27  ;;  %v3201_v37 = vrot.slane %v3194_v40, %v6464_v39  ;;  %v3214_v5 = vrot.slane %v3207_v1, %v6464_v39  ;;  %v2896_v35 = vld [vmem:[#allocation4 + $0x2b] ss:$2 sm:$0x3]  ;;  %v2892_v7 = vld [vmem:[#allocation4 + $0x2a] ss:$2 sm:$0x3]  ;;  %v3064_v18 = vcombine.low %v2866_v59, %v2868_v19 }
 0x3e0   : > { %v3227_v32 = vrot.slane %v3220_v24, %v6464_v39  ;;  %v3006_v27 = vrot.slane %v2999_v17, %v6464_v39  ;;  %v2833_v58 = vld [vmem:[#allocation4 + $0x12] ss:$2 sm:$0x3]  ;;  %v2894_v47 = vld [vmem:[#allocation4 + $0x1b] ss:$2 sm:$0x3]  ;;  %v3051_v46 = vcombine.low %v2862_v13, %v2864_v25 }
 0x3e1   : > { %v5021_v44 = vpack.i.bf16 %v3201_v37, %v2980_v41  ;;  %v2890_v52 = vld [vmem:[#allocation4 + $0x1a] ss:$2 sm:$0x3]  ;;  %v5026_v36 = vpack.i.bf16 %v3214_v5, %v2993_v56  ;;  %v3168_v62 = vcombine.low %v2894_v47, %v2896_v35  ;;  %v2900_v14 = vld [vmem:[#allocation4 + $0x2c] ss:$2 sm:$0x3]  ;;  %v2947_v38 = vcombine.low %v2831_v4, %v2833_v58 }
 0x3e2   : > { %v5031_v2 = vpack.i.bf16 %v3227_v32, %v3006_v27  ;;  %v3155_v50 = vcombine.low %v2890_v52, %v2892_v7  ;;  %v2835_v21 = vld [vmem:[#allocation4 + $0x3] ss:$2 sm:$0x3]  ;;  %v2837_v16 = vld [vmem:[#allocation4 + $0x13] ss:$2 sm:$0x3]  ;;  %v3071_v22 = vrot.slane %v3064_v18, %v6464_v39  ;;  %v3058_v45 = vrot.slane %v3051_v46, %v6464_v39 }
 0x3e3   : > { %3046 = vrot.lane.b32.xlu1 %v3045_v3, %s6747_s16  ;;  %5022 = vrot.lane.b32.xlu0 %v5021_v44, %s6748_s22  ;;  %v2898_v31 = vld [vmem:[#allocation4 + $0x1c] ss:$2 sm:$0x3]  ;;  %v3175_v11 = vrot.slane %v3168_v62, %v6464_v39  ;;  %v2872_v23 = vld [vmem:[#allocation4 + $0x22] ss:$2 sm:$0x3]  ;;  %v2954_v48 = vrot.slane %v2947_v38, %v6464_v39  ;;  %v2960_v61 = vcombine.low %v2835_v21, %v2837_v16 }
 0x3e4   : > { %v3162_v34 = vrot.slane %v3155_v50, %v6464_v39  ;;  %v3181_v51 = vcombine.low %v2898_v31, %v2900_v14  ;;  %v5106_v33 = vld [vmem:[%s6716_s5] sm:$0xff]   ;;  %v2870_v42 = vld [vmem:[#allocation4 + $0x12] ss:$2 sm:$0x3]  ;;  %v5108_v17 = vld [vmem:[%s6716_s5 + $0x58] sm:$0xff]   ;;  %s6776_s16 = smov 96  }
 0x3e5   : > { %v5107_v54 = vld [vmem:[%s6716_s5 + $0x60] ss:$0 sps:$4 sm:$0xff]   ;;  %v5041_v57 = vpack.i.bf16 %v3175_v11, %v2954_v48  ;;  %v3077_v28 = vcombine.low %v2870_v42, %v2872_v23  ;;  %v2916_v10 = vld [vmem:[#allocation4 + $0x33] ss:$2 sm:$0x3]  ;;  %3388 = vmatpush1.bf16.msra.mxu0 %v5106_v33  ;;  %v2967_v15 = vrot.slane %v2960_v61, %v6464_v39  ;;  %s6777_s22 = smov 24  }
 0x3e6   : > { %v5036_v53 = vpack.i.bf16 %v3162_v34, %v2941_v26  ;;  %v3188_v30 = vrot.slane %v3181_v51, %v6464_v39  ;;  %v2914_v49 = vld [vmem:[#allocation4 + $0x23] ss:$2 sm:$0x3]  ;;  %v3371_v12 = vsel %vm2737_vm0, %v5107_v54, 0  ;;  %3395 = vmatprep.subr.bf16.mxu0 %v5205_v20  ;;  %v5109_v13 = vld [vmem:[%s6716_s5 + $0x50] sm:$0xff]   ;;  %v5110_v7 = vld [vmem:[%s6716_s5 + $0x48] sm:$0xff]  }
 0x3e7   : > { %5027 = vrot.lane.b32.xlu1 %v5026_v36, %s6770_s17  ;;  %5032 = vrot.lane.b32.xlu0 %v5031_v2, %s6771_s29  ;;  %v2876_v55 = vld [vmem:[#allocation4 + $0x23] ss:$2 sm:$0x3]  ;;  %v2874_v40 = vld [vmem:[#allocation4 + $0x13] ss:$2 sm:$0x3]  ;;  %v3084_v1 = vrot.slane %v3077_v28, %v6464_v39  ;;  %v3233_v29 = vcombine.low %v2914_v49, %v2916_v10 }
 0x3e8   : > { %v5046_v8 = vpack.i.bf16 %v3188_v30, %v2967_v15  ;;  %v3090_v41 = vcombine.low %v2874_v40, %v2876_v55  ;;  %v2918_v24 = vld [vmem:[#allocation4 + $0x24] ss:$2 sm:$0x3]  ;;  %v2920_v37 = vld [vmem:[#allocation4 + $0x34] ss:$2 sm:$0x3] }
 0x3e9   : > { %v2880_v9 = vld [vmem:[#allocation4 + $0x24] ss:$2 sm:$0x3]  ;;  %3396 = vmatpush2.bf16.msra.mxu0 %v3371_v12  ;;  %v2878_v3 = vld [vmem:[#allocation4 + $0x14] ss:$2 sm:$0x3]  ;;  %v3240_v44 = vrot.slane %v3233_v29, %v6464_v39  ;;  %v3246_v32 = vcombine.low %v2918_v24, %v2920_v37 }
 0x3ea   : > { %3397 = vmatprep.subr.bf16.mxu0 %v5205_v20  ;;  %v3097_v5 = vrot.slane %v3090_v41, %v6464_v39  ;;  %v3103_v59 = vcombine.low %v2878_v3, %v2880_v9  ;;  %v2884_v19 = vld [vmem:[#allocation4 + $0x28] ss:$2 sm:$0x3]  ;;  %v2882_v25 = vld [vmem:[#allocation4 + $0x18] ss:$2 sm:$0x3] }
 0x3eb   : > { %3072 = vrot.lane.b32.xlu1 %v3071_v22, %s6772_s14  ;;  %3059 = vrot.lane.b32.xlu0 %v3058_v45, %s6773_s28  ;;  %v3253_v4 = vrot.slane %v3246_v32, %v6464_v39  ;;  %v3116_v60 = vcombine.low %v2882_v25, %v2884_v19  ;;  %s6781_s26 = smov 112   ;;  %v5111_v27 = vld [vmem:[%s6716_s5 + $0x40] sm:$0xff]   ;;  %v2825_v2 = vld [vmem:[#allocation4 + $0x10] ss:$2 sm:$0x3] }
 0x3ec   : > { %v3110_v35 = vrot.slane %v3103_v59, %v6464_v39  ;;  %v2823_v36 = vld [vmem:[#allocation4] ss:$2 sm:$0x3]  ;;  %v2888_v62 = vld [vmem:[#allocation4 + $0x29] ss:$2 sm:$0x3] }
 0x3ed   : > { %3398 = vmatpush2.bf16.msra.mxu0 %v5108_v17  ;;  %v3123_v56 = vrot.slane %v3116_v60, %v6464_v39  ;;  %v2886_v38 = vld [vmem:[#allocation4 + $0x19] ss:$2 sm:$0x3]  ;;  %v2923_v6 = vcombine.low %v2823_v36, %v2825_v2 }
 0x3ee   : > { %3399 = vmatprep.subr.bf16.mxu0 %v5205_v20  ;;  %v3144_v21 = vcombine.low %v2886_v38, %v2888_v62 }
 0x3ef   : > { %5042 = vrot.lane.b32.xlu0 %v5041_v57, %s6774_s24  ;;  %5037 = vrot.lane.b32.xlu1 %v5036_v53, %s6775_s23  ;;  %v2930_v31 = vrot.slane %v2923_v6, %v6464_v39 }
 0x3f0   : > { %v3151_v11 = vrot.slane %v3144_v21, %v6464_v39 }
 0x3f1   : > { %3400 = vmatpush2.bf16.msra.mxu0 %v5109_v13 }
 0x3f2   : > { %3401 = vmatprep.subr.bf16.mxu0 %v5205_v20 }
 0x3f3   : > { %3085 = vrot.lane.b32.xlu0 %v3084_v1, %s6776_s16  ;;  %5047 = vrot.lane.b32.xlu1 %v5046_v8, %s6777_s22 }
 0x3f5   : > { %3402 = vmatpush2.bf16.msra.mxu0 %v5110_v7 }
 0x3f6   : > { %3403 = vmatprep.subr.bf16.mxu0 %v5205_v20 }
 0x3f7   : > { %3241 = vrot.lane.b32.xlu0 %v3240_v44, %s6778_s25  ;;  %3098 = vrot.lane.b32.xlu1 %v3097_v5, %s6779_s21 }
 0x3f9   : > { %3404 = vmatpush2.bf16.msra.mxu0 %v5111_v27 }
 0x3fb   : > { %3254 = vrot.lane.b32.xlu0 %v3253_v4, %s6780_s2  ;;  %3111 = vrot.lane.b32.xlu1 %v3110_v35, %s6781_s26 }
 0x3ff   : > { %3124 = vrot.lane.b32.xlu1 %v3123_v56, %s6782_s4 }
 0x451   : > { %v3034_v58 = vpop.permute.xlu0 %3033  ;;  %v3021_v47 = vpop.permute.xlu1 %3020 }
 0x455   : > { %v3047_v18 = vpop.permute.xlu1 %3046  ;;  %v5023_v46 = vpop.permute.xlu0 %5022 }
 0x456   : > { %v5025_v42 = vunpack.i.h.bf16 %v5023_v46  ;;  %v5024_v57 = vunpack.i.l.bf16 %v5023_v46 }
 0x459   : > { %v5028_v63 = vpop.permute.xlu1 %5027  ;;  %v5033_v52 = vpop.permute.xlu0 %5032 }
 0x45a   : > { %v5030_v30 = vunpack.i.h.bf16 %v5028_v63  ;;  %v5029_v10 = vunpack.i.l.bf16 %v5028_v63  ;;  %v5035_v15 = vunpack.i.h.bf16 %v5033_v52  ;;  %v5034_v12 = vunpack.i.l.bf16 %v5033_v52 }
 0x45d   : > { %v3073_v50 = vpop.permute.xlu1 %3072  ;;  %v3060_v14 = vpop.permute.xlu0 %3059 }
 0x461   : > { %v5043_v16 = vpop.permute.xlu0 %5042  ;;  %v5038_v22 = vpop.permute.xlu1 %5037 }
 0x462   : > { %v5040_v43 = vunpack.i.h.bf16 %v5038_v22  ;;  %v5039_v45 = vunpack.i.l.bf16 %v5038_v22  ;;  %v5045_v34 = vunpack.i.h.bf16 %v5043_v16  ;;  %v5044_v51 = vunpack.i.l.bf16 %v5043_v16 }
 0x464   : > { %v3127_v23 = vsel %vm2049_vm7, %v2930_v31, %v5039_v45  ;;  %v3257_v33 = vsel %vm2049_vm7, %v3151_v11, %v5040_v43  ;;  %v5112_v31 = vld [vmem:[%s6718_s7 + $0x38] sm:$0xff]   ;;  %v5113_v43 = vld [vmem:[%s6718_s7 + $0x30] sm:$0xff]   ;;  %v5114_v45 = vld [vmem:[%s6718_s7 + $0x28] sm:$0xff]  }
 0x465   : > { %v3086_v48 = vpop.permute.xlu0 %3085  ;;  %v5048_v26 = vpop.permute.xlu1 %5047  ;;  %v3128_v53 = vsel %vm2472_vm4, %v3127_v23, %v5044_v51  ;;  %v3258_v28 = vsel %vm2472_vm4, %v3257_v33, %v5045_v34  ;;  %3703 = vmatpush1.bf16.msra.mxu1 %v5112_v31  ;;  %v5115_v11 = vld [vmem:[%s6718_s7 + $0x20] sm:$0xff]   ;;  %v5116_v34 = vld [vmem:[%s6718_s7 + $0x18] sm:$0xff]   ;;  %v5117_v51 = vld [vmem:[%s6718_s7 + $0x10] sm:$0xff]  }
 0x466   : > { %v5050_v61 = vunpack.i.h.bf16 %v5048_v26  ;;  %v5049_v54 = vunpack.i.l.bf16 %v5048_v26  ;;  %3704 = vmatprep.subr.bf16.mxu1 %v5205_v20  ;;  %v5118_v23 = vld [vmem:[%s6718_s7 + $0x8] sm:$0xff]   ;;  %v5119_v33 = vld [vmem:[%s6718_s7] sm:$0xff]  }
 0x468   : > { %v3129_v49 = vsel %vm1430_vm10, %v3128_v53, %v5049_v54  ;;  %v3259_v55 = vsel %vm1430_vm10, %v3258_v28, %v5050_v61  ;;  %v4133_v61 = vld [vmem:[%s6717_s6 + $0x1] ss:$0 sm:$0xff] }
 0x469   : > { %v3130_v40 = vsel %vm2477_vm5, %v3129_v49, %v5024_v57  ;;  %v3242_v1 = vpop.permute.xlu0 %3241  ;;  %v3260_v8 = vsel %vm2477_vm5, %v3259_v55, %v5025_v42  ;;  %v3099_v29 = vpop.permute.xlu1 %3098  ;;  %3705 = vmatpush1.bf16.msra.mxu1 %v5113_v43 }
 0x46a   : > { %v3131_v41 = vsel %vm2480_vm6, %v3130_v40, %v5029_v10  ;;  %v3261_v24 = vsel %vm2480_vm6, %v3260_v8, %v5030_v30  ;;  %3706 = vmatprep.subr.bf16.mxu1 %v5205_v20 }
 0x46b   : > { %v3132_v37 = vsel %vm1854_vm3, %v3131_v41, %v5034_v12  ;;  %v3262_v9 = vsel %vm1854_vm3, %v3261_v24, %v5035_v15 }
 0x46c   : > { %v3263_v17 = vsel %vm6753_vm9, %v3262_v9, %v3242_v1  ;;  %v3133_v3 = vsel %vm6753_vm9, %v3132_v37, %v3021_v47  ;;  %vm3440_vm9 = vcmask 62464   ;;  %v5120_v37 = vld [vmem:[%s6718_s7 + $0x60] ss:$0 sps:$4 sm:$0xff]  }
 0x46d   : > { %v3134_v44 = vsel %vm2488_vm11, %v3133_v3, %v3034_v58  ;;  %v3255_v5 = vpop.permute.xlu0 %3254  ;;  %v3112_v32 = vpop.permute.xlu1 %3111  ;;  %3441 = vst.msk [vmem:[#allocation5] sm:$0x3f] %vm3440_vm9, %v5187_v0  ;;  %3442 = vst.msk [vmem:[#allocation5 + $0x8] sm:$0x3f] %vm3440_vm9, %v5187_v0  ;;  %3707 = vmatpush1.bf16.msra.mxu1 %v5114_v45  ;;  %v3700_v3 = vsel %vm2737_vm0, %v5120_v37, 0 }
 0x46e   : > { %v3135_v59 = vsel %vm2491_vm12, %v3134_v44, %v3047_v18  ;;  %v3264_v19 = vsel %vm2488_vm11, %v3263_v17, %v3255_v5  ;;  %3443 = vst.msk [vmem:[#allocation5 + $0x10] sm:$0x3f] %vm3440_vm9, %v5187_v0  ;;  %3444 = vst.msk [vmem:[#allocation5 + $0x18] sm:$0x3f] %vm3440_vm9, %v5187_v0  ;;  %3708 = vmatprep.subr.bf16.mxu1 %v5205_v20 }
 0x46f   : > { %v3136_v13 = vsel %vm6783_vm8, %v3135_v59, %v3060_v14  ;;  %v3266_v25 = vpack.c.bf16 %v3264_v19, %v3264_v19  ;;  %3445 = vst.msk [vmem:[#allocation5 + $0x20] sm:$0x3f] %vm3440_vm9, %v5187_v0  ;;  %vm3448_vm8 = vcmask 58368  }
 0x470   : > { %v3137_v4 = vsel %vm2497_vm14, %v3136_v13, %v3073_v50  ;;  %v5122_v13 = vld [vmem:[%s6718_s7 + $0x50] sm:$0xff]  }
 0x471   : > { %v3138_v35 = vsel %vm2500_vm15, %v3137_v4, %v3086_v48  ;;  %4131 = vmatprep.mubr.msk.bf16.mxu0 %vm2491_vm12, %v3266_v25  ;;  %v3125_v56 = vpop.permute.xlu1 %3124  ;;  %3709 = vmatpush1.bf16.msra.mxu1 %v5115_v11  ;;  %v4132_v48 = vld [vmem:[%s6717_s6] ss:$0 sm:$0xff] }
 0x472   : > { %v3139_v60 = vsel %vm2503_vm1, %v3138_v35, %v3099_v29  ;;  %3710 = vmatprep.subr.bf16.mxu1 %v5205_v20  ;;  %v5123_v35 = vld [vmem:[%s6718_s7 + $0x48] sm:$0xff]  }
 0x473   : > { %v3140_v7 = vsel %vm6784_vm13, %v3139_v60, %v3112_v32 }
 0x474   : > { %v3141_v27 = vsel %vm6785_vm2, %v3140_v7, %v3125_v56  ;;  %v3454_v47 = vld [vmem:[#allocation5 + $0x3] sm:$0x1]  ;;  %v3455_v46 = vld [vmem:[#allocation5 + $0x4] sm:$0x1]  ;;  %v3457_v36 = vld [vmem:[#allocation5 + $0x8] sm:$0x1] }
 0x475   : > { %v3265_v58 = vpack.c.bf16 %v3141_v27, %v3141_v27  ;;  %v3472_v18 = vld [vmem:[#allocation5 + $0x1c] sm:$0x1]  ;;  %v3458_v50 = vld [vmem:[#allocation5 + $0x9] sm:$0x1]  ;;  %v3459_v0 = vld [vmem:[#allocation5 + $0xa] sm:$0x1]  ;;  %3711 = vmatpush1.bf16.msra.mxu1 %v5116_v34 }
 0x476   : > { %v5051_v63 = vpack.i.bf16 %v3472_v18, %v3454_v47  ;;  %v3474_v52 = vld [vmem:[#allocation5 + $0x20] sm:$0x1]  ;;  %v3475_v2 = vld [vmem:[#allocation5 + $0x21] sm:$0x1]  ;;  %v3476_v14 = vld [vmem:[#allocation5 + $0x22] sm:$0x1]  ;;  %3712 = vmatprep.subr.bf16.mxu1 %v5205_v20 }
 0x477   : > { %3406 = vmatmul.mubr.bf16.vlgmr.msra.gmra.mxu0 %v3265_v58  ;;  %v5056_v62 = vpack.i.bf16 %v3474_v52, %v3455_v46  ;;  %v5061_v38 = vpack.i.bf16 %v3475_v2, %v3457_v36  ;;  %v5066_v6 = vpack.i.bf16 %v3476_v14, %v3458_v50  ;;  %v3460_v21 = vld [vmem:[#allocation5 + $0xb] sm:$0x1]  ;;  %v3461_v16 = vld [vmem:[#allocation5 + $0xc] sm:$0x1]  ;;  %v3462_v22 = vld [vmem:[#allocation5 + $0x10] sm:$0x1] }
 0x478   : > { %5052 = vrot.lane.b32.xlu0 %v5051_v63, %s6777_s22  ;;  %v3453_v9 = vld [vmem:[#allocation5 + $0x2] sm:$0x1]  ;;  %v3452_v17 = vld [vmem:[#allocation5 + $0x1] sm:$0x1]  ;;  %v3463_v19 = vld [vmem:[#allocation5 + $0x11] sm:$0x1] }
 0x479   : > { %5057 = vrot.lane.b32.xlu1 %v5056_v62, %s6786_s0  ;;  %3713 = vmatpush1.bf16.msra.mxu1 %v5117_v51  ;;  %v3477_v4 = vld [vmem:[#allocation5 + $0x23] sm:$0x1]  ;;  %v3478_v7 = vld [vmem:[#allocation5 + $0x24] sm:$0x1]  ;;  %v3466_v56 = vld [vmem:[#allocation5 + $0x14] sm:$0x1] }
 0x47a   : > { %3714 = vmatprep.subr.bf16.mxu1 %v5205_v20  ;;  %v5124_v27 = vld [vmem:[%s6718_s7 + $0x40] sm:$0xff]   ;;  %v3468_v58 = vld [vmem:[#allocation5 + $0x18] sm:$0x1]  ;;  %v3469_v14 = vld [vmem:[#allocation5 + $0x19] sm:$0x1] }
 0x47b   : > { %v3451_v50 = vld [vmem:[#allocation5] sm:$0x1] }
 0x47c   : > { %5062 = vrot.lane.b32.xlu0 %v5061_v38, %s6770_s17 }
 0x47d   : > { %5067 = vrot.lane.b32.xlu1 %v5066_v6, %s6771_s29  ;;  %3715 = vmatpush1.bf16.msra.mxu1 %v5118_v23 }
 0x47e   : > { %3716 = vmatprep.subr.bf16.mxu1 %v5205_v20 }
 0x480   : > { %3504 = vrot.lane.b32.xlu0 %v3459_v0, %s6778_s25 }
 0x481   : > { %3508 = vrot.lane.b32.xlu1 %v3460_v21, %s6780_s2  ;;  %3717 = vmatpush1.bf16.msra.mxu1 %v5119_v33 }
 0x482   : > { %3724 = vmatprep.subr.bf16.mxu1 %v5205_v20 }
 0x484   : > { %3512 = vrot.lane.b32.xlu0 %v3461_v16, %s6787_s1 }
 0x485   : > { %3516 = vrot.lane.b32.xlu1 %v3462_v22, %s6773_s28  ;;  %3725 = vmatpush2.bf16.msra.mxu1 %v3700_v3 }
 0x486   : > { %3726 = vmatprep.subr.bf16.mxu1 %v5205_v20 }
 0x4ea   : > { %v5053_v47 = vpop.permute.xlu0 %5052 }
 0x4eb   : > { %v5058_v18 = vpop.permute.xlu1 %5057  ;;  %v5055_v22 = vunpack.i.h.bf16 %v5053_v47  ;;  %v5054_v31 = vunpack.i.l.bf16 %v5053_v47 }
 0x4ec   : > { %v5060_v11 = vunpack.i.h.bf16 %v5058_v18  ;;  %v5059_v34 = vunpack.i.l.bf16 %v5058_v18 }
 0x4ee   : > { %v5063_v46 = vpop.permute.xlu0 %5062 }
 0x4ef   : > { %v5068_v63 = vpop.permute.xlu1 %5067 }
 0x4f2   : > { %v3505_v52 = vpop.permute.xlu0 %3504 }
 0x4f3   : > { %v3509_v36 = vpop.permute.xlu1 %3508 }
 0x4f6   : > { %v3513_v2 = vpop.permute.xlu0 %3512 }
 0x4f7   : > { %v3517_v62 = vpop.permute.xlu1 %3516 }
 0x537   : > { %v3407_v26 = vpop.f32.mrf.mxu0 }
 0x538   : > { %v3419_v54 = vmul.f32 %v4132_v48, %v3407_v26  ;;  %v5065_v26 = vunpack.i.h.bf16 %v5063_v46 }
 0x539   : > { %v3409_v42 = vpop.f32.mrf.mxu0 }
 0x53a   : > { %v3424_v57 = vadd.f32 %v4133_v61, %v3419_v54  ;;  %v5064_v61 = vunpack.i.l.bf16 %v5063_v46 }
 0x53b   : > { %v3410_v53 = vpop.f32.mrf.mxu0 }
 0x53c   : > { %v3425_v28 = vmax.f32 %v3424_v57, 0.0  ;;  %v5069_v57 = vunpack.i.l.bf16 %v5068_v63 }
 0x53d   : > { %v3411_v30 = vpop.f32.mrf.mxu0 }
 0x53e   : > { %v4340_v10 = vcvt.f32.s32 %v3425_v28  ;;  %v4338_v55 = vand.u32 2147483647, %v3425_v28  ;;  %v4343_v12 = vand.u32 2147483648, %v3425_v28  ;;  %v5070_v30 = vunpack.i.h.bf16 %v5068_v63 }
 0x540   : > { %v4341_v49 = vcvt.s32.f32 %v4340_v10  ;;  %vm4339_vm9 = vcmp.lt.f32.partialorder %v4338_v55, 8388608.0 }
 0x542   : > { %v4342_v15 = vand.u32 2147483647, %v4341_v49 }
 0x544   : > { %v4344_v40 = vor.u32 %v4343_v12, %v4342_v15 }
 0x546   : > { %v4345_v1 = vsel %vm4339_vm9, %v4344_v40, %v3425_v28 }
 0x547   : > { %v3427_v8 = vmax.f32 %v4345_v1, 0.0 }
 0x549   : > { %v3428_v29 = vmin.f32 %v3427_v8, 255.0 }
 0x54b   : > { %v3436_v41 = vrot.slane %v3428_v29, %v6464_v39  ;;  %v5121_v39 = vld [vmem:[%s6718_s7 + $0x58] sm:$0xff]  }
 0x54c   : > { %3727 = vmatpush2.bf16.msra.mxu1 %v5121_v39 }
 0x54d   : > { %v3437_v24 = vcombine.high %v3436_v41, %v3436_v41  ;;  %3449 = vst.msk [vmem:[#allocation5 + $0x12] sm:$0x3] %vm3448_vm8, %v3436_v41  ;;  %3728 = vmatprep.subr.bf16.mxu1 %v5205_v20 }
 0x54f   : > { %3450 = vst.msk [vmem:[#allocation5 + $0x1a] sm:$0x3] %vm3448_vm8, %v3437_v24 }
 0x550   : > { %3729 = vmatpush2.bf16.msra.mxu1 %v5122_v13 }
 0x551   : > { %3730 = vmatprep.subr.bf16.mxu1 %v5205_v20 }
 0x554   : > { %v3464_v25 = vld [vmem:[#allocation5 + $0x12] sm:$0x1]  ;;  %v3465_v60 = vld [vmem:[#allocation5 + $0x13] sm:$0x1]  ;;  %3731 = vmatpush2.bf16.msra.mxu1 %v5123_v35  ;;  %v3743_v35 = vld [vmem:[%s6719_s8 + $0x1] sm:$0x1] }
 0x555   : > { %3732 = vmatprep.subr.bf16.mxu1 %v5205_v20 }
 0x556   : > { %v3471_v44 = vld [vmem:[#allocation5 + $0x1b] sm:$0x1]  ;;  %v3470_v5 = vld [vmem:[#allocation5 + $0x1a] sm:$0x1] }
 0x557   : > { %v5076_v32 = vpack.i.bf16 %v3471_v44, %v3453_v9  ;;  %v5071_v59 = vpack.i.bf16 %v3470_v5, %v3452_v17 }
 0x558   : > { %3733 = vmatpush2.bf16.msra.mxu1 %v5124_v27 }
 0x559   : > { %5077 = vrot.lane.b32.xlu1 %v5076_v32, %s6774_s24  ;;  %5072 = vrot.lane.b32.xlu0 %v5071_v59, %s6775_s23 }
 0x55d   : > { %3524 = vrot.lane.b32.xlu1 %v3464_v25, %s6776_s16  ;;  %3520 = vrot.lane.b32.xlu0 %v3463_v19, %s6772_s14  ;;  %v3742_v25 = vld [vmem:[%s6719_s8] sm:$0x1] }
 0x561   : > { %3579 = vrot.lane.b32.xlu1 %v3477_v4, %s6778_s25  ;;  %3528 = vrot.lane.b32.xlu0 %v3465_v60, %s6779_s21  ;;  %s323_s21 = sand.u32 1, %s5177_s10  }
 0x562   : > { %s324_s27 = scalar_lea.vmem [#allocation6], %s323_s21  ;;  %s3750_s3 = scalar_lea.sflag [#allocation7], %s323_s21 }
 0x563   : > { %s3762_s29 = sshll.u32 %s324_s27, 4  ;;  %s3763_s29 = int_to_ptr.vmem [resolvable:$true] %s3762_s29 }
 0x564   : > { %s5125_s22 = scalar_lea.vmem %s3763_s29, 16 }
 0x565   : > { %3583 = vrot.lane.b32.xlu1 %v3478_v7, %s6780_s2  ;;  %3532 = vrot.lane.b32.xlu0 %v3466_v56, %s6781_s26  ;;  %s4148_s26 = sshll.u32 %s5292_s13, 4  ;;  %p5126_p11 = scmp.ne.s32.totalorder %s3763_s29, %s5125_s22 }
 0x566   : > { %s6676_s1 = scalar_lea.hbm %s6720_s9, %s4148_s26  ;;  %s5220_s13 = smov [#allocation6]  }
 0x567   : > { %p5127_p12 = pnand %p5126_p11, %p5309_p5  ;;  %s5129_s24 = sshll.u32 %s5220_s13, 4  ;;  %s5130_s24 = int_to_ptr.vmem [resolvable:$false] %s5129_s24 }
 0x568   : > { %s5131_s23 = scalar_lea.vmem %s5130_s24, 32  ;;  %p5132_p0 = scmp.lt.s32.totalorder %s3763_s29, %s5130_s24 }
 0x569   : > { %3536 = vrot.lane.b32.xlu0 %v3468_v58, %s6782_s4  ;;  %p5128_p13 = pneg %p5127_p12  ;;  %p5133_p1 = scmp.lt.s32.totalorder %s5131_s23, %s5125_s22 }
 0x56b   : > { %p5134_p2 = por %p5133_p1, %p5132_p0 }
 0x56d   : > { %p5135_p3 = pnand %p5134_p2, %p5128_p13 }
 0x5cb   : > { %v5073_v38 = vpop.permute.xlu0 %5072  ;;  %v5078_v20 = vpop.permute.xlu1 %5077 }
 0x5cc   : > { %v5075_v6 = vunpack.i.h.bf16 %v5073_v38  ;;  %v5074_v0 = vunpack.i.l.bf16 %v5073_v38  ;;  %v5080_v21 = vunpack.i.h.bf16 %v5078_v20  ;;  %v5079_v16 = vunpack.i.l.bf16 %v5078_v20 }
 0x5ce   : > { %v3586_v43 = vsel %vm2049_vm7, %v3469_v14, %v5075_v6  ;;  %v3539_v45 = vsel %vm2049_vm7, %v3451_v50, %v5074_v0  ;;  %vm6788_vm7 = vcmask 457728  }
 0x5cf   : > { %v3587_v51 = vsel %vm2472_vm4, %v3586_v43, %v5080_v21  ;;  %v3540_v23 = vsel %vm2472_vm4, %v3539_v45, %v5079_v16  ;;  %v3521_v33 = vpop.permute.xlu0 %3520  ;;  %v3525_v48 = vpop.permute.xlu1 %3524  ;;  %vm6790_vm0 = vmmov %vm6788_vm7 }
 0x5d0   : > { %v3588_v54 = vsel %vm1430_vm10, %v3587_v51, %v5055_v22  ;;  %v3541_v42 = vsel %vm1430_vm10, %v3540_v23, %v5054_v31  ;;  %vm6789_vm10 = vcmask 654336   ;;  %vm6792_vm4 = vmmov %vm6785_vm2 }
 0x5d1   : > { %v3542_v53 = vsel %vm2477_vm5, %v3541_v42, %v5059_v34  ;;  %v3589_v28 = vsel %vm2477_vm5, %v3588_v54, %v5060_v11  ;;  %vm3747_vm5 = vcmask 122880  }
 0x5d2   : > { %v3543_v10 = vsel %vm2480_vm6, %v3542_v53, %v5064_v61  ;;  %v3590_v49 = vsel %vm2480_vm6, %v3589_v28, %v5065_v26 }
 0x5d3   : > { %v3544_v55 = vsel %vm1854_vm3, %v3543_v10, %v5069_v57  ;;  %v3529_v15 = vpop.permute.xlu0 %3528  ;;  %v3580_v12 = vpop.permute.xlu1 %3579  ;;  %v3591_v1 = vsel %vm1854_vm3, %v3590_v49, %v5070_v30  ;;  %vm6791_vm3 = vmmov %vm6784_vm13 }
 0x5d4   : > { %v3545_v40 = vsel %vm6788_vm7, %v3544_v55, %v3505_v52  ;;  %v3592_v24 = vsel %vm6790_vm0, %v3591_v1, %v3580_v12 }
 0x5d5   : > { %v3546_v8 = vsel %vm2488_vm11, %v3545_v40, %v3509_v36 }
 0x5d6   : > { %v3547_v29 = vsel %vm2491_vm12, %v3546_v8, %v3513_v2 }
 0x5d7   : > { %v3548_v41 = vsel %vm6789_vm10, %v3547_v29, %v3517_v62  ;;  %v3533_v37 = vpop.permute.xlu0 %3532  ;;  %v3584_v9 = vpop.permute.xlu1 %3583 }
 0x5d8   : > { %v3549_v17 = vsel %vm2497_vm14, %v3548_v41, %v3521_v33  ;;  %v3593_v3 = vsel %vm2488_vm11, %v3592_v24, %v3584_v9 }
 0x5d9   : > { %v3550_v44 = vsel %vm2500_vm15, %v3549_v17, %v3525_v48  ;;  %v3595_v5 = vpack.c.bf16 %v3593_v3, %v3593_v3 }
 0x5da   : > { %v3551_v32 = vsel %vm2503_vm1, %v3550_v44, %v3529_v15 }
 0x5db   : > { %v3552_v59 = vsel %vm6791_vm3, %v3551_v32, %v3533_v37  ;;  %v3537_v39 = vpop.permute.xlu0 %3536  ;;  %4147 = vmatprep.mubr.msk.bf16.mxu1 %vm2491_vm12, %v3595_v5 }
 0x5dc   : > { %v3553_v19 = vsel %vm6792_vm4, %v3552_v59, %v3537_v39 }
 0x5dd   : > { %v3594_v13 = vpack.c.bf16 %v3553_v19, %v3553_v19 }
 0x5df   : > { %3735 = vmatmul.mubr.bf16.vlgmr.msra.gmra.mxu1 %v3594_v13 }
 0x69f   : > { %v3736_v4 = vpop.f32.mrf.mxu1 }
 0x6a0   : > { %v3744_v60 = vmul.f32 %v3742_v25, %v3736_v4 }
 0x6a1   : > { %v3738_v7 = vpop.f32.mrf.mxu1 }
 0x6a2   : > { %v3745_v56 = vadd.f32 %v3744_v60, %v3743_v35 }
 0x6a3   : > { %v3739_v27 = vpop.f32.mrf.mxu1 }
 0x6a4   : > { %v4348_v58 = vcvt.f32.s32 %v3745_v56  ;;  %v4346_v46 = vand.u32 2147483647, %v3745_v56  ;;  %v4351_v52 = vand.u32 2147483648, %v3745_v56 }
 0x6a5   : > { %v3740_v47 = vpop.f32.mrf.mxu1 }
 0x6a6   : > { %v4349_v18 = vcvt.s32.f32 %v4348_v58  ;;  %vm4347_vm6 = vcmp.lt.f32.partialorder %v4346_v46, 8388608.0 }
 0x6a8   : > { %v4350_v63 = vand.u32 2147483647, %v4349_v18 }
 0x6aa   : > { %v4352_v36 = vor.u32 %v4351_v52, %v4350_v63 }
 0x6ac   : > { %v4353_v2 = vsel %vm4347_vm6, %v4352_v36, %v3745_v56 }
 0x6ad   : > { %3748 = vst.msk [vmem:[%s324_s27] sm:$0x1] %vm3747_vm5, %v4353_v2 }
 0x6ae   : > { %5138 = shalt.err (!%p5135_p3)
}
 0x6af   : > { %s5139_s17 = scalar_lea.hbm %s6676_s1, 16  ;;  %s5143_s4 = scalar_lea.hbm %s6720_s9, 32 }
 0x6b0   : > { %p5140_p4 = scmp.ne.s32.totalorder %s6676_s1, %s5139_s17  ;;  %p5144_p9 = scmp.lt.s32.totalorder %s6676_s1, %s6720_s9 }
 0x6b1   : > { %p5145_p10 = scmp.lt.s32.totalorder %s5143_s4, %s5139_s17 }
 0x6b2   : > { %p5141_p7 = pnand %p5140_p4, %p5309_p5 }
 0x6b3   : > { %p5146_p11 = por %p5145_p10, %p5144_p9 }
 0x6b4   : > { %p5142_p8 = pneg %p5141_p7 }
 0x6b6   : > { %p5147_p12 = pnand %p5146_p11, %p5142_p8 }
 0x6b8   : > { %5150 = shalt.err (!%p5147_p12)
}
 0x6b9   : > { %4354 = dma.vmem_to_hbm [thread:$0]  (%p5309_p5), %s3763_s29, 16, %s6676_s1, %s3750_s3  }
 0x6ba PF: > { %p4360_p13 = scmp.ge.s32.totalorder %s5185_s12, 2  ;;  %s3774_s21 = sand.u32 1, %s5173_s30  }
 0x6bb   : > { %s3775_s26 = scalar_lea.sflag [#allocation7], %s3774_s21 }
 0x6bc   : > { %p4357_p0 = pnand %p4360_p13, %p5313_p6 }
 0x6be   : > { %p4358_p1 = pneg %p4357_p0 }
 0x6c0   : > { %5168 = dma.done.wait (%p4358_p1), %s3775_s26, 16  }
 0x6c1   : > { %5170 = vsyncadd (%p4358_p1), %s3775_s26, 4294967280  ;;  %p19_p2 = scmp.ge.s32.totalorder %s5296_s15, 4   ;;  %s6793_s30 = smov %s5177_s10 }
 0x6c2   : > { %s6794_s10 = smov %s5181_s11  ;;  %s6795_s11 = smov %s5307_s18 }
 0x6c3   : > { %s6796_s12 = smov %s5296_s15  ;;  %21 = sbr.rel (!%p19_p2) target bundleno = 9 (0x9), region = 442 }
 0x6c8   :  { %3779 = vsyncpa [#allocation7], 1 }
 0x6c9   :  { %3781 = vsyncpa [#allocation7 + $0x1], 1 }

</bundles_post_ra>
